<compile_context>
chip_gen: v5e
topology: v5e:2x2
jax: 0.10.0
libtpu: 0.0.40
codegen_flags: <defaults>
</compile_context>

<pallas_src>
import jax
import jax.numpy as jnp
from jax import lax
from jax.experimental import pallas as pl
from jax.experimental.pallas import tpu as pltpu

EPS = 1e-8
TOL = 1e-6
MAX_TILE_N = 512
NSLOT = 9          # intersection of two convex quads has at most 8 vertices


def _diou_kernel(b_ref, o_ref):
    tn = b_ref.shape[1]

    def row(i):
        return b_ref[i:i + 1, :]                      # (1, tn)

    px, py, pz, pw, ph, plz, pa = (row(i) for i in range(7))
    tx, ty, tz, tw, th, tlz, ta = (row(i) for i in range(7, 14))

    # angles -> cos/sin inside the kernel (EUP; removes host glue ops)
    pcos, psin = jnp.cos(pa), jnp.sin(pa)
    tcos, tsin = jnp.cos(ta), jnp.sin(ta)

    # ---- corners of both boxes packed into one (8, tn) block --------------
    # rows 0..3 = box1 corners, rows 4..7 = box2 corners
    # corner sign pattern: x: (+,-,-,+) * 0.5w ; y: (+,+,-,-) * 0.5h
    r8 = lax.broadcasted_iota(jnp.int32, (8, tn), 0)
    is1 = r8 < 4
    k4 = r8 & 3
    xsgn = jnp.where((k4 == 0) | (k4 == 3), 0.5, -0.5)
    ysgn = jnp.where(k4 < 2, 0.5, -0.5)

    def sel(a, b):                                    # rows 0..3 -> a, 4..7 -> b
        return jnp.where(is1, a, b)

    w8, h8 = sel(pw, tw), sel(ph, th)
    c8, s8 = sel(pcos, tcos), sel(psin, tsin)
    x8, y8 = sel(px, tx), sel(py, ty)
    lx = xsgn * w8
    ly = ysgn * h8
    cx = lx * c8 - ly * s8 + x8                       # (8, tn)
    cy = lx * s8 + ly * c8 + y8

    # single corner rows (reused by gathers and in-box tests)
    c1x0, c1x1, c1x2, c1x3 = (cx[i:i + 1, :] for i in range(4))
    c2x0, c2x1, c2x2, c2x3 = (cx[i:i + 1, :] for i in range(4, 8))
    c1y0, c1y1, c1y2, c1y3 = (cy[i:i + 1, :] for i in range(4))
    c2y0, c2y1, c2y2, c2y3 = (cy[i:i + 1, :] for i in range(4, 8))

    # ---- 16 edge-pair intersections (box1-edge major, box2-edge minor) ----
    r16 = lax.broadcasted_iota(jnp.int32, (16, tn), 0)
    i16 = r16 >> 2
    j16 = r16 & 3
    si0, si2, silt2 = i16 == 0, i16 == 2, i16 < 2
    sj0, sj2, sjlt2 = j16 == 0, j16 == 2, j16 < 2

    def gath(s0, s2, slt2, a0, a1, a2, a3):           # row-gather via selects
        return jnp.where(slt2, jnp.where(s0, a0, a1), jnp.where(s2, a2, a3))

    X1 = gath(si0, si2, silt2, c1x0, c1x1, c1x2, c1x3)
    Y1 = gath(si0, si2, silt2, c1y0, c1y1, c1y2, c1y3)
    X2 = gath(si0, si2, silt2, c1x1, c1x2, c1x3, c1x0)
    Y2 = gath(si0, si2, silt2, c1y1, c1y2, c1y3, c1y0)
    X3 = gath(sj0, sj2, sjlt2, c2x0, c2x1, c2x2, c2x3)
    Y3 = gath(sj0, sj2, sjlt2, c2y0, c2y1, c2y2, c2y3)
    X4 = gath(sj0, sj2, sjlt2, c2x1, c2x2, c2x3, c2x0)
    Y4 = gath(sj0, sj2, sjlt2, c2y1, c2y2, c2y3, c2y0)

    e1x, e1y = X2 - X1, Y2 - Y1
    e2x, e2y = X3 - X4, Y3 - Y4
    dx_, dy_ = X3 - X1, Y3 - Y1
    num = e1x * e2y - e1y * e2x
    den_t = dx_ * e2y - dy_ * e2x
    den_u = e1x * dy_ - e1y * dx_
    # t = den_t/num in (0,1) and u = den_u/num in (0,1), tested with sign
    # products instead of divisions (num == 0 lanes are automatically false).
    mt = (den_t * num > 0.0) & ((den_t - num) * num < 0.0)
    mu = (den_u * num > 0.0) & ((den_u - num) * num < 0.0)
    imask_f = (mt & mu).astype(jnp.float32)           # (16, tn)
    denom = num + jnp.where(num < 0.0, -EPS, EPS)     # sign-preserving EPS
    tval = den_t / denom
    ix = (X1 + tval * e1x) * imask_f
    iy = (Y1 + tval * e1y) * imask_f

    # ---- corners of one box inside the other (all 8 query corners at once)
    Ax, Ay = sel(c2x0, c1x0), sel(c2y0, c1y0)
    Bx, By = sel(c2x1, c1x1), sel(c2y1, c1y1)
    Dx, Dy = sel(c2x3, c1x3), sel(c2y3, c1y3)
    abx, aby = Bx - Ax, By - Ay
    adx, ady = Dx - Ax, Dy - Ay
    amx, amy = cx - Ax, cy - Ay
    p_ab = abx * amx + aby * amy
    n_ab = abx * abx + aby * aby
    p_ad = adx * amx + ady * amy
    n_ad = adx * adx + ady * ady
    in_ab = (p_ab > -TOL * n_ab) & (p_ab < (1.0 + TOL) * n_ab)
    in_ad = (p_ad > -TOL * n_ad) & (p_ad < (1.0 + TOL) * n_ad)
    m8f = (in_ab & in_ad).astype(jnp.float32)         # (8, tn)

    # ---- 24 candidate vertices (seams on 8-sublane boundaries) ------------
    vx = jnp.concatenate([cx, ix], axis=0)            # (24, tn)
    vy = jnp.concatenate([cy, iy], axis=0)
    m24 = jnp.concatenate([m8f, imask_f], axis=0)
    vxm = vx * m24
    vym = vy * m24

    def sum24(a):                                     # (24, tn) -> (1, tn)
        return jnp.sum(a[0:8, :] + a[8:16, :] + a[16:24, :],
                       axis=0, keepdims=True)

    nv = sum24(m24)                                   # num valid vertices
    inv_nv = pl.reciprocal(jnp.maximum(nv, 1.0), approx=True)
    mx = sum24(vxm) * inv_nv                          # centroid (only affects
    my = sum24(vym) * inv_nv                          # vertex ordering)
    cxv = vx - mx
    cyv = vy - my

    # pseudo-angle key, strictly monotone in CCW angle around the centroid
    rinv = pl.reciprocal(cxv * cxv + cyv * cyv + EPS, approx=True)
    pcv = jnp.abs(cxv) * cxv * rinv                   # sign(x) * cos^2(theta)
    key = jnp.where(cyv >= 0.0, -pcv, 2.0 + pcv)
    key = jnp.where(m24 > 0.5, key, 1e9)              # invalid -> sorts last

    # ---- angular rank (tie broken by candidate index) ----------------------
    # accumulate over candidates j: rank_i = #{j : key_j < key_i or
    #                                           (key_j == key_i and j < i)}
    idx24 = lax.broadcasted_iota(jnp.int32, (24, tn), 0)
    rank = key * 0.0
    for j in range(24):
        kj = key[j:j + 1, :]
        precedes = (kj < key) | ((kj == key) & (idx24 > j))
        rank = rank + precedes.astype(jnp.float32)

    # ---- scatter valid vertices into <=9 sorted slots; shoelace from the
    #      per-slot (1, tn) pieces (no (24, tn) xs/ys materialization) -------
    xs_l, ys_l = [], []
    for r in range(NSLOT):
        selr = rank == float(r)
        xs_l.append(sum24(jnp.where(selr, vxm, 0.0)))
        ys_l.append(sum24(jnp.where(selr, vym, 0.0)))

    shoelace = xs_l[0] * ys_l[1] - ys_l[0] * xs_l[1]
    for r in range(1, NSLOT - 1):
        shoelace = shoelace + xs_l[r] * ys_l[r + 1] - ys_l[r] * xs_l[r + 1]
    # closing edge: vertex at slot (nv - 1) back to slot 0
    xl = nv * 0.0
    yl = nv * 0.0
    for r in range(NSLOT):
        is_last = nv == float(r + 1)
        xl = xl + jnp.where(is_last, xs_l[r], 0.0)
        yl = yl + jnp.where(is_last, ys_l[r], 0.0)
    shoelace = shoelace + xl * ys_l[0] - yl * xs_l[0]
    area = jnp.abs(shoelace) * 0.5                    # 2-D intersection area

    # ---- 3-D extension + (D)IoU --------------------------------------------
    zmax1, zmin1 = pz + 0.5 * plz, pz - 0.5 * plz
    zmax2, zmin2 = tz + 0.5 * tlz, tz - 0.5 * tlz
    z_overlap = jnp.maximum(
        jnp.minimum(zmax1, zmax2) - jnp.maximum(zmin1, zmin2), 0.0)
    inter3d = area * z_overlap
    vol1 = pw * ph * plz
    vol2 = tw * th * tlz
    union3d = vol1 + vol2 - inter3d

    xmaxe = jnp.max(cx, axis=0, keepdims=True)        # enclosing 2-D box
    xmine = jnp.min(cx, axis=0, keepdims=True)
    ymaxe = jnp.max(cy, axis=0, keepdims=True)
    ymine = jnp.min(cy, axis=0, keepdims=True)
    zmaxe = jnp.maximum(zmax1, zmax2)
    zmine = jnp.minimum(zmin1, zmin2)

    # NOTE: reference uses box1[..., :3] == (x, y, w) for the center-distance
    # term; reproduced as-is.
    r2 = (px - tx) ** 2 + (py - ty) ** 2 + (pw - tw) ** 2
    c2 = (xmine - xmaxe) ** 2 + (ymine - ymaxe) ** 2 + (zmine - zmaxe) ** 2

    iou3d = inter3d / union3d
    diou = iou3d - r2 / c2
    o_ref[0:1, :] = 1.0 - diou
    o_ref[1:2, :] = 1.0 - iou3d


def _round_up(x, m):
    return ((x + m - 1) // m) * m


def _pallas_rotated_iou3d_losses(pred, target):
    """pred/target: (N, 7) boxes (x, y, z, w, h, l, alpha).

    Returns (2, N): row0 = 1 - DIoU, row1 = 1 - IoU."""
    n = int(pred.shape[0])
    n_eff = max(n, 1)
    tile = min(MAX_TILE_N, _round_up(n_eff, 128))
    npad = _round_up(n_eff, tile)

    p = pred.astype(jnp.float32)
    t = target.astype(jnp.float32)
    pad = npad - n
    if pad:
        # well-separated dummy boxes for padded lanes (avoids 0/0 there)
        dp = jnp.array([0.0, 0.0, 0.0, 1.0, 1.0, 1.0, 0.0], jnp.float32)
        dt = jnp.array([10.0, 0.0, 0.0, 1.0, 1.0, 1.0, 0.0], jnp.float32)
        p = jnp.concatenate([p, jnp.broadcast_to(dp, (pad, 7))], axis=0)
        t = jnp.concatenate([t, jnp.broadcast_to(dt, (pad, 7))], axis=0)
    feats = jnp.concatenate(
        [p, t, jnp.zeros((npad, 2), jnp.float32)], axis=1).T     # (16, npad)

    out = pl.pallas_call(
        _diou_kernel,
        out_shape=jax.ShapeDtypeStruct((2, npad), jnp.float32),
        grid_spec=pltpu.PrefetchScalarGridSpec(
            num_scalar_prefetch=0,
            grid=(npad // tile,),
            in_specs=[pl.BlockSpec((16, tile), lambda i: (0, i))],
            out_specs=pl.BlockSpec((2, tile), lambda i: (0, i))),
        compiler_params=pltpu.CompilerParams(
            dimension_semantics=("parallel",)),
        cost_estimate=pl.CostEstimate(
            flops=12_000 * npad, transcendentals=40 * npad,
            bytes_accessed=72 * npad),
    )(feats)
    return out[:, :n]


class TR3DRotatedIoU3DLoss:
    """JAX/Pallas port of TR3DRotatedIoU3DLoss (no learnable parameters)."""

    def __init__(self, mode='diou', reduction='mean', loss_weight=1.0):
        assert mode in ('iou', 'diou')
        assert reduction in ('none', 'sum', 'mean')
        self.mode = mode
        self.reduction = reduction
        self.loss_weight = loss_weight

    def __call__(self, pred, target, weight=None, avg_factor=None,
                 reduction_override=None, **kwargs):
        if weight is not None:
            # Reference early-exit; only taken when `weight` is concrete so the
            # wrapper stays trace/jit friendly.
            try:
                if not bool(jnp.any(weight > 0)):
                    return pred.sum() * weight.sum()
            except jax.errors.ConcretizationTypeError:
                pass
        assert reduction_override in (None, 'none', 'mean', 'sum')
        reduction = reduction_override if reduction_override else self.reduction
        if weight is not None and weight.ndim > 1:
            weight = weight.mean(-1)

        losses = _pallas_rotated_iou3d_losses(pred, target)
        loss = losses[0] if self.mode == 'diou' else losses[1]   # (N,)

        if weight is not None:
            loss = loss * weight
        if avg_factor is None:
            if reduction == 'mean':
                loss = loss.mean()
            elif reduction == 'sum':
                loss = loss.sum()
        else:
            if reduction == 'mean':
                loss = loss.sum() / (avg_factor + float(jnp.finfo(jnp.float32).eps))
            elif reduction != 'none':
                raise ValueError('avg_factor can not be used with reduction="sum"')
        return self.loss_weight * loss


if __name__ == "__main__":
    key = jax.random.PRNGKey(0)
    k1, k2, k3, k4, k5, k6 = jax.random.split(key, 6)
    N = 32  # number of (pred, target) box pairs

    def make_boxes(kc, ks, ka):
        centers = jax.random.uniform(kc, (N, 3), minval=-1.0, maxval=1.0)
        sizes = jax.random.uniform(ks, (N, 3), minval=0.5, maxval=1.5)
        alpha = jax.random.uniform(ka, (N, 1), minval=-3.0, maxval=3.0)
        return jnp.concatenate([centers, sizes, alpha], axis=1).astype(jnp.float32)

    pred = make_boxes(k1, k2, k3)
    # targets = perturbed preds so boxes genuinely overlap
    target = make_boxes(k4, k5, k6)
    target = target.at[:, :3].set(pred[:, :3] + 0.1 * target[:, :3])
    target = target.at[:, 3:6].set(
        pred[:, 3:6] * (0.8 + 0.2 * jax.random.uniform(k6, (N, 3))))

    loss_fn = TR3DRotatedIoU3DLoss(mode='diou', reduction='mean', loss_weight=1.0)
    loss = loss_fn(pred, target)
    jax.block_until_ready(loss)
    print("KERNEL_OK")
</pallas_src>

<mosaic_0001>
module attributes {stable_mosaic.version = 11 : i64} {
  func.func @_diou_kernel(%arg0: i32, %arg1: memref<16x128xf32, #tpu.memory_space<vmem>>, %arg2: memref<2x128xf32, #tpu.memory_space<vmem>>) attributes {dimension_semantics = [#tpu.dimension_semantics<parallel>], iteration_bounds = array<i64: 1>, scalar_prefetch = 0 : i64, scratch_operands = 0 : i64, tpu.core_type = #tpu.core_type<tc>, window_params = [{transform_indices = @transform_0, window_bounds = array<i64: 16, 128>}, {transform_indices = @transform_1, window_bounds = array<i64: 2, 128>}]} {
    %c0 = arith.constant 0 : index
    %c0_0 = arith.constant 0 : index
    %0 = vector.load %arg1[%c0, %c0_0] : memref<16x128xf32, #tpu.memory_space<vmem>>, vector<1x128xf32>
    %c1 = arith.constant 1 : index
    %c0_1 = arith.constant 0 : index
    %1 = vector.load %arg1[%c1, %c0_1] : memref<16x128xf32, #tpu.memory_space<vmem>>, vector<1x128xf32>
    %c2 = arith.constant 2 : index
    %c0_2 = arith.constant 0 : index
    %2 = vector.load %arg1[%c2, %c0_2] : memref<16x128xf32, #tpu.memory_space<vmem>>, vector<1x128xf32>
    %c3 = arith.constant 3 : index
    %c0_3 = arith.constant 0 : index
    %3 = vector.load %arg1[%c3, %c0_3] : memref<16x128xf32, #tpu.memory_space<vmem>>, vector<1x128xf32>
    %c4 = arith.constant 4 : index
    %c0_4 = arith.constant 0 : index
    %4 = vector.load %arg1[%c4, %c0_4] : memref<16x128xf32, #tpu.memory_space<vmem>>, vector<1x128xf32>
    %c5 = arith.constant 5 : index
    %c0_5 = arith.constant 0 : index
    %5 = vector.load %arg1[%c5, %c0_5] : memref<16x128xf32, #tpu.memory_space<vmem>>, vector<1x128xf32>
    %c6 = arith.constant 6 : index
    %c0_6 = arith.constant 0 : index
    %6 = vector.load %arg1[%c6, %c0_6] : memref<16x128xf32, #tpu.memory_space<vmem>>, vector<1x128xf32>
    %c7 = arith.constant 7 : index
    %c0_7 = arith.constant 0 : index
    %7 = vector.load %arg1[%c7, %c0_7] : memref<16x128xf32, #tpu.memory_space<vmem>>, vector<1x128xf32>
    %c8 = arith.constant 8 : index
    %c0_8 = arith.constant 0 : index
    %8 = vector.load %arg1[%c8, %c0_8] : memref<16x128xf32, #tpu.memory_space<vmem>>, vector<1x128xf32>
    %c9 = arith.constant 9 : index
    %c0_9 = arith.constant 0 : index
    %9 = vector.load %arg1[%c9, %c0_9] : memref<16x128xf32, #tpu.memory_space<vmem>>, vector<1x128xf32>
    %c10 = arith.constant 10 : index
    %c0_10 = arith.constant 0 : index
    %10 = vector.load %arg1[%c10, %c0_10] : memref<16x128xf32, #tpu.memory_space<vmem>>, vector<1x128xf32>
    %c11 = arith.constant 11 : index
    %c0_11 = arith.constant 0 : index
    %11 = vector.load %arg1[%c11, %c0_11] : memref<16x128xf32, #tpu.memory_space<vmem>>, vector<1x128xf32>
    %c12 = arith.constant 12 : index
    %c0_12 = arith.constant 0 : index
    %12 = vector.load %arg1[%c12, %c0_12] : memref<16x128xf32, #tpu.memory_space<vmem>>, vector<1x128xf32>
    %c13 = arith.constant 13 : index
    %c0_13 = arith.constant 0 : index
    %13 = vector.load %arg1[%c13, %c0_13] : memref<16x128xf32, #tpu.memory_space<vmem>>, vector<1x128xf32>
    %14 = math.cos %6 : vector<1x128xf32>
    %15 = math.sin %6 : vector<1x128xf32>
    %16 = math.cos %13 : vector<1x128xf32>
    %17 = math.sin %13 : vector<1x128xf32>
    %18 = tpu.iota {dimensions = array<i32: 0>} : vector<8x128xi32>
    %c4_i32 = arith.constant 4 : i32
    %19 = vector.broadcast %c4_i32 : i32 to vector<8x128xi32>
    %20 = arith.cmpi slt, %18, %19 : vector<8x128xi32>
    %c3_i32 = arith.constant 3 : i32
    %21 = vector.broadcast %c3_i32 : i32 to vector<8x128xi32>
    %22 = arith.andi %18, %21 : vector<8x128xi32>
    %c0_i32 = arith.constant 0 : i32
    %23 = vector.broadcast %c0_i32 : i32 to vector<8x128xi32>
    %24 = arith.cmpi eq, %22, %23 : vector<8x128xi32>
    %c3_i32_14 = arith.constant 3 : i32
    %25 = vector.broadcast %c3_i32_14 : i32 to vector<8x128xi32>
    %26 = arith.cmpi eq, %22, %25 : vector<8x128xi32>
    %27 = arith.ori %24, %26 : vector<8x128xi1>
    %cst = arith.constant 5.000000e-01 : f32
    %cst_15 = arith.constant -5.000000e-01 : f32
    %28 = vector.broadcast %cst : f32 to vector<8x128xf32>
    %29 = vector.broadcast %cst_15 : f32 to vector<8x128xf32>
    %30 = arith.select %27, %28, %29 : vector<8x128xi1>, vector<8x128xf32>
    %c2_i32 = arith.constant 2 : i32
    %31 = vector.broadcast %c2_i32 : i32 to vector<8x128xi32>
    %32 = arith.cmpi slt, %22, %31 : vector<8x128xi32>
    %cst_16 = arith.constant 5.000000e-01 : f32
    %cst_17 = arith.constant -5.000000e-01 : f32
    %33 = vector.broadcast %cst_16 : f32 to vector<8x128xf32>
    %34 = vector.broadcast %cst_17 : f32 to vector<8x128xf32>
    %35 = arith.select %32, %33, %34 : vector<8x128xi1>, vector<8x128xf32>
    %36 = vector.shape_cast %3 : vector<1x128xf32> to vector<1x128xf32>
    %37 = vector.broadcast %36 : vector<1x128xf32> to vector<8x128xf32>
    %38 = vector.shape_cast %10 : vector<1x128xf32> to vector<1x128xf32>
    %39 = vector.broadcast %38 : vector<1x128xf32> to vector<8x128xf32>
    %40 = arith.select %20, %37, %39 : vector<8x128xi1>, vector<8x128xf32>
    %41 = vector.shape_cast %4 : vector<1x128xf32> to vector<1x128xf32>
    %42 = vector.broadcast %41 : vector<1x128xf32> to vector<8x128xf32>
    %43 = vector.shape_cast %11 : vector<1x128xf32> to vector<1x128xf32>
    %44 = vector.broadcast %43 : vector<1x128xf32> to vector<8x128xf32>
    %45 = arith.select %20, %42, %44 : vector<8x128xi1>, vector<8x128xf32>
    %46 = vector.shape_cast %14 : vector<1x128xf32> to vector<1x128xf32>
    %47 = vector.broadcast %46 : vector<1x128xf32> to vector<8x128xf32>
    %48 = vector.shape_cast %16 : vector<1x128xf32> to vector<1x128xf32>
    %49 = vector.broadcast %48 : vector<1x128xf32> to vector<8x128xf32>
    %50 = arith.select %20, %47, %49 : vector<8x128xi1>, vector<8x128xf32>
    %51 = vector.shape_cast %15 : vector<1x128xf32> to vector<1x128xf32>
    %52 = vector.broadcast %51 : vector<1x128xf32> to vector<8x128xf32>
    %53 = vector.shape_cast %17 : vector<1x128xf32> to vector<1x128xf32>
    %54 = vector.broadcast %53 : vector<1x128xf32> to vector<8x128xf32>
    %55 = arith.select %20, %52, %54 : vector<8x128xi1>, vector<8x128xf32>
    %56 = vector.shape_cast %0 : vector<1x128xf32> to vector<1x128xf32>
    %57 = vector.broadcast %56 : vector<1x128xf32> to vector<8x128xf32>
    %58 = vector.shape_cast %7 : vector<1x128xf32> to vector<1x128xf32>
    %59 = vector.broadcast %58 : vector<1x128xf32> to vector<8x128xf32>
    %60 = arith.select %20, %57, %59 : vector<8x128xi1>, vector<8x128xf32>
    %61 = vector.shape_cast %1 : vector<1x128xf32> to vector<1x128xf32>
    %62 = vector.broadcast %61 : vector<1x128xf32> to vector<8x128xf32>
    %63 = vector.shape_cast %8 : vector<1x128xf32> to vector<1x128xf32>
    %64 = vector.broadcast %63 : vector<1x128xf32> to vector<8x128xf32>
    %65 = arith.select %20, %62, %64 : vector<8x128xi1>, vector<8x128xf32>
    %66 = arith.mulf %30, %40 : vector<8x128xf32>
    %67 = arith.mulf %35, %45 : vector<8x128xf32>
    %68 = arith.mulf %66, %50 : vector<8x128xf32>
    %69 = arith.mulf %67, %55 : vector<8x128xf32>
    %70 = arith.subf %68, %69 : vector<8x128xf32>
    %71 = arith.addf %70, %60 : vector<8x128xf32>
    %72 = arith.mulf %66, %55 : vector<8x128xf32>
    %73 = arith.mulf %67, %50 : vector<8x128xf32>
    %74 = arith.addf %72, %73 : vector<8x128xf32>
    %75 = arith.addf %74, %65 : vector<8x128xf32>
    %76 = vector.extract_strided_slice %71 {offsets = [0, 0], sizes = [1, 128], strides = [1, 1]} : vector<8x128xf32> to vector<1x128xf32>
    %77 = vector.extract_strided_slice %71 {offsets = [1, 0], sizes = [1, 128], strides = [1, 1]} : vector<8x128xf32> to vector<1x128xf32>
    %78 = vector.extract_strided_slice %71 {offsets = [2, 0], sizes = [1, 128], strides = [1, 1]} : vector<8x128xf32> to vector<1x128xf32>
    %79 = vector.extract_strided_slice %71 {offsets = [3, 0], sizes = [1, 128], strides = [1, 1]} : vector<8x128xf32> to vector<1x128xf32>
    %80 = vector.extract_strided_slice %71 {offsets = [4, 0], sizes = [1, 128], strides = [1, 1]} : vector<8x128xf32> to vector<1x128xf32>
    %81 = vector.extract_strided_slice %71 {offsets = [5, 0], sizes = [1, 128], strides = [1, 1]} : vector<8x128xf32> to vector<1x128xf32>
    %82 = vector.extract_strided_slice %71 {offsets = [6, 0], sizes = [1, 128], strides = [1, 1]} : vector<8x128xf32> to vector<1x128xf32>
    %83 = vector.extract_strided_slice %71 {offsets = [7, 0], sizes = [1, 128], strides = [1, 1]} : vector<8x128xf32> to vector<1x128xf32>
    %84 = vector.extract_strided_slice %75 {offsets = [0, 0], sizes = [1, 128], strides = [1, 1]} : vector<8x128xf32> to vector<1x128xf32>
    %85 = vector.extract_strided_slice %75 {offsets = [1, 0], sizes = [1, 128], strides = [1, 1]} : vector<8x128xf32> to vector<1x128xf32>
    %86 = vector.extract_strided_slice %75 {offsets = [2, 0], sizes = [1, 128], strides = [1, 1]} : vector<8x128xf32> to vector<1x128xf32>
    %87 = vector.extract_strided_slice %75 {offsets = [3, 0], sizes = [1, 128], strides = [1, 1]} : vector<8x128xf32> to vector<1x128xf32>
    %88 = vector.extract_strided_slice %75 {offsets = [4, 0], sizes = [1, 128], strides = [1, 1]} : vector<8x128xf32> to vector<1x128xf32>
    %89 = vector.extract_strided_slice %75 {offsets = [5, 0], sizes = [1, 128], strides = [1, 1]} : vector<8x128xf32> to vector<1x128xf32>
    %90 = vector.extract_strided_slice %75 {offsets = [6, 0], sizes = [1, 128], strides = [1, 1]} : vector<8x128xf32> to vector<1x128xf32>
    %91 = vector.extract_strided_slice %75 {offsets = [7, 0], sizes = [1, 128], strides = [1, 1]} : vector<8x128xf32> to vector<1x128xf32>
    %92 = tpu.iota {dimensions = array<i32: 0>} : vector<16x128xi32>
    %c2_i32_18 = arith.constant 2 : i32
    %93 = vector.broadcast %c2_i32_18 : i32 to vector<16x128xi32>
    %94 = arith.shrsi %92, %93 : vector<16x128xi32>
    %c3_i32_19 = arith.constant 3 : i32
    %95 = vector.broadcast %c3_i32_19 : i32 to vector<16x128xi32>
    %96 = arith.andi %92, %95 : vector<16x128xi32>
    %c0_i32_20 = arith.constant 0 : i32
    %97 = vector.broadcast %c0_i32_20 : i32 to vector<16x128xi32>
    %98 = arith.cmpi eq, %94, %97 : vector<16x128xi32>
    %c2_i32_21 = arith.constant 2 : i32
    %99 = vector.broadcast %c2_i32_21 : i32 to vector<16x128xi32>
    %100 = arith.cmpi eq, %94, %99 : vector<16x128xi32>
    %c2_i32_22 = arith.constant 2 : i32
    %101 = vector.broadcast %c2_i32_22 : i32 to vector<16x128xi32>
    %102 = arith.cmpi slt, %94, %101 : vector<16x128xi32>
    %c0_i32_23 = arith.constant 0 : i32
    %103 = vector.broadcast %c0_i32_23 : i32 to vector<16x128xi32>
    %104 = arith.cmpi eq, %96, %103 : vector<16x128xi32>
    %c2_i32_24 = arith.constant 2 : i32
    %105 = vector.broadcast %c2_i32_24 : i32 to vector<16x128xi32>
    %106 = arith.cmpi eq, %96, %105 : vector<16x128xi32>
    %c2_i32_25 = arith.constant 2 : i32
    %107 = vector.broadcast %c2_i32_25 : i32 to vector<16x128xi32>
    %108 = arith.cmpi slt, %96, %107 : vector<16x128xi32>
    %109 = vector.shape_cast %76 : vector<1x128xf32> to vector<1x128xf32>
    %110 = vector.broadcast %109 : vector<1x128xf32> to vector<16x128xf32>
    %111 = vector.shape_cast %77 : vector<1x128xf32> to vector<1x128xf32>
    %112 = vector.broadcast %111 : vector<1x128xf32> to vector<16x128xf32>
    %113 = arith.select %98, %110, %112 : vector<16x128xi1>, vector<16x128xf32>
    %114 = vector.shape_cast %78 : vector<1x128xf32> to vector<1x128xf32>
    %115 = vector.broadcast %114 : vector<1x128xf32> to vector<16x128xf32>
    %116 = vector.shape_cast %79 : vector<1x128xf32> to vector<1x128xf32>
    %117 = vector.broadcast %116 : vector<1x128xf32> to vector<16x128xf32>
    %118 = arith.select %100, %115, %117 : vector<16x128xi1>, vector<16x128xf32>
    %119 = arith.select %102, %113, %118 : vector<16x128xi1>, vector<16x128xf32>
    %120 = vector.shape_cast %84 : vector<1x128xf32> to vector<1x128xf32>
    %121 = vector.broadcast %120 : vector<1x128xf32> to vector<16x128xf32>
    %122 = vector.shape_cast %85 : vector<1x128xf32> to vector<1x128xf32>
    %123 = vector.broadcast %122 : vector<1x128xf32> to vector<16x128xf32>
    %124 = arith.select %98, %121, %123 : vector<16x128xi1>, vector<16x128xf32>
    %125 = vector.shape_cast %86 : vector<1x128xf32> to vector<1x128xf32>
    %126 = vector.broadcast %125 : vector<1x128xf32> to vector<16x128xf32>
    %127 = vector.shape_cast %87 : vector<1x128xf32> to vector<1x128xf32>
    %128 = vector.broadcast %127 : vector<1x128xf32> to vector<16x128xf32>
    %129 = arith.select %100, %126, %128 : vector<16x128xi1>, vector<16x128xf32>
    %130 = arith.select %102, %124, %129 : vector<16x128xi1>, vector<16x128xf32>
    %131 = vector.shape_cast %77 : vector<1x128xf32> to vector<1x128xf32>
    %132 = vector.broadcast %131 : vector<1x128xf32> to vector<16x128xf32>
    %133 = vector.shape_cast %78 : vector<1x128xf32> to vector<1x128xf32>
    %134 = vector.broadcast %133 : vector<1x128xf32> to vector<16x128xf32>
    %135 = arith.select %98, %132, %134 : vector<16x128xi1>, vector<16x128xf32>
    %136 = vector.shape_cast %79 : vector<1x128xf32> to vector<1x128xf32>
    %137 = vector.broadcast %136 : vector<1x128xf32> to vector<16x128xf32>
    %138 = vector.shape_cast %76 : vector<1x128xf32> to vector<1x128xf32>
    %139 = vector.broadcast %138 : vector<1x128xf32> to vector<16x128xf32>
    %140 = arith.select %100, %137, %139 : vector<16x128xi1>, vector<16x128xf32>
    %141 = arith.select %102, %135, %140 : vector<16x128xi1>, vector<16x128xf32>
    %142 = vector.shape_cast %85 : vector<1x128xf32> to vector<1x128xf32>
    %143 = vector.broadcast %142 : vector<1x128xf32> to vector<16x128xf32>
    %144 = vector.shape_cast %86 : vector<1x128xf32> to vector<1x128xf32>
    %145 = vector.broadcast %144 : vector<1x128xf32> to vector<16x128xf32>
    %146 = arith.select %98, %143, %145 : vector<16x128xi1>, vector<16x128xf32>
    %147 = vector.shape_cast %87 : vector<1x128xf32> to vector<1x128xf32>
    %148 = vector.broadcast %147 : vector<1x128xf32> to vector<16x128xf32>
    %149 = vector.shape_cast %84 : vector<1x128xf32> to vector<1x128xf32>
    %150 = vector.broadcast %149 : vector<1x128xf32> to vector<16x128xf32>
    %151 = arith.select %100, %148, %150 : vector<16x128xi1>, vector<16x128xf32>
    %152 = arith.select %102, %146, %151 : vector<16x128xi1>, vector<16x128xf32>
    %153 = vector.shape_cast %80 : vector<1x128xf32> to vector<1x128xf32>
    %154 = vector.broadcast %153 : vector<1x128xf32> to vector<16x128xf32>
    %155 = vector.shape_cast %81 : vector<1x128xf32> to vector<1x128xf32>
    %156 = vector.broadcast %155 : vector<1x128xf32> to vector<16x128xf32>
    %157 = arith.select %104, %154, %156 : vector<16x128xi1>, vector<16x128xf32>
    %158 = vector.shape_cast %82 : vector<1x128xf32> to vector<1x128xf32>
    %159 = vector.broadcast %158 : vector<1x128xf32> to vector<16x128xf32>
    %160 = vector.shape_cast %83 : vector<1x128xf32> to vector<1x128xf32>
    %161 = vector.broadcast %160 : vector<1x128xf32> to vector<16x128xf32>
    %162 = arith.select %106, %159, %161 : vector<16x128xi1>, vector<16x128xf32>
    %163 = arith.select %108, %157, %162 : vector<16x128xi1>, vector<16x128xf32>
    %164 = vector.shape_cast %88 : vector<1x128xf32> to vector<1x128xf32>
    %165 = vector.broadcast %164 : vector<1x128xf32> to vector<16x128xf32>
    %166 = vector.shape_cast %89 : vector<1x128xf32> to vector<1x128xf32>
    %167 = vector.broadcast %166 : vector<1x128xf32> to vector<16x128xf32>
    %168 = arith.select %104, %165, %167 : vector<16x128xi1>, vector<16x128xf32>
    %169 = vector.shape_cast %90 : vector<1x128xf32> to vector<1x128xf32>
    %170 = vector.broadcast %169 : vector<1x128xf32> to vector<16x128xf32>
    %171 = vector.shape_cast %91 : vector<1x128xf32> to vector<1x128xf32>
    %172 = vector.broadcast %171 : vector<1x128xf32> to vector<16x128xf32>
    %173 = arith.select %106, %170, %172 : vector<16x128xi1>, vector<16x128xf32>
    %174 = arith.select %108, %168, %173 : vector<16x128xi1>, vector<16x128xf32>
    %175 = vector.shape_cast %81 : vector<1x128xf32> to vector<1x128xf32>
    %176 = vector.broadcast %175 : vector<1x128xf32> to vector<16x128xf32>
    %177 = vector.shape_cast %82 : vector<1x128xf32> to vector<1x128xf32>
    %178 = vector.broadcast %177 : vector<1x128xf32> to vector<16x128xf32>
    %179 = arith.select %104, %176, %178 : vector<16x128xi1>, vector<16x128xf32>
    %180 = vector.shape_cast %83 : vector<1x128xf32> to vector<1x128xf32>
    %181 = vector.broadcast %180 : vector<1x128xf32> to vector<16x128xf32>
    %182 = vector.shape_cast %80 : vector<1x128xf32> to vector<1x128xf32>
    %183 = vector.broadcast %182 : vector<1x128xf32> to vector<16x128xf32>
    %184 = arith.select %106, %181, %183 : vector<16x128xi1>, vector<16x128xf32>
    %185 = arith.select %108, %179, %184 : vector<16x128xi1>, vector<16x128xf32>
    %186 = vector.shape_cast %89 : vector<1x128xf32> to vector<1x128xf32>
    %187 = vector.broadcast %186 : vector<1x128xf32> to vector<16x128xf32>
    %188 = vector.shape_cast %90 : vector<1x128xf32> to vector<1x128xf32>
    %189 = vector.broadcast %188 : vector<1x128xf32> to vector<16x128xf32>
    %190 = arith.select %104, %187, %189 : vector<16x128xi1>, vector<16x128xf32>
    %191 = vector.shape_cast %91 : vector<1x128xf32> to vector<1x128xf32>
    %192 = vector.broadcast %191 : vector<1x128xf32> to vector<16x128xf32>
    %193 = vector.shape_cast %88 : vector<1x128xf32> to vector<1x128xf32>
    %194 = vector.broadcast %193 : vector<1x128xf32> to vector<16x128xf32>
    %195 = arith.select %106, %192, %194 : vector<16x128xi1>, vector<16x128xf32>
    %196 = arith.select %108, %190, %195 : vector<16x128xi1>, vector<16x128xf32>
    %197 = arith.subf %141, %119 : vector<16x128xf32>
    %198 = arith.subf %152, %130 : vector<16x128xf32>
    %199 = arith.subf %163, %185 : vector<16x128xf32>
    %200 = arith.subf %174, %196 : vector<16x128xf32>
    %201 = arith.subf %163, %119 : vector<16x128xf32>
    %202 = arith.subf %174, %130 : vector<16x128xf32>
    %203 = arith.mulf %197, %200 : vector<16x128xf32>
    %204 = arith.mulf %198, %199 : vector<16x128xf32>
    %205 = arith.subf %203, %204 : vector<16x128xf32>
    %206 = arith.mulf %201, %200 : vector<16x128xf32>
    %207 = arith.mulf %202, %199 : vector<16x128xf32>
    %208 = arith.subf %206, %207 : vector<16x128xf32>
    %209 = arith.mulf %197, %202 : vector<16x128xf32>
    %210 = arith.mulf %198, %201 : vector<16x128xf32>
    %211 = arith.subf %209, %210 : vector<16x128xf32>
    %212 = arith.mulf %208, %205 : vector<16x128xf32>
    %cst_26 = arith.constant 0.000000e+00 : f32
    %213 = vector.broadcast %cst_26 : f32 to vector<16x128xf32>
    %214 = arith.cmpf ogt, %212, %213 : vector<16x128xf32>
    %215 = arith.subf %208, %205 : vector<16x128xf32>
    %216 = arith.mulf %215, %205 : vector<16x128xf32>
    %cst_27 = arith.constant 0.000000e+00 : f32
    %217 = vector.broadcast %cst_27 : f32 to vector<16x128xf32>
    %218 = arith.cmpf olt, %216, %217 : vector<16x128xf32>
    %219 = arith.andi %214, %218 : vector<16x128xi1>
    %220 = arith.mulf %211, %205 : vector<16x128xf32>
    %cst_28 = arith.constant 0.000000e+00 : f32
    %221 = vector.broadcast %cst_28 : f32 to vector<16x128xf32>
    %222 = arith.cmpf ogt, %220, %221 : vector<16x128xf32>
    %223 = arith.subf %211, %205 : vector<16x128xf32>
    %224 = arith.mulf %223, %205 : vector<16x128xf32>
    %cst_29 = arith.constant 0.000000e+00 : f32
    %225 = vector.broadcast %cst_29 : f32 to vector<16x128xf32>
    %226 = arith.cmpf olt, %224, %225 : vector<16x128xf32>
    %227 = arith.andi %222, %226 : vector<16x128xi1>
    %228 = arith.andi %219, %227 : vector<16x128xi1>
    %229 = arith.extui %228 : vector<16x128xi1> to vector<16x128xi32>
    %230 = arith.sitofp %229 : vector<16x128xi32> to vector<16x128xf32>
    %cst_30 = arith.constant 0.000000e+00 : f32
    %231 = vector.broadcast %cst_30 : f32 to vector<16x128xf32>
    %232 = arith.cmpf olt, %205, %231 : vector<16x128xf32>
    %cst_31 = arith.constant -9.99999993E-9 : f32
    %cst_32 = arith.constant 9.99999993E-9 : f32
    %233 = vector.broadcast %cst_31 : f32 to vector<16x128xf32>
    %234 = vector.broadcast %cst_32 : f32 to vector<16x128xf32>
    %235 = arith.select %232, %233, %234 : vector<16x128xi1>, vector<16x128xf32>
    %236 = arith.addf %205, %235 : vector<16x128xf32>
    %237 = arith.divf %208, %236 : vector<16x128xf32>
    %238 = arith.mulf %237, %197 : vector<16x128xf32>
    %239 = arith.addf %119, %238 : vector<16x128xf32>
    %240 = arith.mulf %239, %230 : vector<16x128xf32>
    %241 = arith.mulf %237, %198 : vector<16x128xf32>
    %242 = arith.addf %130, %241 : vector<16x128xf32>
    %243 = arith.mulf %242, %230 : vector<16x128xf32>
    %244 = vector.shape_cast %80 : vector<1x128xf32> to vector<1x128xf32>
    %245 = vector.broadcast %244 : vector<1x128xf32> to vector<8x128xf32>
    %246 = vector.shape_cast %76 : vector<1x128xf32> to vector<1x128xf32>
    %247 = vector.broadcast %246 : vector<1x128xf32> to vector<8x128xf32>
    %248 = arith.select %20, %245, %247 : vector<8x128xi1>, vector<8x128xf32>
    %249 = vector.shape_cast %88 : vector<1x128xf32> to vector<1x128xf32>
    %250 = vector.broadcast %249 : vector<1x128xf32> to vector<8x128xf32>
    %251 = vector.shape_cast %84 : vector<1x128xf32> to vector<1x128xf32>
    %252 = vector.broadcast %251 : vector<1x128xf32> to vector<8x128xf32>
    %253 = arith.select %20, %250, %252 : vector<8x128xi1>, vector<8x128xf32>
    %254 = vector.shape_cast %81 : vector<1x128xf32> to vector<1x128xf32>
    %255 = vector.broadcast %254 : vector<1x128xf32> to vector<8x128xf32>
    %256 = vector.shape_cast %77 : vector<1x128xf32> to vector<1x128xf32>
    %257 = vector.broadcast %256 : vector<1x128xf32> to vector<8x128xf32>
    %258 = arith.select %20, %255, %257 : vector<8x128xi1>, vector<8x128xf32>
    %259 = vector.shape_cast %89 : vector<1x128xf32> to vector<1x128xf32>
    %260 = vector.broadcast %259 : vector<1x128xf32> to vector<8x128xf32>
    %261 = vector.shape_cast %85 : vector<1x128xf32> to vector<1x128xf32>
    %262 = vector.broadcast %261 : vector<1x128xf32> to vector<8x128xf32>
    %263 = arith.select %20, %260, %262 : vector<8x128xi1>, vector<8x128xf32>
    %264 = vector.shape_cast %83 : vector<1x128xf32> to vector<1x128xf32>
    %265 = vector.broadcast %264 : vector<1x128xf32> to vector<8x128xf32>
    %266 = vector.shape_cast %79 : vector<1x128xf32> to vector<1x128xf32>
    %267 = vector.broadcast %266 : vector<1x128xf32> to vector<8x128xf32>
    %268 = arith.select %20, %265, %267 : vector<8x128xi1>, vector<8x128xf32>
    %269 = vector.shape_cast %91 : vector<1x128xf32> to vector<1x128xf32>
    %270 = vector.broadcast %269 : vector<1x128xf32> to vector<8x128xf32>
    %271 = vector.shape_cast %87 : vector<1x128xf32> to vector<1x128xf32>
    %272 = vector.broadcast %271 : vector<1x128xf32> to vector<8x128xf32>
    %273 = arith.select %20, %270, %272 : vector<8x128xi1>, vector<8x128xf32>
    %274 = arith.subf %258, %248 : vector<8x128xf32>
    %275 = arith.subf %263, %253 : vector<8x128xf32>
    %276 = arith.subf %268, %248 : vector<8x128xf32>
    %277 = arith.subf %273, %253 : vector<8x128xf32>
    %278 = arith.subf %71, %248 : vector<8x128xf32>
    %279 = arith.subf %75, %253 : vector<8x128xf32>
    %280 = arith.mulf %274, %278 : vector<8x128xf32>
    %281 = arith.mulf %275, %279 : vector<8x128xf32>
    %282 = arith.addf %280, %281 : vector<8x128xf32>
    %283 = arith.mulf %274, %274 : vector<8x128xf32>
    %284 = arith.mulf %275, %275 : vector<8x128xf32>
    %285 = arith.addf %283, %284 : vector<8x128xf32>
    %286 = arith.mulf %276, %278 : vector<8x128xf32>
    %287 = arith.mulf %277, %279 : vector<8x128xf32>
    %288 = arith.addf %286, %287 : vector<8x128xf32>
    %289 = arith.mulf %276, %276 : vector<8x128xf32>
    %290 = arith.mulf %277, %277 : vector<8x128xf32>
    %291 = arith.addf %289, %290 : vector<8x128xf32>
    %cst_33 = arith.constant -9.99999997E-7 : f32
    %292 = vector.broadcast %cst_33 : f32 to vector<8x128xf32>
    %293 = arith.mulf %292, %285 : vector<8x128xf32>
    %294 = arith.cmpf ogt, %282, %293 : vector<8x128xf32>
    %cst_34 = arith.constant 1.00000095 : f32
    %295 = vector.broadcast %cst_34 : f32 to vector<8x128xf32>
    %296 = arith.mulf %295, %285 : vector<8x128xf32>
    %297 = arith.cmpf olt, %282, %296 : vector<8x128xf32>
    %298 = arith.andi %294, %297 : vector<8x128xi1>
    %cst_35 = arith.constant -9.99999997E-7 : f32
    %299 = vector.broadcast %cst_35 : f32 to vector<8x128xf32>
    %300 = arith.mulf %299, %291 : vector<8x128xf32>
    %301 = arith.cmpf ogt, %288, %300 : vector<8x128xf32>
    %cst_36 = arith.constant 1.00000095 : f32
    %302 = vector.broadcast %cst_36 : f32 to vector<8x128xf32>
    %303 = arith.mulf %302, %291 : vector<8x128xf32>
    %304 = arith.cmpf olt, %288, %303 : vector<8x128xf32>
    %305 = arith.andi %301, %304 : vector<8x128xi1>
    %306 = arith.andi %298, %305 : vector<8x128xi1>
    %307 = arith.extui %306 : vector<8x128xi1> to vector<8x128xi32>
    %308 = arith.sitofp %307 : vector<8x128xi32> to vector<8x128xf32>
    %309 = tpu.concatenate %71, %240 in 0 : vector<8x128xf32>, vector<16x128xf32> -> vector<24x128xf32>
    %310 = tpu.concatenate %75, %243 in 0 : vector<8x128xf32>, vector<16x128xf32> -> vector<24x128xf32>
    %311 = tpu.concatenate %308, %230 in 0 : vector<8x128xf32>, vector<16x128xf32> -> vector<24x128xf32>
    %312 = arith.mulf %309, %311 : vector<24x128xf32>
    %313 = arith.mulf %310, %311 : vector<24x128xf32>
    %314 = vector.extract_strided_slice %311 {offsets = [0, 0], sizes = [8, 128], strides = [1, 1]} : vector<24x128xf32> to vector<8x128xf32>
    %315 = vector.extract_strided_slice %311 {offsets = [8, 0], sizes = [8, 128], strides = [1, 1]} : vector<24x128xf32> to vector<8x128xf32>
    %316 = arith.addf %314, %315 : vector<8x128xf32>
    %317 = vector.extract_strided_slice %311 {offsets = [16, 0], sizes = [8, 128], strides = [1, 1]} : vector<24x128xf32> to vector<8x128xf32>
    %318 = arith.addf %316, %317 : vector<8x128xf32>
    %cst_37 = arith.constant dense<0.000000e+00> : vector<128xf32>
    %319 = vector.multi_reduction <add>, %318, %cst_37 [0] : vector<8x128xf32> to vector<128xf32>
    %320 = vector.shape_cast %319 : vector<128xf32> to vector<1x128xf32>
    %cst_38 = arith.constant 1.000000e+00 : f32
    %321 = vector.broadcast %cst_38 : f32 to vector<1x128xf32>
    %322 = arith.maximumf %320, %321 : vector<1x128xf32>
    %323 = tpu.reciprocal %322 {approx = true} : vector<1x128xf32> -> vector<1x128xf32>
    %324 = vector.extract_strided_slice %312 {offsets = [0, 0], sizes = [8, 128], strides = [1, 1]} : vector<24x128xf32> to vector<8x128xf32>
    %325 = vector.extract_strided_slice %312 {offsets = [8, 0], sizes = [8, 128], strides = [1, 1]} : vector<24x128xf32> to vector<8x128xf32>
    %326 = arith.addf %324, %325 : vector<8x128xf32>
    %327 = vector.extract_strided_slice %312 {offsets = [16, 0], sizes = [8, 128], strides = [1, 1]} : vector<24x128xf32> to vector<8x128xf32>
    %328 = arith.addf %326, %327 : vector<8x128xf32>
    %cst_39 = arith.constant dense<0.000000e+00> : vector<128xf32>
    %329 = vector.multi_reduction <add>, %328, %cst_39 [0] : vector<8x128xf32> to vector<128xf32>
    %330 = vector.shape_cast %329 : vector<128xf32> to vector<1x128xf32>
    %331 = arith.mulf %330, %323 : vector<1x128xf32>
    %332 = vector.extract_strided_slice %313 {offsets = [0, 0], sizes = [8, 128], strides = [1, 1]} : vector<24x128xf32> to vector<8x128xf32>
    %333 = vector.extract_strided_slice %313 {offsets = [8, 0], sizes = [8, 128], strides = [1, 1]} : vector<24x128xf32> to vector<8x128xf32>
    %334 = arith.addf %332, %333 : vector<8x128xf32>
    %335 = vector.extract_strided_slice %313 {offsets = [16, 0], sizes = [8, 128], strides = [1, 1]} : vector<24x128xf32> to vector<8x128xf32>
    %336 = arith.addf %334, %335 : vector<8x128xf32>
    %cst_40 = arith.constant dense<0.000000e+00> : vector<128xf32>
    %337 = vector.multi_reduction <add>, %336, %cst_40 [0] : vector<8x128xf32> to vector<128xf32>
    %338 = vector.shape_cast %337 : vector<128xf32> to vector<1x128xf32>
    %339 = arith.mulf %338, %323 : vector<1x128xf32>
    %340 = vector.broadcast %331 : vector<1x128xf32> to vector<24x128xf32>
    %341 = arith.subf %309, %340 : vector<24x128xf32>
    %342 = vector.broadcast %339 : vector<1x128xf32> to vector<24x128xf32>
    %343 = arith.subf %310, %342 : vector<24x128xf32>
    %344 = arith.mulf %341, %341 : vector<24x128xf32>
    %345 = arith.mulf %343, %343 : vector<24x128xf32>
    %346 = arith.addf %344, %345 : vector<24x128xf32>
    %cst_41 = arith.constant 9.99999993E-9 : f32
    %347 = vector.broadcast %cst_41 : f32 to vector<24x128xf32>
    %348 = arith.addf %346, %347 : vector<24x128xf32>
    %349 = tpu.reciprocal %348 {approx = true} : vector<24x128xf32> -> vector<24x128xf32>
    %350 = math.absf %341 : vector<24x128xf32>
    %351 = arith.mulf %350, %341 : vector<24x128xf32>
    %352 = arith.mulf %351, %349 : vector<24x128xf32>
    %cst_42 = arith.constant 0.000000e+00 : f32
    %353 = vector.broadcast %cst_42 : f32 to vector<24x128xf32>
    %354 = arith.cmpf oge, %343, %353 : vector<24x128xf32>
    %cst_43 = arith.constant 0.000000e+00 : f32
    %355 = vector.broadcast %cst_43 : f32 to vector<24x128xf32>
    %356 = arith.subf %355, %352 : vector<24x128xf32>
    %cst_44 = arith.constant 2.000000e+00 : f32
    %357 = vector.broadcast %cst_44 : f32 to vector<24x128xf32>
    %358 = arith.addf %357, %352 : vector<24x128xf32>
    %359 = arith.select %354, %356, %358 : vector<24x128xi1>, vector<24x128xf32>
    %cst_45 = arith.constant 5.000000e-01 : f32
    %360 = vector.broadcast %cst_45 : f32 to vector<24x128xf32>
    %361 = arith.cmpf ogt, %311, %360 : vector<24x128xf32>
    %cst_46 = arith.constant 1.000000e+09 : f32
    %362 = vector.broadcast %cst_46 : f32 to vector<24x128xf32>
    %363 = arith.select %361, %359, %362 : vector<24x128xi1>, vector<24x128xf32>
    %364 = tpu.iota {dimensions = array<i32: 0>} : vector<24x128xi32>
    %cst_47 = arith.constant 0.000000e+00 : f32
    %365 = vector.broadcast %cst_47 : f32 to vector<24x128xf32>
    %366 = arith.mulf %363, %365 : vector<24x128xf32>
    %367 = vector.extract_strided_slice %363 {offsets = [0, 0], sizes = [1, 128], strides = [1, 1]} : vector<24x128xf32> to vector<1x128xf32>
    %368 = vector.broadcast %367 : vector<1x128xf32> to vector<24x128xf32>
    %369 = arith.cmpf olt, %368, %363 : vector<24x128xf32>
    %370 = vector.broadcast %367 : vector<1x128xf32> to vector<24x128xf32>
    %371 = arith.cmpf oeq, %370, %363 : vector<24x128xf32>
    %c0_i32_48 = arith.constant 0 : i32
    %372 = vector.broadcast %c0_i32_48 : i32 to vector<24x128xi32>
    %373 = arith.cmpi sgt, %364, %372 : vector<24x128xi32>
    %374 = arith.andi %371, %373 : vector<24x128xi1>
    %375 = arith.ori %369, %374 : vector<24x128xi1>
    %376 = arith.extui %375 : vector<24x128xi1> to vector<24x128xi32>
    %377 = arith.sitofp %376 : vector<24x128xi32> to vector<24x128xf32>
    %378 = arith.addf %366, %377 : vector<24x128xf32>
    %379 = vector.extract_strided_slice %363 {offsets = [1, 0], sizes = [1, 128], strides = [1, 1]} : vector<24x128xf32> to vector<1x128xf32>
    %380 = vector.broadcast %379 : vector<1x128xf32> to vector<24x128xf32>
    %381 = arith.cmpf olt, %380, %363 : vector<24x128xf32>
    %382 = vector.broadcast %379 : vector<1x128xf32> to vector<24x128xf32>
    %383 = arith.cmpf oeq, %382, %363 : vector<24x128xf32>
    %c1_i32 = arith.constant 1 : i32
    %384 = vector.broadcast %c1_i32 : i32 to vector<24x128xi32>
    %385 = arith.cmpi sgt, %364, %384 : vector<24x128xi32>
    %386 = arith.andi %383, %385 : vector<24x128xi1>
    %387 = arith.ori %381, %386 : vector<24x128xi1>
    %388 = arith.extui %387 : vector<24x128xi1> to vector<24x128xi32>
    %389 = arith.sitofp %388 : vector<24x128xi32> to vector<24x128xf32>
    %390 = arith.addf %378, %389 : vector<24x128xf32>
    %391 = vector.extract_strided_slice %363 {offsets = [2, 0], sizes = [1, 128], strides = [1, 1]} : vector<24x128xf32> to vector<1x128xf32>
    %392 = vector.broadcast %391 : vector<1x128xf32> to vector<24x128xf32>
    %393 = arith.cmpf olt, %392, %363 : vector<24x128xf32>
    %394 = vector.broadcast %391 : vector<1x128xf32> to vector<24x128xf32>
    %395 = arith.cmpf oeq, %394, %363 : vector<24x128xf32>
    %c2_i32_49 = arith.constant 2 : i32
    %396 = vector.broadcast %c2_i32_49 : i32 to vector<24x128xi32>
    %397 = arith.cmpi sgt, %364, %396 : vector<24x128xi32>
    %398 = arith.andi %395, %397 : vector<24x128xi1>
    %399 = arith.ori %393, %398 : vector<24x128xi1>
    %400 = arith.extui %399 : vector<24x128xi1> to vector<24x128xi32>
    %401 = arith.sitofp %400 : vector<24x128xi32> to vector<24x128xf32>
    %402 = arith.addf %390, %401 : vector<24x128xf32>
    %403 = vector.extract_strided_slice %363 {offsets = [3, 0], sizes = [1, 128], strides = [1, 1]} : vector<24x128xf32> to vector<1x128xf32>
    %404 = vector.broadcast %403 : vector<1x128xf32> to vector<24x128xf32>
    %405 = arith.cmpf olt, %404, %363 : vector<24x128xf32>
    %406 = vector.broadcast %403 : vector<1x128xf32> to vector<24x128xf32>
    %407 = arith.cmpf oeq, %406, %363 : vector<24x128xf32>
    %c3_i32_50 = arith.constant 3 : i32
    %408 = vector.broadcast %c3_i32_50 : i32 to vector<24x128xi32>
    %409 = arith.cmpi sgt, %364, %408 : vector<24x128xi32>
    %410 = arith.andi %407, %409 : vector<24x128xi1>
    %411 = arith.ori %405, %410 : vector<24x128xi1>
    %412 = arith.extui %411 : vector<24x128xi1> to vector<24x128xi32>
    %413 = arith.sitofp %412 : vector<24x128xi32> to vector<24x128xf32>
    %414 = arith.addf %402, %413 : vector<24x128xf32>
    %415 = vector.extract_strided_slice %363 {offsets = [4, 0], sizes = [1, 128], strides = [1, 1]} : vector<24x128xf32> to vector<1x128xf32>
    %416 = vector.broadcast %415 : vector<1x128xf32> to vector<24x128xf32>
    %417 = arith.cmpf olt, %416, %363 : vector<24x128xf32>
    %418 = vector.broadcast %415 : vector<1x128xf32> to vector<24x128xf32>
    %419 = arith.cmpf oeq, %418, %363 : vector<24x128xf32>
    %c4_i32_51 = arith.constant 4 : i32
    %420 = vector.broadcast %c4_i32_51 : i32 to vector<24x128xi32>
    %421 = arith.cmpi sgt, %364, %420 : vector<24x128xi32>
    %422 = arith.andi %419, %421 : vector<24x128xi1>
    %423 = arith.ori %417, %422 : vector<24x128xi1>
    %424 = arith.extui %423 : vector<24x128xi1> to vector<24x128xi32>
    %425 = arith.sitofp %424 : vector<24x128xi32> to vector<24x128xf32>
    %426 = arith.addf %414, %425 : vector<24x128xf32>
    %427 = vector.extract_strided_slice %363 {offsets = [5, 0], sizes = [1, 128], strides = [1, 1]} : vector<24x128xf32> to vector<1x128xf32>
    %428 = vector.broadcast %427 : vector<1x128xf32> to vector<24x128xf32>
    %429 = arith.cmpf olt, %428, %363 : vector<24x128xf32>
    %430 = vector.broadcast %427 : vector<1x128xf32> to vector<24x128xf32>
    %431 = arith.cmpf oeq, %430, %363 : vector<24x128xf32>
    %c5_i32 = arith.constant 5 : i32
    %432 = vector.broadcast %c5_i32 : i32 to vector<24x128xi32>
    %433 = arith.cmpi sgt, %364, %432 : vector<24x128xi32>
    %434 = arith.andi %431, %433 : vector<24x128xi1>
    %435 = arith.ori %429, %434 : vector<24x128xi1>
    %436 = arith.extui %435 : vector<24x128xi1> to vector<24x128xi32>
    %437 = arith.sitofp %436 : vector<24x128xi32> to vector<24x128xf32>
    %438 = arith.addf %426, %437 : vector<24x128xf32>
    %439 = vector.extract_strided_slice %363 {offsets = [6, 0], sizes = [1, 128], strides = [1, 1]} : vector<24x128xf32> to vector<1x128xf32>
    %440 = vector.broadcast %439 : vector<1x128xf32> to vector<24x128xf32>
    %441 = arith.cmpf olt, %440, %363 : vector<24x128xf32>
    %442 = vector.broadcast %439 : vector<1x128xf32> to vector<24x128xf32>
    %443 = arith.cmpf oeq, %442, %363 : vector<24x128xf32>
    %c6_i32 = arith.constant 6 : i32
    %444 = vector.broadcast %c6_i32 : i32 to vector<24x128xi32>
    %445 = arith.cmpi sgt, %364, %444 : vector<24x128xi32>
    %446 = arith.andi %443, %445 : vector<24x128xi1>
    %447 = arith.ori %441, %446 : vector<24x128xi1>
    %448 = arith.extui %447 : vector<24x128xi1> to vector<24x128xi32>
    %449 = arith.sitofp %448 : vector<24x128xi32> to vector<24x128xf32>
    %450 = arith.addf %438, %449 : vector<24x128xf32>
    %451 = vector.extract_strided_slice %363 {offsets = [7, 0], sizes = [1, 128], strides = [1, 1]} : vector<24x128xf32> to vector<1x128xf32>
    %452 = vector.broadcast %451 : vector<1x128xf32> to vector<24x128xf32>
    %453 = arith.cmpf olt, %452, %363 : vector<24x128xf32>
    %454 = vector.broadcast %451 : vector<1x128xf32> to vector<24x128xf32>
    %455 = arith.cmpf oeq, %454, %363 : vector<24x128xf32>
    %c7_i32 = arith.constant 7 : i32
    %456 = vector.broadcast %c7_i32 : i32 to vector<24x128xi32>
    %457 = arith.cmpi sgt, %364, %456 : vector<24x128xi32>
    %458 = arith.andi %455, %457 : vector<24x128xi1>
    %459 = arith.ori %453, %458 : vector<24x128xi1>
    %460 = arith.extui %459 : vector<24x128xi1> to vector<24x128xi32>
    %461 = arith.sitofp %460 : vector<24x128xi32> to vector<24x128xf32>
    %462 = arith.addf %450, %461 : vector<24x128xf32>
    %463 = vector.extract_strided_slice %363 {offsets = [8, 0], sizes = [1, 128], strides = [1, 1]} : vector<24x128xf32> to vector<1x128xf32>
    %464 = vector.broadcast %463 : vector<1x128xf32> to vector<24x128xf32>
    %465 = arith.cmpf olt, %464, %363 : vector<24x128xf32>
    %466 = vector.broadcast %463 : vector<1x128xf32> to vector<24x128xf32>
    %467 = arith.cmpf oeq, %466, %363 : vector<24x128xf32>
    %c8_i32 = arith.constant 8 : i32
    %468 = vector.broadcast %c8_i32 : i32 to vector<24x128xi32>
    %469 = arith.cmpi sgt, %364, %468 : vector<24x128xi32>
    %470 = arith.andi %467, %469 : vector<24x128xi1>
    %471 = arith.ori %465, %470 : vector<24x128xi1>
    %472 = arith.extui %471 : vector<24x128xi1> to vector<24x128xi32>
    %473 = arith.sitofp %472 : vector<24x128xi32> to vector<24x128xf32>
    %474 = arith.addf %462, %473 : vector<24x128xf32>
    %475 = vector.extract_strided_slice %363 {offsets = [9, 0], sizes = [1, 128], strides = [1, 1]} : vector<24x128xf32> to vector<1x128xf32>
    %476 = vector.broadcast %475 : vector<1x128xf32> to vector<24x128xf32>
    %477 = arith.cmpf olt, %476, %363 : vector<24x128xf32>
    %478 = vector.broadcast %475 : vector<1x128xf32> to vector<24x128xf32>
    %479 = arith.cmpf oeq, %478, %363 : vector<24x128xf32>
    %c9_i32 = arith.constant 9 : i32
    %480 = vector.broadcast %c9_i32 : i32 to vector<24x128xi32>
    %481 = arith.cmpi sgt, %364, %480 : vector<24x128xi32>
    %482 = arith.andi %479, %481 : vector<24x128xi1>
    %483 = arith.ori %477, %482 : vector<24x128xi1>
    %484 = arith.extui %483 : vector<24x128xi1> to vector<24x128xi32>
    %485 = arith.sitofp %484 : vector<24x128xi32> to vector<24x128xf32>
    %486 = arith.addf %474, %485 : vector<24x128xf32>
    %487 = vector.extract_strided_slice %363 {offsets = [10, 0], sizes = [1, 128], strides = [1, 1]} : vector<24x128xf32> to vector<1x128xf32>
    %488 = vector.broadcast %487 : vector<1x128xf32> to vector<24x128xf32>
    %489 = arith.cmpf olt, %488, %363 : vector<24x128xf32>
    %490 = vector.broadcast %487 : vector<1x128xf32> to vector<24x128xf32>
    %491 = arith.cmpf oeq, %490, %363 : vector<24x128xf32>
    %c10_i32 = arith.constant 10 : i32
    %492 = vector.broadcast %c10_i32 : i32 to vector<24x128xi32>
    %493 = arith.cmpi sgt, %364, %492 : vector<24x128xi32>
    %494 = arith.andi %491, %493 : vector<24x128xi1>
    %495 = arith.ori %489, %494 : vector<24x128xi1>
    %496 = arith.extui %495 : vector<24x128xi1> to vector<24x128xi32>
    %497 = arith.sitofp %496 : vector<24x128xi32> to vector<24x128xf32>
    %498 = arith.addf %486, %497 : vector<24x128xf32>
    %499 = vector.extract_strided_slice %363 {offsets = [11, 0], sizes = [1, 128], strides = [1, 1]} : vector<24x128xf32> to vector<1x128xf32>
    %500 = vector.broadcast %499 : vector<1x128xf32> to vector<24x128xf32>
    %501 = arith.cmpf olt, %500, %363 : vector<24x128xf32>
    %502 = vector.broadcast %499 : vector<1x128xf32> to vector<24x128xf32>
    %503 = arith.cmpf oeq, %502, %363 : vector<24x128xf32>
    %c11_i32 = arith.constant 11 : i32
    %504 = vector.broadcast %c11_i32 : i32 to vector<24x128xi32>
    %505 = arith.cmpi sgt, %364, %504 : vector<24x128xi32>
    %506 = arith.andi %503, %505 : vector<24x128xi1>
    %507 = arith.ori %501, %506 : vector<24x128xi1>
    %508 = arith.extui %507 : vector<24x128xi1> to vector<24x128xi32>
    %509 = arith.sitofp %508 : vector<24x128xi32> to vector<24x128xf32>
    %510 = arith.addf %498, %509 : vector<24x128xf32>
    %511 = vector.extract_strided_slice %363 {offsets = [12, 0], sizes = [1, 128], strides = [1, 1]} : vector<24x128xf32> to vector<1x128xf32>
    %512 = vector.broadcast %511 : vector<1x128xf32> to vector<24x128xf32>
    %513 = arith.cmpf olt, %512, %363 : vector<24x128xf32>
    %514 = vector.broadcast %511 : vector<1x128xf32> to vector<24x128xf32>
    %515 = arith.cmpf oeq, %514, %363 : vector<24x128xf32>
    %c12_i32 = arith.constant 12 : i32
    %516 = vector.broadcast %c12_i32 : i32 to vector<24x128xi32>
    %517 = arith.cmpi sgt, %364, %516 : vector<24x128xi32>
    %518 = arith.andi %515, %517 : vector<24x128xi1>
    %519 = arith.ori %513, %518 : vector<24x128xi1>
    %520 = arith.extui %519 : vector<24x128xi1> to vector<24x128xi32>
    %521 = arith.sitofp %520 : vector<24x128xi32> to vector<24x128xf32>
    %522 = arith.addf %510, %521 : vector<24x128xf32>
    %523 = vector.extract_strided_slice %363 {offsets = [13, 0], sizes = [1, 128], strides = [1, 1]} : vector<24x128xf32> to vector<1x128xf32>
    %524 = vector.broadcast %523 : vector<1x128xf32> to vector<24x128xf32>
    %525 = arith.cmpf olt, %524, %363 : vector<24x128xf32>
    %526 = vector.broadcast %523 : vector<1x128xf32> to vector<24x128xf32>
    %527 = arith.cmpf oeq, %526, %363 : vector<24x128xf32>
    %c13_i32 = arith.constant 13 : i32
    %528 = vector.broadcast %c13_i32 : i32 to vector<24x128xi32>
    %529 = arith.cmpi sgt, %364, %528 : vector<24x128xi32>
    %530 = arith.andi %527, %529 : vector<24x128xi1>
    %531 = arith.ori %525, %530 : vector<24x128xi1>
    %532 = arith.extui %531 : vector<24x128xi1> to vector<24x128xi32>
    %533 = arith.sitofp %532 : vector<24x128xi32> to vector<24x128xf32>
    %534 = arith.addf %522, %533 : vector<24x128xf32>
    %535 = vector.extract_strided_slice %363 {offsets = [14, 0], sizes = [1, 128], strides = [1, 1]} : vector<24x128xf32> to vector<1x128xf32>
    %536 = vector.broadcast %535 : vector<1x128xf32> to vector<24x128xf32>
    %537 = arith.cmpf olt, %536, %363 : vector<24x128xf32>
    %538 = vector.broadcast %535 : vector<1x128xf32> to vector<24x128xf32>
    %539 = arith.cmpf oeq, %538, %363 : vector<24x128xf32>
    %c14_i32 = arith.constant 14 : i32
    %540 = vector.broadcast %c14_i32 : i32 to vector<24x128xi32>
    %541 = arith.cmpi sgt, %364, %540 : vector<24x128xi32>
    %542 = arith.andi %539, %541 : vector<24x128xi1>
    %543 = arith.ori %537, %542 : vector<24x128xi1>
    %544 = arith.extui %543 : vector<24x128xi1> to vector<24x128xi32>
    %545 = arith.sitofp %544 : vector<24x128xi32> to vector<24x128xf32>
    %546 = arith.addf %534, %545 : vector<24x128xf32>
    %547 = vector.extract_strided_slice %363 {offsets = [15, 0], sizes = [1, 128], strides = [1, 1]} : vector<24x128xf32> to vector<1x128xf32>
    %548 = vector.broadcast %547 : vector<1x128xf32> to vector<24x128xf32>
    %549 = arith.cmpf olt, %548, %363 : vector<24x128xf32>
    %550 = vector.broadcast %547 : vector<1x128xf32> to vector<24x128xf32>
    %551 = arith.cmpf oeq, %550, %363 : vector<24x128xf32>
    %c15_i32 = arith.constant 15 : i32
    %552 = vector.broadcast %c15_i32 : i32 to vector<24x128xi32>
    %553 = arith.cmpi sgt, %364, %552 : vector<24x128xi32>
    %554 = arith.andi %551, %553 : vector<24x128xi1>
    %555 = arith.ori %549, %554 : vector<24x128xi1>
    %556 = arith.extui %555 : vector<24x128xi1> to vector<24x128xi32>
    %557 = arith.sitofp %556 : vector<24x128xi32> to vector<24x128xf32>
    %558 = arith.addf %546, %557 : vector<24x128xf32>
    %559 = vector.extract_strided_slice %363 {offsets = [16, 0], sizes = [1, 128], strides = [1, 1]} : vector<24x128xf32> to vector<1x128xf32>
    %560 = vector.broadcast %559 : vector<1x128xf32> to vector<24x128xf32>
    %561 = arith.cmpf olt, %560, %363 : vector<24x128xf32>
    %562 = vector.broadcast %559 : vector<1x128xf32> to vector<24x128xf32>
    %563 = arith.cmpf oeq, %562, %363 : vector<24x128xf32>
    %c16_i32 = arith.constant 16 : i32
    %564 = vector.broadcast %c16_i32 : i32 to vector<24x128xi32>
    %565 = arith.cmpi sgt, %364, %564 : vector<24x128xi32>
    %566 = arith.andi %563, %565 : vector<24x128xi1>
    %567 = arith.ori %561, %566 : vector<24x128xi1>
    %568 = arith.extui %567 : vector<24x128xi1> to vector<24x128xi32>
    %569 = arith.sitofp %568 : vector<24x128xi32> to vector<24x128xf32>
    %570 = arith.addf %558, %569 : vector<24x128xf32>
    %571 = vector.extract_strided_slice %363 {offsets = [17, 0], sizes = [1, 128], strides = [1, 1]} : vector<24x128xf32> to vector<1x128xf32>
    %572 = vector.broadcast %571 : vector<1x128xf32> to vector<24x128xf32>
    %573 = arith.cmpf olt, %572, %363 : vector<24x128xf32>
    %574 = vector.broadcast %571 : vector<1x128xf32> to vector<24x128xf32>
    %575 = arith.cmpf oeq, %574, %363 : vector<24x128xf32>
    %c17_i32 = arith.constant 17 : i32
    %576 = vector.broadcast %c17_i32 : i32 to vector<24x128xi32>
    %577 = arith.cmpi sgt, %364, %576 : vector<24x128xi32>
    %578 = arith.andi %575, %577 : vector<24x128xi1>
    %579 = arith.ori %573, %578 : vector<24x128xi1>
    %580 = arith.extui %579 : vector<24x128xi1> to vector<24x128xi32>
    %581 = arith.sitofp %580 : vector<24x128xi32> to vector<24x128xf32>
    %582 = arith.addf %570, %581 : vector<24x128xf32>
    %583 = vector.extract_strided_slice %363 {offsets = [18, 0], sizes = [1, 128], strides = [1, 1]} : vector<24x128xf32> to vector<1x128xf32>
    %584 = vector.broadcast %583 : vector<1x128xf32> to vector<24x128xf32>
    %585 = arith.cmpf olt, %584, %363 : vector<24x128xf32>
    %586 = vector.broadcast %583 : vector<1x128xf32> to vector<24x128xf32>
    %587 = arith.cmpf oeq, %586, %363 : vector<24x128xf32>
    %c18_i32 = arith.constant 18 : i32
    %588 = vector.broadcast %c18_i32 : i32 to vector<24x128xi32>
    %589 = arith.cmpi sgt, %364, %588 : vector<24x128xi32>
    %590 = arith.andi %587, %589 : vector<24x128xi1>
    %591 = arith.ori %585, %590 : vector<24x128xi1>
    %592 = arith.extui %591 : vector<24x128xi1> to vector<24x128xi32>
    %593 = arith.sitofp %592 : vector<24x128xi32> to vector<24x128xf32>
    %594 = arith.addf %582, %593 : vector<24x128xf32>
    %595 = vector.extract_strided_slice %363 {offsets = [19, 0], sizes = [1, 128], strides = [1, 1]} : vector<24x128xf32> to vector<1x128xf32>
    %596 = vector.broadcast %595 : vector<1x128xf32> to vector<24x128xf32>
    %597 = arith.cmpf olt, %596, %363 : vector<24x128xf32>
    %598 = vector.broadcast %595 : vector<1x128xf32> to vector<24x128xf32>
    %599 = arith.cmpf oeq, %598, %363 : vector<24x128xf32>
    %c19_i32 = arith.constant 19 : i32
    %600 = vector.broadcast %c19_i32 : i32 to vector<24x128xi32>
    %601 = arith.cmpi sgt, %364, %600 : vector<24x128xi32>
    %602 = arith.andi %599, %601 : vector<24x128xi1>
    %603 = arith.ori %597, %602 : vector<24x128xi1>
    %604 = arith.extui %603 : vector<24x128xi1> to vector<24x128xi32>
    %605 = arith.sitofp %604 : vector<24x128xi32> to vector<24x128xf32>
    %606 = arith.addf %594, %605 : vector<24x128xf32>
    %607 = vector.extract_strided_slice %363 {offsets = [20, 0], sizes = [1, 128], strides = [1, 1]} : vector<24x128xf32> to vector<1x128xf32>
    %608 = vector.broadcast %607 : vector<1x128xf32> to vector<24x128xf32>
    %609 = arith.cmpf olt, %608, %363 : vector<24x128xf32>
    %610 = vector.broadcast %607 : vector<1x128xf32> to vector<24x128xf32>
    %611 = arith.cmpf oeq, %610, %363 : vector<24x128xf32>
    %c20_i32 = arith.constant 20 : i32
    %612 = vector.broadcast %c20_i32 : i32 to vector<24x128xi32>
    %613 = arith.cmpi sgt, %364, %612 : vector<24x128xi32>
    %614 = arith.andi %611, %613 : vector<24x128xi1>
    %615 = arith.ori %609, %614 : vector<24x128xi1>
    %616 = arith.extui %615 : vector<24x128xi1> to vector<24x128xi32>
    %617 = arith.sitofp %616 : vector<24x128xi32> to vector<24x128xf32>
    %618 = arith.addf %606, %617 : vector<24x128xf32>
    %619 = vector.extract_strided_slice %363 {offsets = [21, 0], sizes = [1, 128], strides = [1, 1]} : vector<24x128xf32> to vector<1x128xf32>
    %620 = vector.broadcast %619 : vector<1x128xf32> to vector<24x128xf32>
    %621 = arith.cmpf olt, %620, %363 : vector<24x128xf32>
    %622 = vector.broadcast %619 : vector<1x128xf32> to vector<24x128xf32>
    %623 = arith.cmpf oeq, %622, %363 : vector<24x128xf32>
    %c21_i32 = arith.constant 21 : i32
    %624 = vector.broadcast %c21_i32 : i32 to vector<24x128xi32>
    %625 = arith.cmpi sgt, %364, %624 : vector<24x128xi32>
    %626 = arith.andi %623, %625 : vector<24x128xi1>
    %627 = arith.ori %621, %626 : vector<24x128xi1>
    %628 = arith.extui %627 : vector<24x128xi1> to vector<24x128xi32>
    %629 = arith.sitofp %628 : vector<24x128xi32> to vector<24x128xf32>
    %630 = arith.addf %618, %629 : vector<24x128xf32>
    %631 = vector.extract_strided_slice %363 {offsets = [22, 0], sizes = [1, 128], strides = [1, 1]} : vector<24x128xf32> to vector<1x128xf32>
    %632 = vector.broadcast %631 : vector<1x128xf32> to vector<24x128xf32>
    %633 = arith.cmpf olt, %632, %363 : vector<24x128xf32>
    %634 = vector.broadcast %631 : vector<1x128xf32> to vector<24x128xf32>
    %635 = arith.cmpf oeq, %634, %363 : vector<24x128xf32>
    %c22_i32 = arith.constant 22 : i32
    %636 = vector.broadcast %c22_i32 : i32 to vector<24x128xi32>
    %637 = arith.cmpi sgt, %364, %636 : vector<24x128xi32>
    %638 = arith.andi %635, %637 : vector<24x128xi1>
    %639 = arith.ori %633, %638 : vector<24x128xi1>
    %640 = arith.extui %639 : vector<24x128xi1> to vector<24x128xi32>
    %641 = arith.sitofp %640 : vector<24x128xi32> to vector<24x128xf32>
    %642 = arith.addf %630, %641 : vector<24x128xf32>
    %643 = vector.extract_strided_slice %363 {offsets = [23, 0], sizes = [1, 128], strides = [1, 1]} : vector<24x128xf32> to vector<1x128xf32>
    %644 = vector.broadcast %643 : vector<1x128xf32> to vector<24x128xf32>
    %645 = arith.cmpf olt, %644, %363 : vector<24x128xf32>
    %646 = vector.broadcast %643 : vector<1x128xf32> to vector<24x128xf32>
    %647 = arith.cmpf oeq, %646, %363 : vector<24x128xf32>
    %c23_i32 = arith.constant 23 : i32
    %648 = vector.broadcast %c23_i32 : i32 to vector<24x128xi32>
    %649 = arith.cmpi sgt, %364, %648 : vector<24x128xi32>
    %650 = arith.andi %647, %649 : vector<24x128xi1>
    %651 = arith.ori %645, %650 : vector<24x128xi1>
    %652 = arith.extui %651 : vector<24x128xi1> to vector<24x128xi32>
    %653 = arith.sitofp %652 : vector<24x128xi32> to vector<24x128xf32>
    %654 = arith.addf %642, %653 : vector<24x128xf32>
    %cst_52 = arith.constant 0.000000e+00 : f32
    %655 = vector.broadcast %cst_52 : f32 to vector<24x128xf32>
    %656 = arith.cmpf oeq, %654, %655 : vector<24x128xf32>
    %cst_53 = arith.constant 0.000000e+00 : f32
    %657 = vector.broadcast %cst_53 : f32 to vector<24x128xf32>
    %658 = arith.select %656, %312, %657 : vector<24x128xi1>, vector<24x128xf32>
    %659 = vector.extract_strided_slice %658 {offsets = [0, 0], sizes = [8, 128], strides = [1, 1]} : vector<24x128xf32> to vector<8x128xf32>
    %660 = vector.extract_strided_slice %658 {offsets = [8, 0], sizes = [8, 128], strides = [1, 1]} : vector<24x128xf32> to vector<8x128xf32>
    %661 = arith.addf %659, %660 : vector<8x128xf32>
    %662 = vector.extract_strided_slice %658 {offsets = [16, 0], sizes = [8, 128], strides = [1, 1]} : vector<24x128xf32> to vector<8x128xf32>
    %663 = arith.addf %661, %662 : vector<8x128xf32>
    %cst_54 = arith.constant dense<0.000000e+00> : vector<128xf32>
    %664 = vector.multi_reduction <add>, %663, %cst_54 [0] : vector<8x128xf32> to vector<128xf32>
    %665 = vector.shape_cast %664 : vector<128xf32> to vector<1x128xf32>
    %cst_55 = arith.constant 0.000000e+00 : f32
    %666 = vector.broadcast %cst_55 : f32 to vector<24x128xf32>
    %667 = arith.select %656, %313, %666 : vector<24x128xi1>, vector<24x128xf32>
    %668 = vector.extract_strided_slice %667 {offsets = [0, 0], sizes = [8, 128], strides = [1, 1]} : vector<24x128xf32> to vector<8x128xf32>
    %669 = vector.extract_strided_slice %667 {offsets = [8, 0], sizes = [8, 128], strides = [1, 1]} : vector<24x128xf32> to vector<8x128xf32>
    %670 = arith.addf %668, %669 : vector<8x128xf32>
    %671 = vector.extract_strided_slice %667 {offsets = [16, 0], sizes = [8, 128], strides = [1, 1]} : vector<24x128xf32> to vector<8x128xf32>
    %672 = arith.addf %670, %671 : vector<8x128xf32>
    %cst_56 = arith.constant dense<0.000000e+00> : vector<128xf32>
    %673 = vector.multi_reduction <add>, %672, %cst_56 [0] : vector<8x128xf32> to vector<128xf32>
    %674 = vector.shape_cast %673 : vector<128xf32> to vector<1x128xf32>
    %cst_57 = arith.constant 1.000000e+00 : f32
    %675 = vector.broadcast %cst_57 : f32 to vector<24x128xf32>
    %676 = arith.cmpf oeq, %654, %675 : vector<24x128xf32>
    %cst_58 = arith.constant 0.000000e+00 : f32
    %677 = vector.broadcast %cst_58 : f32 to vector<24x128xf32>
    %678 = arith.select %676, %312, %677 : vector<24x128xi1>, vector<24x128xf32>
    %679 = vector.extract_strided_slice %678 {offsets = [0, 0], sizes = [8, 128], strides = [1, 1]} : vector<24x128xf32> to vector<8x128xf32>
    %680 = vector.extract_strided_slice %678 {offsets = [8, 0], sizes = [8, 128], strides = [1, 1]} : vector<24x128xf32> to vector<8x128xf32>
    %681 = arith.addf %679, %680 : vector<8x128xf32>
    %682 = vector.extract_strided_slice %678 {offsets = [16, 0], sizes = [8, 128], strides = [1, 1]} : vector<24x128xf32> to vector<8x128xf32>
    %683 = arith.addf %681, %682 : vector<8x128xf32>
    %cst_59 = arith.constant dense<0.000000e+00> : vector<128xf32>
    %684 = vector.multi_reduction <add>, %683, %cst_59 [0] : vector<8x128xf32> to vector<128xf32>
    %685 = vector.shape_cast %684 : vector<128xf32> to vector<1x128xf32>
    %cst_60 = arith.constant 0.000000e+00 : f32
    %686 = vector.broadcast %cst_60 : f32 to vector<24x128xf32>
    %687 = arith.select %676, %313, %686 : vector<24x128xi1>, vector<24x128xf32>
    %688 = vector.extract_strided_slice %687 {offsets = [0, 0], sizes = [8, 128], strides = [1, 1]} : vector<24x128xf32> to vector<8x128xf32>
    %689 = vector.extract_strided_slice %687 {offsets = [8, 0], sizes = [8, 128], strides = [1, 1]} : vector<24x128xf32> to vector<8x128xf32>
    %690 = arith.addf %688, %689 : vector<8x128xf32>
    %691 = vector.extract_strided_slice %687 {offsets = [16, 0], sizes = [8, 128], strides = [1, 1]} : vector<24x128xf32> to vector<8x128xf32>
    %692 = arith.addf %690, %691 : vector<8x128xf32>
    %cst_61 = arith.constant dense<0.000000e+00> : vector<128xf32>
    %693 = vector.multi_reduction <add>, %692, %cst_61 [0] : vector<8x128xf32> to vector<128xf32>
    %694 = vector.shape_cast %693 : vector<128xf32> to vector<1x128xf32>
    %cst_62 = arith.constant 2.000000e+00 : f32
    %695 = vector.broadcast %cst_62 : f32 to vector<24x128xf32>
    %696 = arith.cmpf oeq, %654, %695 : vector<24x128xf32>
    %cst_63 = arith.constant 0.000000e+00 : f32
    %697 = vector.broadcast %cst_63 : f32 to vector<24x128xf32>
    %698 = arith.select %696, %312, %697 : vector<24x128xi1>, vector<24x128xf32>
    %699 = vector.extract_strided_slice %698 {offsets = [0, 0], sizes = [8, 128], strides = [1, 1]} : vector<24x128xf32> to vector<8x128xf32>
    %700 = vector.extract_strided_slice %698 {offsets = [8, 0], sizes = [8, 128], strides = [1, 1]} : vector<24x128xf32> to vector<8x128xf32>
    %701 = arith.addf %699, %700 : vector<8x128xf32>
    %702 = vector.extract_strided_slice %698 {offsets = [16, 0], sizes = [8, 128], strides = [1, 1]} : vector<24x128xf32> to vector<8x128xf32>
    %703 = arith.addf %701, %702 : vector<8x128xf32>
    %cst_64 = arith.constant dense<0.000000e+00> : vector<128xf32>
    %704 = vector.multi_reduction <add>, %703, %cst_64 [0] : vector<8x128xf32> to vector<128xf32>
    %705 = vector.shape_cast %704 : vector<128xf32> to vector<1x128xf32>
    %cst_65 = arith.constant 0.000000e+00 : f32
    %706 = vector.broadcast %cst_65 : f32 to vector<24x128xf32>
    %707 = arith.select %696, %313, %706 : vector<24x128xi1>, vector<24x128xf32>
    %708 = vector.extract_strided_slice %707 {offsets = [0, 0], sizes = [8, 128], strides = [1, 1]} : vector<24x128xf32> to vector<8x128xf32>
    %709 = vector.extract_strided_slice %707 {offsets = [8, 0], sizes = [8, 128], strides = [1, 1]} : vector<24x128xf32> to vector<8x128xf32>
    %710 = arith.addf %708, %709 : vector<8x128xf32>
    %711 = vector.extract_strided_slice %707 {offsets = [16, 0], sizes = [8, 128], strides = [1, 1]} : vector<24x128xf32> to vector<8x128xf32>
    %712 = arith.addf %710, %711 : vector<8x128xf32>
    %cst_66 = arith.constant dense<0.000000e+00> : vector<128xf32>
    %713 = vector.multi_reduction <add>, %712, %cst_66 [0] : vector<8x128xf32> to vector<128xf32>
    %714 = vector.shape_cast %713 : vector<128xf32> to vector<1x128xf32>
    %cst_67 = arith.constant 3.000000e+00 : f32
    %715 = vector.broadcast %cst_67 : f32 to vector<24x128xf32>
    %716 = arith.cmpf oeq, %654, %715 : vector<24x128xf32>
    %cst_68 = arith.constant 0.000000e+00 : f32
    %717 = vector.broadcast %cst_68 : f32 to vector<24x128xf32>
    %718 = arith.select %716, %312, %717 : vector<24x128xi1>, vector<24x128xf32>
    %719 = vector.extract_strided_slice %718 {offsets = [0, 0], sizes = [8, 128], strides = [1, 1]} : vector<24x128xf32> to vector<8x128xf32>
    %720 = vector.extract_strided_slice %718 {offsets = [8, 0], sizes = [8, 128], strides = [1, 1]} : vector<24x128xf32> to vector<8x128xf32>
    %721 = arith.addf %719, %720 : vector<8x128xf32>
    %722 = vector.extract_strided_slice %718 {offsets = [16, 0], sizes = [8, 128], strides = [1, 1]} : vector<24x128xf32> to vector<8x128xf32>
    %723 = arith.addf %721, %722 : vector<8x128xf32>
    %cst_69 = arith.constant dense<0.000000e+00> : vector<128xf32>
    %724 = vector.multi_reduction <add>, %723, %cst_69 [0] : vector<8x128xf32> to vector<128xf32>
    %725 = vector.shape_cast %724 : vector<128xf32> to vector<1x128xf32>
    %cst_70 = arith.constant 0.000000e+00 : f32
    %726 = vector.broadcast %cst_70 : f32 to vector<24x128xf32>
    %727 = arith.select %716, %313, %726 : vector<24x128xi1>, vector<24x128xf32>
    %728 = vector.extract_strided_slice %727 {offsets = [0, 0], sizes = [8, 128], strides = [1, 1]} : vector<24x128xf32> to vector<8x128xf32>
    %729 = vector.extract_strided_slice %727 {offsets = [8, 0], sizes = [8, 128], strides = [1, 1]} : vector<24x128xf32> to vector<8x128xf32>
    %730 = arith.addf %728, %729 : vector<8x128xf32>
    %731 = vector.extract_strided_slice %727 {offsets = [16, 0], sizes = [8, 128], strides = [1, 1]} : vector<24x128xf32> to vector<8x128xf32>
    %732 = arith.addf %730, %731 : vector<8x128xf32>
    %cst_71 = arith.constant dense<0.000000e+00> : vector<128xf32>
    %733 = vector.multi_reduction <add>, %732, %cst_71 [0] : vector<8x128xf32> to vector<128xf32>
    %734 = vector.shape_cast %733 : vector<128xf32> to vector<1x128xf32>
    %cst_72 = arith.constant 4.000000e+00 : f32
    %735 = vector.broadcast %cst_72 : f32 to vector<24x128xf32>
    %736 = arith.cmpf oeq, %654, %735 : vector<24x128xf32>
    %cst_73 = arith.constant 0.000000e+00 : f32
    %737 = vector.broadcast %cst_73 : f32 to vector<24x128xf32>
    %738 = arith.select %736, %312, %737 : vector<24x128xi1>, vector<24x128xf32>
    %739 = vector.extract_strided_slice %738 {offsets = [0, 0], sizes = [8, 128], strides = [1, 1]} : vector<24x128xf32> to vector<8x128xf32>
    %740 = vector.extract_strided_slice %738 {offsets = [8, 0], sizes = [8, 128], strides = [1, 1]} : vector<24x128xf32> to vector<8x128xf32>
    %741 = arith.addf %739, %740 : vector<8x128xf32>
    %742 = vector.extract_strided_slice %738 {offsets = [16, 0], sizes = [8, 128], strides = [1, 1]} : vector<24x128xf32> to vector<8x128xf32>
    %743 = arith.addf %741, %742 : vector<8x128xf32>
    %cst_74 = arith.constant dense<0.000000e+00> : vector<128xf32>
    %744 = vector.multi_reduction <add>, %743, %cst_74 [0] : vector<8x128xf32> to vector<128xf32>
    %745 = vector.shape_cast %744 : vector<128xf32> to vector<1x128xf32>
    %cst_75 = arith.constant 0.000000e+00 : f32
    %746 = vector.broadcast %cst_75 : f32 to vector<24x128xf32>
    %747 = arith.select %736, %313, %746 : vector<24x128xi1>, vector<24x128xf32>
    %748 = vector.extract_strided_slice %747 {offsets = [0, 0], sizes = [8, 128], strides = [1, 1]} : vector<24x128xf32> to vector<8x128xf32>
    %749 = vector.extract_strided_slice %747 {offsets = [8, 0], sizes = [8, 128], strides = [1, 1]} : vector<24x128xf32> to vector<8x128xf32>
    %750 = arith.addf %748, %749 : vector<8x128xf32>
    %751 = vector.extract_strided_slice %747 {offsets = [16, 0], sizes = [8, 128], strides = [1, 1]} : vector<24x128xf32> to vector<8x128xf32>
    %752 = arith.addf %750, %751 : vector<8x128xf32>
    %cst_76 = arith.constant dense<0.000000e+00> : vector<128xf32>
    %753 = vector.multi_reduction <add>, %752, %cst_76 [0] : vector<8x128xf32> to vector<128xf32>
    %754 = vector.shape_cast %753 : vector<128xf32> to vector<1x128xf32>
    %cst_77 = arith.constant 5.000000e+00 : f32
    %755 = vector.broadcast %cst_77 : f32 to vector<24x128xf32>
    %756 = arith.cmpf oeq, %654, %755 : vector<24x128xf32>
    %cst_78 = arith.constant 0.000000e+00 : f32
    %757 = vector.broadcast %cst_78 : f32 to vector<24x128xf32>
    %758 = arith.select %756, %312, %757 : vector<24x128xi1>, vector<24x128xf32>
    %759 = vector.extract_strided_slice %758 {offsets = [0, 0], sizes = [8, 128], strides = [1, 1]} : vector<24x128xf32> to vector<8x128xf32>
    %760 = vector.extract_strided_slice %758 {offsets = [8, 0], sizes = [8, 128], strides = [1, 1]} : vector<24x128xf32> to vector<8x128xf32>
    %761 = arith.addf %759, %760 : vector<8x128xf32>
    %762 = vector.extract_strided_slice %758 {offsets = [16, 0], sizes = [8, 128], strides = [1, 1]} : vector<24x128xf32> to vector<8x128xf32>
    %763 = arith.addf %761, %762 : vector<8x128xf32>
    %cst_79 = arith.constant dense<0.000000e+00> : vector<128xf32>
    %764 = vector.multi_reduction <add>, %763, %cst_79 [0] : vector<8x128xf32> to vector<128xf32>
    %765 = vector.shape_cast %764 : vector<128xf32> to vector<1x128xf32>
    %cst_80 = arith.constant 0.000000e+00 : f32
    %766 = vector.broadcast %cst_80 : f32 to vector<24x128xf32>
    %767 = arith.select %756, %313, %766 : vector<24x128xi1>, vector<24x128xf32>
    %768 = vector.extract_strided_slice %767 {offsets = [0, 0], sizes = [8, 128], strides = [1, 1]} : vector<24x128xf32> to vector<8x128xf32>
    %769 = vector.extract_strided_slice %767 {offsets = [8, 0], sizes = [8, 128], strides = [1, 1]} : vector<24x128xf32> to vector<8x128xf32>
    %770 = arith.addf %768, %769 : vector<8x128xf32>
    %771 = vector.extract_strided_slice %767 {offsets = [16, 0], sizes = [8, 128], strides = [1, 1]} : vector<24x128xf32> to vector<8x128xf32>
    %772 = arith.addf %770, %771 : vector<8x128xf32>
    %cst_81 = arith.constant dense<0.000000e+00> : vector<128xf32>
    %773 = vector.multi_reduction <add>, %772, %cst_81 [0] : vector<8x128xf32> to vector<128xf32>
    %774 = vector.shape_cast %773 : vector<128xf32> to vector<1x128xf32>
    %cst_82 = arith.constant 6.000000e+00 : f32
    %775 = vector.broadcast %cst_82 : f32 to vector<24x128xf32>
    %776 = arith.cmpf oeq, %654, %775 : vector<24x128xf32>
    %cst_83 = arith.constant 0.000000e+00 : f32
    %777 = vector.broadcast %cst_83 : f32 to vector<24x128xf32>
    %778 = arith.select %776, %312, %777 : vector<24x128xi1>, vector<24x128xf32>
    %779 = vector.extract_strided_slice %778 {offsets = [0, 0], sizes = [8, 128], strides = [1, 1]} : vector<24x128xf32> to vector<8x128xf32>
    %780 = vector.extract_strided_slice %778 {offsets = [8, 0], sizes = [8, 128], strides = [1, 1]} : vector<24x128xf32> to vector<8x128xf32>
    %781 = arith.addf %779, %780 : vector<8x128xf32>
    %782 = vector.extract_strided_slice %778 {offsets = [16, 0], sizes = [8, 128], strides = [1, 1]} : vector<24x128xf32> to vector<8x128xf32>
    %783 = arith.addf %781, %782 : vector<8x128xf32>
    %cst_84 = arith.constant dense<0.000000e+00> : vector<128xf32>
    %784 = vector.multi_reduction <add>, %783, %cst_84 [0] : vector<8x128xf32> to vector<128xf32>
    %785 = vector.shape_cast %784 : vector<128xf32> to vector<1x128xf32>
    %cst_85 = arith.constant 0.000000e+00 : f32
    %786 = vector.broadcast %cst_85 : f32 to vector<24x128xf32>
    %787 = arith.select %776, %313, %786 : vector<24x128xi1>, vector<24x128xf32>
    %788 = vector.extract_strided_slice %787 {offsets = [0, 0], sizes = [8, 128], strides = [1, 1]} : vector<24x128xf32> to vector<8x128xf32>
    %789 = vector.extract_strided_slice %787 {offsets = [8, 0], sizes = [8, 128], strides = [1, 1]} : vector<24x128xf32> to vector<8x128xf32>
    %790 = arith.addf %788, %789 : vector<8x128xf32>
    %791 = vector.extract_strided_slice %787 {offsets = [16, 0], sizes = [8, 128], strides = [1, 1]} : vector<24x128xf32> to vector<8x128xf32>
    %792 = arith.addf %790, %791 : vector<8x128xf32>
    %cst_86 = arith.constant dense<0.000000e+00> : vector<128xf32>
    %793 = vector.multi_reduction <add>, %792, %cst_86 [0] : vector<8x128xf32> to vector<128xf32>
    %794 = vector.shape_cast %793 : vector<128xf32> to vector<1x128xf32>
    %cst_87 = arith.constant 7.000000e+00 : f32
    %795 = vector.broadcast %cst_87 : f32 to vector<24x128xf32>
    %796 = arith.cmpf oeq, %654, %795 : vector<24x128xf32>
    %cst_88 = arith.constant 0.000000e+00 : f32
    %797 = vector.broadcast %cst_88 : f32 to vector<24x128xf32>
    %798 = arith.select %796, %312, %797 : vector<24x128xi1>, vector<24x128xf32>
    %799 = vector.extract_strided_slice %798 {offsets = [0, 0], sizes = [8, 128], strides = [1, 1]} : vector<24x128xf32> to vector<8x128xf32>
    %800 = vector.extract_strided_slice %798 {offsets = [8, 0], sizes = [8, 128], strides = [1, 1]} : vector<24x128xf32> to vector<8x128xf32>
    %801 = arith.addf %799, %800 : vector<8x128xf32>
    %802 = vector.extract_strided_slice %798 {offsets = [16, 0], sizes = [8, 128], strides = [1, 1]} : vector<24x128xf32> to vector<8x128xf32>
    %803 = arith.addf %801, %802 : vector<8x128xf32>
    %cst_89 = arith.constant dense<0.000000e+00> : vector<128xf32>
    %804 = vector.multi_reduction <add>, %803, %cst_89 [0] : vector<8x128xf32> to vector<128xf32>
    %805 = vector.shape_cast %804 : vector<128xf32> to vector<1x128xf32>
    %cst_90 = arith.constant 0.000000e+00 : f32
    %806 = vector.broadcast %cst_90 : f32 to vector<24x128xf32>
    %807 = arith.select %796, %313, %806 : vector<24x128xi1>, vector<24x128xf32>
    %808 = vector.extract_strided_slice %807 {offsets = [0, 0], sizes = [8, 128], strides = [1, 1]} : vector<24x128xf32> to vector<8x128xf32>
    %809 = vector.extract_strided_slice %807 {offsets = [8, 0], sizes = [8, 128], strides = [1, 1]} : vector<24x128xf32> to vector<8x128xf32>
    %810 = arith.addf %808, %809 : vector<8x128xf32>
    %811 = vector.extract_strided_slice %807 {offsets = [16, 0], sizes = [8, 128], strides = [1, 1]} : vector<24x128xf32> to vector<8x128xf32>
    %812 = arith.addf %810, %811 : vector<8x128xf32>
    %cst_91 = arith.constant dense<0.000000e+00> : vector<128xf32>
    %813 = vector.multi_reduction <add>, %812, %cst_91 [0] : vector<8x128xf32> to vector<128xf32>
    %814 = vector.shape_cast %813 : vector<128xf32> to vector<1x128xf32>
    %cst_92 = arith.constant 8.000000e+00 : f32
    %815 = vector.broadcast %cst_92 : f32 to vector<24x128xf32>
    %816 = arith.cmpf oeq, %654, %815 : vector<24x128xf32>
    %cst_93 = arith.constant 0.000000e+00 : f32
    %817 = vector.broadcast %cst_93 : f32 to vector<24x128xf32>
    %818 = arith.select %816, %312, %817 : vector<24x128xi1>, vector<24x128xf32>
    %819 = vector.extract_strided_slice %818 {offsets = [0, 0], sizes = [8, 128], strides = [1, 1]} : vector<24x128xf32> to vector<8x128xf32>
    %820 = vector.extract_strided_slice %818 {offsets = [8, 0], sizes = [8, 128], strides = [1, 1]} : vector<24x128xf32> to vector<8x128xf32>
    %821 = arith.addf %819, %820 : vector<8x128xf32>
    %822 = vector.extract_strided_slice %818 {offsets = [16, 0], sizes = [8, 128], strides = [1, 1]} : vector<24x128xf32> to vector<8x128xf32>
    %823 = arith.addf %821, %822 : vector<8x128xf32>
    %cst_94 = arith.constant dense<0.000000e+00> : vector<128xf32>
    %824 = vector.multi_reduction <add>, %823, %cst_94 [0] : vector<8x128xf32> to vector<128xf32>
    %825 = vector.shape_cast %824 : vector<128xf32> to vector<1x128xf32>
    %cst_95 = arith.constant 0.000000e+00 : f32
    %826 = vector.broadcast %cst_95 : f32 to vector<24x128xf32>
    %827 = arith.select %816, %313, %826 : vector<24x128xi1>, vector<24x128xf32>
    %828 = vector.extract_strided_slice %827 {offsets = [0, 0], sizes = [8, 128], strides = [1, 1]} : vector<24x128xf32> to vector<8x128xf32>
    %829 = vector.extract_strided_slice %827 {offsets = [8, 0], sizes = [8, 128], strides = [1, 1]} : vector<24x128xf32> to vector<8x128xf32>
    %830 = arith.addf %828, %829 : vector<8x128xf32>
    %831 = vector.extract_strided_slice %827 {offsets = [16, 0], sizes = [8, 128], strides = [1, 1]} : vector<24x128xf32> to vector<8x128xf32>
    %832 = arith.addf %830, %831 : vector<8x128xf32>
    %cst_96 = arith.constant dense<0.000000e+00> : vector<128xf32>
    %833 = vector.multi_reduction <add>, %832, %cst_96 [0] : vector<8x128xf32> to vector<128xf32>
    %834 = vector.shape_cast %833 : vector<128xf32> to vector<1x128xf32>
    %835 = arith.mulf %665, %694 : vector<1x128xf32>
    %836 = arith.mulf %674, %685 : vector<1x128xf32>
    %837 = arith.subf %835, %836 : vector<1x128xf32>
    %838 = arith.mulf %685, %714 : vector<1x128xf32>
    %839 = arith.addf %837, %838 : vector<1x128xf32>
    %840 = arith.mulf %694, %705 : vector<1x128xf32>
    %841 = arith.subf %839, %840 : vector<1x128xf32>
    %842 = arith.mulf %705, %734 : vector<1x128xf32>
    %843 = arith.addf %841, %842 : vector<1x128xf32>
    %844 = arith.mulf %714, %725 : vector<1x128xf32>
    %845 = arith.subf %843, %844 : vector<1x128xf32>
    %846 = arith.mulf %725, %754 : vector<1x128xf32>
    %847 = arith.addf %845, %846 : vector<1x128xf32>
    %848 = arith.mulf %734, %745 : vector<1x128xf32>
    %849 = arith.subf %847, %848 : vector<1x128xf32>
    %850 = arith.mulf %745, %774 : vector<1x128xf32>
    %851 = arith.addf %849, %850 : vector<1x128xf32>
    %852 = arith.mulf %754, %765 : vector<1x128xf32>
    %853 = arith.subf %851, %852 : vector<1x128xf32>
    %854 = arith.mulf %765, %794 : vector<1x128xf32>
    %855 = arith.addf %853, %854 : vector<1x128xf32>
    %856 = arith.mulf %774, %785 : vector<1x128xf32>
    %857 = arith.subf %855, %856 : vector<1x128xf32>
    %858 = arith.mulf %785, %814 : vector<1x128xf32>
    %859 = arith.addf %857, %858 : vector<1x128xf32>
    %860 = arith.mulf %794, %805 : vector<1x128xf32>
    %861 = arith.subf %859, %860 : vector<1x128xf32>
    %862 = arith.mulf %805, %834 : vector<1x128xf32>
    %863 = arith.addf %861, %862 : vector<1x128xf32>
    %864 = arith.mulf %814, %825 : vector<1x128xf32>
    %865 = arith.subf %863, %864 : vector<1x128xf32>
    %cst_97 = arith.constant 0.000000e+00 : f32
    %866 = vector.broadcast %cst_97 : f32 to vector<1x128xf32>
    %867 = arith.mulf %320, %866 : vector<1x128xf32>
    %cst_98 = arith.constant 0.000000e+00 : f32
    %868 = vector.broadcast %cst_98 : f32 to vector<1x128xf32>
    %869 = arith.mulf %320, %868 : vector<1x128xf32>
    %cst_99 = arith.constant 1.000000e+00 : f32
    %870 = vector.broadcast %cst_99 : f32 to vector<1x128xf32>
    %871 = arith.cmpf oeq, %320, %870 : vector<1x128xf32>
    %cst_100 = arith.constant 0.000000e+00 : f32
    %872 = vector.broadcast %cst_100 : f32 to vector<1x128xf32>
    %873 = arith.select %871, %665, %872 : vector<1x128xi1>, vector<1x128xf32>
    %874 = arith.addf %867, %873 : vector<1x128xf32>
    %cst_101 = arith.constant 0.000000e+00 : f32
    %875 = vector.broadcast %cst_101 : f32 to vector<1x128xf32>
    %876 = arith.select %871, %674, %875 : vector<1x128xi1>, vector<1x128xf32>
    %877 = arith.addf %869, %876 : vector<1x128xf32>
    %cst_102 = arith.constant 2.000000e+00 : f32
    %878 = vector.broadcast %cst_102 : f32 to vector<1x128xf32>
    %879 = arith.cmpf oeq, %320, %878 : vector<1x128xf32>
    %cst_103 = arith.constant 0.000000e+00 : f32
    %880 = vector.broadcast %cst_103 : f32 to vector<1x128xf32>
    %881 = arith.select %879, %685, %880 : vector<1x128xi1>, vector<1x128xf32>
    %882 = arith.addf %874, %881 : vector<1x128xf32>
    %cst_104 = arith.constant 0.000000e+00 : f32
    %883 = vector.broadcast %cst_104 : f32 to vector<1x128xf32>
    %884 = arith.select %879, %694, %883 : vector<1x128xi1>, vector<1x128xf32>
    %885 = arith.addf %877, %884 : vector<1x128xf32>
    %cst_105 = arith.constant 3.000000e+00 : f32
    %886 = vector.broadcast %cst_105 : f32 to vector<1x128xf32>
    %887 = arith.cmpf oeq, %320, %886 : vector<1x128xf32>
    %cst_106 = arith.constant 0.000000e+00 : f32
    %888 = vector.broadcast %cst_106 : f32 to vector<1x128xf32>
    %889 = arith.select %887, %705, %888 : vector<1x128xi1>, vector<1x128xf32>
    %890 = arith.addf %882, %889 : vector<1x128xf32>
    %cst_107 = arith.constant 0.000000e+00 : f32
    %891 = vector.broadcast %cst_107 : f32 to vector<1x128xf32>
    %892 = arith.select %887, %714, %891 : vector<1x128xi1>, vector<1x128xf32>
    %893 = arith.addf %885, %892 : vector<1x128xf32>
    %cst_108 = arith.constant 4.000000e+00 : f32
    %894 = vector.broadcast %cst_108 : f32 to vector<1x128xf32>
    %895 = arith.cmpf oeq, %320, %894 : vector<1x128xf32>
    %cst_109 = arith.constant 0.000000e+00 : f32
    %896 = vector.broadcast %cst_109 : f32 to vector<1x128xf32>
    %897 = arith.select %895, %725, %896 : vector<1x128xi1>, vector<1x128xf32>
    %898 = arith.addf %890, %897 : vector<1x128xf32>
    %cst_110 = arith.constant 0.000000e+00 : f32
    %899 = vector.broadcast %cst_110 : f32 to vector<1x128xf32>
    %900 = arith.select %895, %734, %899 : vector<1x128xi1>, vector<1x128xf32>
    %901 = arith.addf %893, %900 : vector<1x128xf32>
    %cst_111 = arith.constant 5.000000e+00 : f32
    %902 = vector.broadcast %cst_111 : f32 to vector<1x128xf32>
    %903 = arith.cmpf oeq, %320, %902 : vector<1x128xf32>
    %cst_112 = arith.constant 0.000000e+00 : f32
    %904 = vector.broadcast %cst_112 : f32 to vector<1x128xf32>
    %905 = arith.select %903, %745, %904 : vector<1x128xi1>, vector<1x128xf32>
    %906 = arith.addf %898, %905 : vector<1x128xf32>
    %cst_113 = arith.constant 0.000000e+00 : f32
    %907 = vector.broadcast %cst_113 : f32 to vector<1x128xf32>
    %908 = arith.select %903, %754, %907 : vector<1x128xi1>, vector<1x128xf32>
    %909 = arith.addf %901, %908 : vector<1x128xf32>
    %cst_114 = arith.constant 6.000000e+00 : f32
    %910 = vector.broadcast %cst_114 : f32 to vector<1x128xf32>
    %911 = arith.cmpf oeq, %320, %910 : vector<1x128xf32>
    %cst_115 = arith.constant 0.000000e+00 : f32
    %912 = vector.broadcast %cst_115 : f32 to vector<1x128xf32>
    %913 = arith.select %911, %765, %912 : vector<1x128xi1>, vector<1x128xf32>
    %914 = arith.addf %906, %913 : vector<1x128xf32>
    %cst_116 = arith.constant 0.000000e+00 : f32
    %915 = vector.broadcast %cst_116 : f32 to vector<1x128xf32>
    %916 = arith.select %911, %774, %915 : vector<1x128xi1>, vector<1x128xf32>
    %917 = arith.addf %909, %916 : vector<1x128xf32>
    %cst_117 = arith.constant 7.000000e+00 : f32
    %918 = vector.broadcast %cst_117 : f32 to vector<1x128xf32>
    %919 = arith.cmpf oeq, %320, %918 : vector<1x128xf32>
    %cst_118 = arith.constant 0.000000e+00 : f32
    %920 = vector.broadcast %cst_118 : f32 to vector<1x128xf32>
    %921 = arith.select %919, %785, %920 : vector<1x128xi1>, vector<1x128xf32>
    %922 = arith.addf %914, %921 : vector<1x128xf32>
    %cst_119 = arith.constant 0.000000e+00 : f32
    %923 = vector.broadcast %cst_119 : f32 to vector<1x128xf32>
    %924 = arith.select %919, %794, %923 : vector<1x128xi1>, vector<1x128xf32>
    %925 = arith.addf %917, %924 : vector<1x128xf32>
    %cst_120 = arith.constant 8.000000e+00 : f32
    %926 = vector.broadcast %cst_120 : f32 to vector<1x128xf32>
    %927 = arith.cmpf oeq, %320, %926 : vector<1x128xf32>
    %cst_121 = arith.constant 0.000000e+00 : f32
    %928 = vector.broadcast %cst_121 : f32 to vector<1x128xf32>
    %929 = arith.select %927, %805, %928 : vector<1x128xi1>, vector<1x128xf32>
    %930 = arith.addf %922, %929 : vector<1x128xf32>
    %cst_122 = arith.constant 0.000000e+00 : f32
    %931 = vector.broadcast %cst_122 : f32 to vector<1x128xf32>
    %932 = arith.select %927, %814, %931 : vector<1x128xi1>, vector<1x128xf32>
    %933 = arith.addf %925, %932 : vector<1x128xf32>
    %cst_123 = arith.constant 9.000000e+00 : f32
    %934 = vector.broadcast %cst_123 : f32 to vector<1x128xf32>
    %935 = arith.cmpf oeq, %320, %934 : vector<1x128xf32>
    %cst_124 = arith.constant 0.000000e+00 : f32
    %936 = vector.broadcast %cst_124 : f32 to vector<1x128xf32>
    %937 = arith.select %935, %825, %936 : vector<1x128xi1>, vector<1x128xf32>
    %938 = arith.addf %930, %937 : vector<1x128xf32>
    %cst_125 = arith.constant 0.000000e+00 : f32
    %939 = vector.broadcast %cst_125 : f32 to vector<1x128xf32>
    %940 = arith.select %935, %834, %939 : vector<1x128xi1>, vector<1x128xf32>
    %941 = arith.addf %933, %940 : vector<1x128xf32>
    %942 = arith.mulf %938, %674 : vector<1x128xf32>
    %943 = arith.addf %865, %942 : vector<1x128xf32>
    %944 = arith.mulf %941, %665 : vector<1x128xf32>
    %945 = arith.subf %943, %944 : vector<1x128xf32>
    %946 = math.absf %945 : vector<1x128xf32>
    %cst_126 = arith.constant 5.000000e-01 : f32
    %947 = vector.broadcast %cst_126 : f32 to vector<1x128xf32>
    %948 = arith.mulf %946, %947 : vector<1x128xf32>
    %cst_127 = arith.constant 5.000000e-01 : f32
    %949 = vector.broadcast %cst_127 : f32 to vector<1x128xf32>
    %950 = arith.mulf %949, %5 : vector<1x128xf32>
    %951 = arith.addf %2, %950 : vector<1x128xf32>
    %cst_128 = arith.constant 5.000000e-01 : f32
    %952 = vector.broadcast %cst_128 : f32 to vector<1x128xf32>
    %953 = arith.mulf %952, %5 : vector<1x128xf32>
    %954 = arith.subf %2, %953 : vector<1x128xf32>
    %cst_129 = arith.constant 5.000000e-01 : f32
    %955 = vector.broadcast %cst_129 : f32 to vector<1x128xf32>
    %956 = arith.mulf %955, %12 : vector<1x128xf32>
    %957 = arith.addf %9, %956 : vector<1x128xf32>
    %cst_130 = arith.constant 5.000000e-01 : f32
    %958 = vector.broadcast %cst_130 : f32 to vector<1x128xf32>
    %959 = arith.mulf %958, %12 : vector<1x128xf32>
    %960 = arith.subf %9, %959 : vector<1x128xf32>
    %961 = arith.minimumf %951, %957 : vector<1x128xf32>
    %962 = arith.maximumf %954, %960 : vector<1x128xf32>
    %963 = arith.subf %961, %962 : vector<1x128xf32>
    %cst_131 = arith.constant 0.000000e+00 : f32
    %964 = vector.broadcast %cst_131 : f32 to vector<1x128xf32>
    %965 = arith.maximumf %963, %964 : vector<1x128xf32>
    %966 = arith.mulf %948, %965 : vector<1x128xf32>
    %967 = arith.mulf %3, %4 : vector<1x128xf32>
    %968 = arith.mulf %967, %5 : vector<1x128xf32>
    %969 = arith.mulf %10, %11 : vector<1x128xf32>
    %970 = arith.mulf %969, %12 : vector<1x128xf32>
    %971 = arith.addf %968, %970 : vector<1x128xf32>
    %972 = arith.subf %971, %966 : vector<1x128xf32>
    %cst_132 = arith.constant dense<0xFF800000> : vector<128xf32>
    %973 = vector.multi_reduction <maximumf>, %71, %cst_132 [0] : vector<8x128xf32> to vector<128xf32>
    %974 = vector.shape_cast %973 : vector<128xf32> to vector<1x128xf32>
    %cst_133 = arith.constant dense<0x7F800000> : vector<128xf32>
    %975 = vector.multi_reduction <minimumf>, %71, %cst_133 [0] : vector<8x128xf32> to vector<128xf32>
    %976 = vector.shape_cast %975 : vector<128xf32> to vector<1x128xf32>
    %cst_134 = arith.constant dense<0xFF800000> : vector<128xf32>
    %977 = vector.multi_reduction <maximumf>, %75, %cst_134 [0] : vector<8x128xf32> to vector<128xf32>
    %978 = vector.shape_cast %977 : vector<128xf32> to vector<1x128xf32>
    %cst_135 = arith.constant dense<0x7F800000> : vector<128xf32>
    %979 = vector.multi_reduction <minimumf>, %75, %cst_135 [0] : vector<8x128xf32> to vector<128xf32>
    %980 = vector.shape_cast %979 : vector<128xf32> to vector<1x128xf32>
    %981 = arith.maximumf %951, %957 : vector<1x128xf32>
    %982 = arith.minimumf %954, %960 : vector<1x128xf32>
    %983 = arith.subf %0, %7 : vector<1x128xf32>
    %984 = arith.mulf %983, %983 : vector<1x128xf32>
    %985 = arith.subf %1, %8 : vector<1x128xf32>
    %986 = arith.mulf %985, %985 : vector<1x128xf32>
    %987 = arith.addf %984, %986 : vector<1x128xf32>
    %988 = arith.subf %3, %10 : vector<1x128xf32>
    %989 = arith.mulf %988, %988 : vector<1x128xf32>
    %990 = arith.addf %987, %989 : vector<1x128xf32>
    %991 = arith.subf %976, %974 : vector<1x128xf32>
    %992 = arith.mulf %991, %991 : vector<1x128xf32>
    %993 = arith.subf %980, %978 : vector<1x128xf32>
    %994 = arith.mulf %993, %993 : vector<1x128xf32>
    %995 = arith.addf %992, %994 : vector<1x128xf32>
    %996 = arith.subf %982, %981 : vector<1x128xf32>
    %997 = arith.mulf %996, %996 : vector<1x128xf32>
    %998 = arith.addf %995, %997 : vector<1x128xf32>
    %999 = arith.divf %966, %972 : vector<1x128xf32>
    %1000 = arith.divf %990, %998 : vector<1x128xf32>
    %1001 = arith.subf %999, %1000 : vector<1x128xf32>
    %cst_136 = arith.constant 1.000000e+00 : f32
    %1002 = vector.broadcast %cst_136 : f32 to vector<1x128xf32>
    %1003 = arith.subf %1002, %1001 : vector<1x128xf32>
    %c0_137 = arith.constant 0 : index
    %c0_138 = arith.constant 0 : index
    %1004 = vector.load %arg2[%c0_137, %c0_138] : memref<2x128xf32, #tpu.memory_space<vmem>>, vector<1x128xf32>
    tpu.vector_store %arg2[%c0_137, %c0_138], %1003 {strides = array<i32>} : memref<2x128xf32, #tpu.memory_space<vmem>>, vector<1x128xf32>,
    %cst_139 = arith.constant 1.000000e+00 : f32
    %1005 = vector.broadcast %cst_139 : f32 to vector<1x128xf32>
    %1006 = arith.subf %1005, %999 : vector<1x128xf32>
    %c1_140 = arith.constant 1 : index
    %c0_141 = arith.constant 0 : index
    %1007 = vector.load %arg2[%c1_140, %c0_141] : memref<2x128xf32, #tpu.memory_space<vmem>>, vector<1x128xf32>
    tpu.vector_store %arg2[%c1_140, %c0_141], %1006 {strides = array<i32>} : memref<2x128xf32, #tpu.memory_space<vmem>>, vector<1x128xf32>,
    return
  }
  func.func @transform_0(%arg0: i32) -> (i32, i32) {
    %c0_i32 = arith.constant 0 : i32
    %c0_i32_0 = arith.constant 0 : i32
    return %c0_i32, %arg0 : i32, i32
  }
  func.func @transform_1(%arg0: i32) -> (i32, i32) {
    %c0_i32 = arith.constant 0 : i32
    %c0_i32_0 = arith.constant 0 : i32
    return %c0_i32, %arg0 : i32, i32
  }
}

</mosaic_0001>

<bundles_post_ra>
// kernel: tpu_custom_call.1
= control target key start
LH: loop header
LB: loop body
LE: loop exit
PB: predicated region body
PF: predicated region fallthrough
CT: control target
= control target key end

     0   :  { %6 = vsyncpa [#allocation3], 0  ;;  %s3603_s0 = inlined_call_operand.hbm [shape: f32[16,128], index: 0, kind: input, shape index: {}]   ;;  %s3604_s1 = inlined_call_operand.hbm [shape: f32[2,128], index: 1, kind: output, shape index: {}]  }
   0x1   :  { %7 = vsyncpa [#allocation4], 0  ;;  %s12_s8 = sshll.u32 %s3603_s0, 4  ;;  %s2200_s9 = smov [#allocation2]   ;;  %s13_s8 = int_to_ptr.hbm [resolvable:$true] %s12_s8 }
   0x2   :  { %s14_s10 = sshll.u32 %s2200_s9, 4  ;;  %s2201_s11 = smov 128   ;;  %s15_s10 = int_to_ptr.vmem [resolvable:$true] %s14_s10 }
   0x3   :  { %s2202_s12 = smov 8  }
   0x4   :  { %20 = dma.hbm_to_vmem [thread:$0]  %s13_s8, 256, %s15_s10, [#allocation3], %s2201_s11, %s2201_s11, %s2202_s12  }
   0x5   :  { %2196 = dma.done.wait [#allocation3], 256  }
   0x6   :  { %2197 = vsyncadd [#allocation3], 4294967040  ;;  %v2227_v0 = vld [vmem:[#allocation2 + $0x6] sm:$0x1]  ;;  %v2229_v1 = vld [vmem:[#allocation2 + $0xd] sm:$0x1] }
   0x7   :  { %v39_v2 = vand.u32 2147483647, %v2227_v0  ;;  %v42_v3 = vand.u32 2139095040, %v2227_v0  ;;  %v348_v5 = vand.u32 2147483647, %v2229_v1  ;;  %v351_v6 = vand.u32 2139095040, %v2229_v1 }
   0x8   :  { %v2203_v23 = vmov 683565275   ;;  %v2204_v25 = vmov 2475754826   ;;  %v2205_v27 = vmov 2131351028  }
   0x9   :  { %v46_v4 = vand.u32 8388607, %v39_v2  ;;  %v43_v7 = vshrl.u32 %v42_v3, 23  ;;  %v352_v8 = vshrl.u32 %v351_v6, 23  ;;  %v355_v12 = vand.u32 8388607, %v348_v5 }
   0xa   :  { %v2206_v29 = vmov 2102212464   ;;  %v2207_v31 = vmov 920167782   ;;  %v2208_v40 = vmov 1326507024  }
   0xb   :  { %v2023_v9 = vadd.s32 4294967169, %v43_v7  ;;  %v47_v10 = vor.u32 8388608, %v46_v4  ;;  %v2029_v11 = vadd.s32 4294967169, %v352_v8  ;;  %v356_v17 = vor.u32 8388608, %v355_v12  ;;  %s2213_s0 = smov [#allocation5]   ;;  %s2013_s16 = sshll.u32 %s3604_s1, 4  ;;  %s2014_s16 = int_to_ptr.hbm [resolvable:$true] %s2013_s16 }
   0xc   :  { %s2011_s13 = sshll.u32 %s2213_s0, 4  ;;  %s2012_s13 = int_to_ptr.vmem [resolvable:$true] %s2011_s13 }
   0xd   :  { %v49_v13 = vadd.s32 1, %v2023_v9  ;;  %v358_v14 = vadd.s32 1, %v2029_v11  ;;  %v2239_v16 = vshll.u32 %v47_v10, 8  ;;  %v2249_v34 = vshll.u32 %v356_v17, 8 }
   0xf   :  { %vm50_vm0 = vcmp.gt.s32.totalorder %v49_v13, 0  ;;  %vm359_vm1 = vcmp.gt.s32.totalorder %v358_v14, 0  ;;  %v88_v33 = vand.u32 65535, %v2239_v16  ;;  %v89_v38 = vshrl.u32 %v2239_v16, 16 }
  0x10   :  { %v51_v15 = vsel %vm50_vm0, %v49_v13, 0  ;;  %v360_v19 = vsel %vm359_vm1, %v358_v14, 0 }
  0x11   :  { %v53_v18 = vand.u32 31, %v51_v15  ;;  %v2241_v20 = vshrl.u32 %v51_v15, 5  ;;  %v2243_v21 = vand.u32 31, %v360_v19  ;;  %v2267_v51 = vshrl.u32 %v360_v19, 5 }
  0x13   :  { %v54_v22 = vsub.s32 32, %v53_v18  ;;  %v56_v24 = vshll.u32 %v2203_v23, %v53_v18  ;;  %v59_v26 = vshll.u32 %v2204_v25, %v53_v18  ;;  %v62_v28 = vshll.u32 %v2205_v27, %v53_v18 }
  0x14   :  { %v65_v30 = vshll.u32 %v2206_v29, %v53_v18  ;;  %v68_v32 = vshll.u32 %v2207_v31, %v53_v18  ;;  %vm71_vm2 = vcmp.lt.s32.totalorder %v2241_v20, 1  ;;  %vm74_vm3 = vcmp.lt.s32.totalorder %v2241_v20, 4 }
  0x15   :  { %v57_v35 = vshrl.u32 %v2204_v25, %v54_v22  ;;  %v60_v36 = vshrl.u32 %v2205_v27, %v54_v22  ;;  %v63_v37 = vshrl.u32 %v2206_v29, %v54_v22  ;;  %v66_v39 = vshrl.u32 %v2207_v31, %v54_v22 }
  0x16   :  { %v69_v41 = vshrl.u32 %v2208_v40, %v54_v22  ;;  %v2258_v45 = vsub.s32 32, %v2243_v21  ;;  %v55_v46 = vshrl.u32 %v2203_v23, %v54_v22  ;;  %vm73_vm4 = vcmp.lt.s32.totalorder %v2241_v20, 3 }
  0x17   :  { %v58_v42 = vor.u32 %v57_v35, %v56_v24  ;;  %v61_v43 = vor.u32 %v60_v36, %v59_v26  ;;  %v64_v44 = vor.u32 %v63_v37, %v62_v28  ;;  %v67_v47 = vor.u32 %v66_v39, %v65_v30 }
  0x18   :  { %v70_v48 = vor.u32 %v69_v41, %v68_v32  ;;  %vm72_vm5 = vcmp.lt.s32.totalorder %v2241_v20, 2  ;;  %v365_v54 = vshll.u32 %v2203_v23, %v2243_v21  ;;  %v368_v55 = vshll.u32 %v2204_v25, %v2243_v21 }
  0x19   :  { %v79_v49 = vsel %vm71_vm2, %v58_v42, %v61_v43  ;;  %v83_v50 = vsel %vm71_vm2, %v61_v43, %v64_v44  ;;  %v80_v52 = vsel %vm74_vm3, %v67_v47, 920167782  ;;  %v76_v56 = vsel %vm74_vm3, %v64_v44, 2102212464 }
  0x1a   :  { %v84_v53 = vsel %vm74_vm3, %v70_v48, 1326507024  ;;  %v81_v57 = vsel %vm73_vm4, %v64_v44, %v80_v52  ;;  %v366_v59 = vshrl.u32 %v2204_v25, %v2258_v45  ;;  %v75_v60 = vsel %vm71_vm2, %v55_v46, %v58_v42 }
  0x1b   :  { %v85_v58 = vsel %vm73_vm4, %v67_v47, %v84_v53  ;;  %v82_v61 = vsel %vm72_vm5, %v79_v49, %v81_v57  ;;  %v369_v63 = vshrl.u32 %v2205_v27, %v2258_v45  ;;  %v77_v8 = vsel %vm73_vm4, %v61_v43, %v76_v56 }
  0x1c   :  { %v86_v62 = vsel %vm72_vm5, %v83_v50, %v85_v58  ;;  %v112_v6 = vand.u32 65535, %v82_v61  ;;  %v113_v7 = vshrl.u32 %v82_v61, 16  ;;  %v2292_v9 = vor.u32 %v366_v59, %v365_v54 }
  0x1d   :  { %v90_v3 = vand.u32 65535, %v86_v62  ;;  %v91_v4 = vshrl.u32 %v86_v62, 16  ;;  %v2294_v10 = vor.u32 %v369_v63, %v368_v55  ;;  %v371_v11 = vshll.u32 %v2205_v27, %v2243_v21 }
  0x1e   :  { %v372_v15 = vshrl.u32 %v2206_v29, %v2258_v45  ;;  %v114_v18 = vmul.u32 %v112_v6, %v88_v33  ;;  %v115_v19 = vmul.u32 %v113_v7, %v88_v33  ;;  %v116_v22 = vmul.u32 %v112_v6, %v89_v38 }
  0x1f   :  { %v92_v12 = vmul.u32 %v90_v3, %v88_v33  ;;  %v93_v13 = vmul.u32 %v91_v4, %v88_v33  ;;  %v94_v14 = vmul.u32 %v90_v3, %v89_v38  ;;  %v95_v17 = vmul.u32 %v91_v4, %v89_v38 }
  0x20   :  { %v117_v28 = vmul.u32 %v113_v7, %v89_v38  ;;  %v118_v32 = vshll.u32 %v115_v19, 16  ;;  %v119_v35 = vshrl.u32 %v115_v19, 16  ;;  %v120_v36 = vshll.u32 %v116_v22, 16 }
  0x21   :  { %v96_v24 = vshll.u32 %v93_v13, 16  ;;  %v97_v25 = vshrl.u32 %v93_v13, 16  ;;  %v98_v26 = vshll.u32 %v94_v14, 16  ;;  %v99_v30 = vshrl.u32 %v94_v14, 16 }
  0x22   :  { %v121_v37 = vshrl.u32 %v116_v22, 16  ;;  %v374_v39 = vshll.u32 %v2206_v29, %v2243_v21  ;;  %v2209_v41 = vmov 0   ;;  %vm122_vm7 = vc.u32 %v114_v18, %v118_v32 }
  0x23   :  { %vm100_vm6 = vc.u32 %v92_v12, %v96_v24  ;;  %v102_v27 = vadd.s32 %v96_v24, %v92_v12  ;;  %v124_v33 = vadd.s32 %v118_v32, %v114_v18  ;;  %v375_v43 = vshrl.u32 %v2207_v31, %v2258_v45 }
  0x24   :  { %v101_v42 = vsel %vm100_vm6, 1, %v2209_v41  ;;  %v123_v38 = vsel %vm122_vm7, 1, %v2209_v41  ;;  %v377_v46 = vshll.u32 %v2207_v31, %v2243_v21  ;;  %v373_v29 = vor.u32 %v372_v15, %v371_v11 }
  0x25   :  { %v103_v44 = vadd.s32 %v101_v42, %v95_v17  ;;  %vm104_vm8 = vc.u32 %v102_v27, %v98_v26  ;;  %v125_v48 = vadd.s32 %v123_v38, %v117_v28  ;;  %vm126_vm9 = vc.u32 %v124_v33, %v120_v36 }
  0x26   :  { %v105_v47 = vsel %vm104_vm8, 1, %v2209_v41  ;;  %v127_v50 = vsel %vm126_vm9, 1, %v2209_v41  ;;  %v376_v52 = vor.u32 %v375_v43, %v374_v39  ;;  %v378_v53 = vshrl.u32 %v2208_v40, %v2258_v45 }
  0x27   :  { %v107_v49 = vadd.s32 %v105_v47, %v103_v44  ;;  %v2311_v54 = vadd.s32 %v124_v33, %v120_v36  ;;  %v129_v55 = vadd.s32 %v127_v50, %v125_v48  ;;  %vm380_vm10 = vcmp.lt.s32.totalorder %v2267_v51, 1 }
  0x28   :  { %vm382_vm11 = vcmp.lt.s32.totalorder %v2267_v51, 3  ;;  %v379_v31 = vor.u32 %v378_v53, %v377_v46  ;;  %vm381_vm12 = vcmp.lt.s32.totalorder %v2267_v51, 2  ;;  %vm383_vm13 = vcmp.lt.s32.totalorder %v2267_v51, 4 }
  0x29   :  { %v108_v21 = vadd.s32 %v107_v49, %v97_v25  ;;  %v78_v56 = vsel %vm72_vm5, %v75_v60, %v77_v8  ;;  %v130_v57 = vadd.s32 %v129_v55, %v119_v35  ;;  %v388_v40 = vsel %vm380_vm10, %v2292_v9, %v2294_v10 }
  0x2a   :  { %v389_v58 = vsel %vm383_vm13, %v376_v52, 920167782  ;;  %v392_v62 = vsel %vm380_vm10, %v2294_v10, %v373_v29  ;;  %v397_v20 = vand.u32 65535, %v2249_v34  ;;  %v393_v3 = vsel %vm383_vm13, %v379_v31, 1326507024 }
  0x2b   :  { %v2325_v59 = vadd.s32 %v108_v21, %v99_v30  ;;  %v390_v61 = vsel %vm382_vm11, %v373_v29, %v389_v58  ;;  %v131_v60 = vadd.s32 %v130_v57, %v121_v37  ;;  %v398_v4 = vshrl.u32 %v2249_v34, 16 }
  0x2c   :  { %v391_v63 = vsel %vm381_vm12, %v388_v40, %v390_v61  ;;  %v132_v6 = vmul.u32 %v2239_v16, %v78_v56  ;;  %v394_v7 = vsel %vm382_vm11, %v376_v52, %v393_v3  ;;  %v364_v18 = vshrl.u32 %v2203_v23, %v2258_v45 }
  0x2d   :  { %vm134_vm14 = vc.u32 %v2325_v59, %v2311_v54  ;;  %v421_v8 = vand.u32 65535, %v391_v63  ;;  %v135_v11 = vadd.s32 1, %v131_v60  ;;  %v395_v12 = vsel %vm381_vm12, %v392_v62, %v394_v7 }
  0x2e   :  { %v422_v13 = vshrl.u32 %v391_v63, 16  ;;  %v399_v14 = vand.u32 65535, %v395_v12  ;;  %v400_v15 = vshrl.u32 %v395_v12, 16  ;;  %v385_v35 = vsel %vm383_vm13, %v373_v29, 2102212464 }
  0x2f   :  { %v136_v17 = vsel %vm134_vm14, %v135_v11, %v131_v60  ;;  %v425_v16 = vmul.u32 %v421_v8, %v398_v4  ;;  %v423_v26 = vmul.u32 %v421_v8, %v397_v20  ;;  %v384_v37 = vsel %vm380_vm10, %v364_v18, %v2292_v9 }
  0x30   :  { %v424_v19 = vmul.u32 %v422_v13, %v397_v20  ;;  %v137_v22 = vadd.s32 %v136_v17, %v132_v6  ;;  %v401_v24 = vmul.u32 %v399_v14, %v397_v20  ;;  %v402_v25 = vmul.u32 %v400_v15, %v397_v20 }
  0x31   :  { %v403_v28 = vmul.u32 %v399_v14, %v398_v4  ;;  %v404_v36 = vmul.u32 %v400_v15, %v398_v4  ;;  %v426_v23 = vmul.u32 %v422_v13, %v398_v4  ;;  %v429_v45 = vshll.u32 %v425_v16, 16 }
  0x32   :  { %v427_v30 = vshll.u32 %v424_v19, 16  ;;  %v138_v32 = vadd.s32 536870912, %v137_v22  ;;  %v405_v27 = vshll.u32 %v402_v25, 16  ;;  %v386_v43 = vsel %vm382_vm11, %v2294_v10, %v385_v35 }
  0x33   :  { %v407_v39 = vshll.u32 %v403_v28, 16  ;;  %v406_v9 = vshrl.u32 %v402_v25, 16  ;;  %v428_v49 = vshrl.u32 %v424_v19, 16  ;;  %v408_v53 = vshrl.u32 %v403_v28, 16 }
  0x34   :  { %v2352_v42 = vshrl.u32 %v138_v32, 30  ;;  %vm409_vm15 = vc.u32 %v401_v24, %v405_v27  ;;  %v411_v33 = vadd.s32 %v405_v27, %v401_v24  ;;  %vm431_vm0 = vc.u32 %v423_v26, %v427_v30 }
  0x35   :  { %v410_v44 = vsel %vm409_vm15, 1, %v2209_v41  ;;  %v432_v38 = vsel %vm431_vm0, 1, %v2209_v41  ;;  %v433_v46 = vadd.s32 %v427_v30, %v423_v26  ;;  %v430_v21 = vshrl.u32 %v425_v16, 16 }
  0x36   :  { %v140_v47 = vshll.u32 %v2352_v42, 30  ;;  %v412_v48 = vadd.s32 %v410_v44, %v404_v36  ;;  %vm413_vm1 = vc.u32 %v411_v33, %v407_v39  ;;  %v434_v50 = vadd.s32 %v432_v38, %v426_v23 }
  0x37   :  { %v414_v29 = vsel %vm413_vm1, 1, %v2209_v41  ;;  %vm435_vm2 = vc.u32 %v433_v46, %v429_v45  ;;  %v437_v40 = vadd.s32 %v433_v46, %v429_v45  ;;  %v387_v58 = vsel %vm381_vm12, %v384_v37, %v386_v43 }
  0x38   :  { %v141_v52 = vsub.s32 %v137_v22, %v140_v47  ;;  %v416_v55 = vadd.s32 %v414_v29, %v412_v48  ;;  %v436_v10 = vsel %vm435_vm2, 1, %v2209_v41  ;;  %v441_v3 = vmul.u32 %v2249_v34, %v387_v58 }
  0x39   :  { %v438_v31 = vadd.s32 %v436_v10, %v434_v50  ;;  %v133_v41 = vadd.s32 %v2311_v54, %v2325_v59  ;;  %vm41_vm7 = vcmp.lt.s32.totalorder %v2227_v0, 0  ;;  %vm2370_vm8 = vcmp.le.f32.partialorder %v39_v2, 0.7853982 }
  0x3a   :  { %vm142_vm3 = vcmp.lt.s32.totalorder %v141_v52, 0  ;;  %v143_v56 = vsub.s32 0, %v141_v52  ;;  %v417_v57 = vadd.s32 %v416_v55, %v406_v9  ;;  %vm350_vm10 = vcmp.lt.s32.totalorder %v2229_v1, 0 }
  0x3b   :  { %v439_v61 = vadd.s32 %v438_v31, %v428_v49  ;;  %vm349_vm11 = vcmp.le.f32.partialorder %v348_v5, 0.7853982 }
  0x3c   :  { %v144_v62 = vsel %vm142_vm3, %v143_v56, %v141_v52  ;;  %v418_v20 = vadd.s32 %v417_v57, %v408_v53 }
  0x3d   :  { %v145_v60 = vclz %v144_v62  ;;  %v440_v63 = vadd.s32 %v439_v61, %v430_v21 }
  0x3e   :  { %vm443_vm4 = vc.u32 %v418_v20, %v437_v40  ;;  %v442_v23 = vadd.s32 %v437_v40, %v418_v20 }
  0x3f   :  { %v2024_v4 = vadd.s32 4294967294, %v145_v60  ;;  %v444_v6 = vadd.s32 1, %v440_v63 }
  0x41   :  { %vm2025_vm5 = vcmp.lt.s32.totalorder %v2024_v4, 0  ;;  %v445_v7 = vsel %vm443_vm4, %v444_v6, %v440_v63 }
  0x42   :  { %v148_v8 = vsel %vm2025_vm5, 0, %v2024_v4  ;;  %v446_v11 = vadd.s32 %v445_v7, %v441_v3 }
  0x43   :  { %v149_v12 = vsub.s32 32, %v148_v8  ;;  %v150_v51 = vshll.u32 %v141_v52, %v148_v8  ;;  %v153_v13 = vsub.s32 4294967266, %v148_v8  ;;  %v163_v52 = vsub.s32 4, %v2352_v42 }
  0x44   :  { %v447_v17 = vadd.s32 536870912, %v446_v11 }
  0x45   :  { %v151_v14 = vshrl.u32 %v133_v41, %v149_v12  ;;  %v154_v15 = vadd.s32 127, %v153_v13  ;;  %v164_v56 = vsel %vm41_vm7, %v163_v52, %v2352_v42  ;;  %v657_v41 = vlaneseq }
  0x46   :  { %v448_v16 = vshrl.u32 %v447_v17, 30  ;;  %v166_v62 = vsel %vm2370_vm8, 0, %v164_v56  ;;  %v2210_v52 = vmov -0.5  }
  0x47   :  { %v152_v18 = vor.u32 %v151_v14, %v150_v51  ;;  %v155_v19 = vshll.u32 %v154_v15, 23  ;;  %v337_v4 = vadd.s32 3, %v166_v62  ;;  %v183_v12 = vand.u32 3, %v166_v62 }
  0x48   :  { %v449_v24 = vshll.u32 %v448_v16, 30  ;;  %v472_v61 = vsub.s32 4, %v448_v16  ;;  %v2389_v17 = vshrl.u32 %v657_v41, 7  ;;  %v2130_v41 = vld [vmem:[#allocation2 + $0x1] ss:$0 sm:$0xff] }
  0x49   :  { %v156_v34 = vor.u32 4788187, %v155_v19  ;;  %v159_v22 = vcvt.s32.f32 %v152_v18  ;;  %v338_v15 = vand.u32 3, %v337_v4  ;;  %vm185_vm12 = vcmp.eq.s32.totalorder %v183_v12, 0 }
  0x4a   :  { %v450_v26 = vsub.s32 %v446_v11, %v449_v24  ;;  %v473_v6 = vsel %vm350_vm10, %v472_v61, %v448_v16  ;;  %vm188_vm13 = vcmp.eq.s32.totalorder %v183_v12, 2  ;;  %vm184_vm0 = vcmp.lt.s32.totalorder %v183_v12, 2 }
  0x4b   :  { %v157_v25 = vand.u32 2147483647, %v156_v34  ;;  %v475_v51 = vsel %vm349_vm11, 0, %v473_v6  ;;  %vm340_vm14 = vcmp.eq.s32.totalorder %v338_v15, 0  ;;  %vm343_vm15 = vcmp.eq.s32.totalorder %v338_v15, 2 }
  0x4c   :  { %vm451_vm6 = vcmp.lt.s32.totalorder %v450_v26, 0  ;;  %v452_v54 = vsub.s32 0, %v450_v26  ;;  %vm339_vm1 = vcmp.lt.s32.totalorder %v338_v15, 2  ;;  %v696_v12 = vshra.s32 %v2389_v17, 2 }
  0x4d   :  { %v160_v28 = vmul.f32 %v159_v22, %v157_v25  ;;  %v646_v22 = vadd.s32 3, %v475_v51  ;;  %v492_v25 = vand.u32 3, %v475_v51 }
  0x4e   :  { %v453_v32 = vsel %vm451_vm6, %v452_v54, %v450_v26  ;;  %vm182_vm6 = vweird.f32 %v2227_v0 }
  0x4f   :  { %v161_v30 = vxor.u32 2147483648, %v160_v28  ;;  %v454_v35 = vclz %v453_v32  ;;  %v647_v32 = vand.u32 3, %v646_v22  ;;  %vm493_vm2 = vcmp.lt.s32.totalorder %v492_v25, 2 }
  0x50   :  { %vm497_vm3 = vcmp.eq.s32.totalorder %v492_v25, 2 }
  0x51   :  { %v162_v36 = vsel %vm41_vm7, %v161_v30, %v160_v28  ;;  %v2030_v37 = vadd.s32 4294967294, %v454_v35  ;;  %vm491_vm7 = vweird.f32 %v2229_v1 }
  0x52   :  { %v165_v27 = vsel %vm2370_vm8, %v2227_v0, %v162_v36  ;;  %vm652_vm8 = vcmp.eq.s32.totalorder %v647_v32, 2  ;;  %v2418_v0 = vadd.s32 8, %v2389_v17 }
  0x53   :  { %v167_v39 = vmul.f32 %v165_v27, %v165_v27  ;;  %vm2031_vm9 = vcmp.lt.s32.totalorder %v2030_v37, 0 }
  0x54   :  { %v457_v2 = vsel %vm2031_vm9, 0, %v2030_v37  ;;  %vm659_vm9 = vcmp.lt.s32.totalorder %v2389_v17, 4  ;;  %v697_v51 = vshra.s32 %v2418_v0, 2 }
  0x55   :  { %v168_v45 = vmul.f32 -0.001358992, %v167_v39  ;;  %v175_v33 = vmul.f32 -0.00019511016, %v167_v39  ;;  %v458_v43 = vsub.s32 32, %v457_v2  ;;  %v459_v44 = vshll.u32 %v450_v26, %v457_v2 }
  0x56   :  { %v462_v38 = vsub.s32 4294967266, %v457_v2  ;;  %v2392_v26 = vand.u32 3, %v2389_v17  ;;  %v2125_v2 = vld [vmem:[#allocation2 + $0xa] ss:$0 sm:$0xff] }
  0x57   :  { %v169_v46 = vadd.f32 0.041655596, %v168_v45  ;;  %v176_v47 = vadd.f32 0.008332121, %v175_v33  ;;  %v460_v9 = vshrl.u32 %v442_v23, %v458_v43  ;;  %v2124_v33 = vld [vmem:[#allocation2 + $0x3] ss:$0 sm:$0xff] }
  0x58   :  { %v463_v48 = vadd.s32 127, %v462_v38  ;;  %vm661_vm4 = vcmp.eq.s32.totalorder %v2392_v26, 0  ;;  %vm662_vm5 = vcmp.eq.s32.totalorder %v2392_v26, 3  ;;  %v2127_v38 = vld [vmem:[#allocation2 + $0xb] ss:$0 sm:$0xff] }
  0x59   :  { %v177_v29 = vmul.f32 %v176_v47, %v167_v39  ;;  %v461_v49 = vor.u32 %v460_v9, %v459_v44  ;;  %v170_v53 = vmul.f32 %v169_v46, %v167_v39  ;;  %v2126_v44 = vld [vmem:[#allocation2 + $0x4] ss:$0 sm:$0xff] }
  0x5a   :  { %v464_v50 = vshll.u32 %v463_v48, 23 }
  0x5b   :  { %v178_v55 = vadd.f32 -0.16666654, %v177_v29  ;;  %v468_v21 = vcvt.s32.f32 %v461_v49  ;;  %v171_v57 = vadd.f32 -0.4999988, %v170_v53 }
  0x5c   :  { %v465_v10 = vor.u32 4788187, %v464_v50 }
  0x5d   :  { %v179_v40 = vmul.f32 %v178_v55, %v167_v39  ;;  %v172_v60 = vmul.f32 %v171_v57, %v167_v39 }
  0x5e   :  { %v466_v31 = vand.u32 2147483647, %v465_v10  ;;  %v669_v10 = vsel %vm659_vm9, %v2124_v33, %v2125_v2 }
  0x5f   :  { %v180_v63 = vadd.f32 1.0, %v179_v40  ;;  %v173_v8 = vadd.f32 1.0, %v172_v60  ;;  %v2128_v60 = vld [vmem:[#allocation2] ss:$0 sm:$0xff] }
  0x60   :  { %v469_v58 = vmul.f32 %v468_v21, %v466_v31  ;;  %v672_v21 = vsel %vm659_vm9, %v2126_v44, %v2127_v38 }
  0x61   :  { %v181_v11 = vmul.f32 %v180_v63, %v165_v27  ;;  %v189_v34 = vxor.u32 2147483648, %v173_v8  ;;  %v2129_v63 = vld [vmem:[#allocation2 + $0x7] ss:$0 sm:$0xff] }
  0x62   :  { %v470_v20 = vxor.u32 2147483648, %v469_v58 }
  0x63   :  { %v186_v19 = vxor.u32 2147483648, %v181_v11  ;;  %v190_v30 = vsel %vm188_vm13, %v189_v34, %v181_v11  ;;  %v345_v36 = vsel %vm343_vm15, %v189_v34, %v181_v11  ;;  %vm648_vm13 = vcmp.lt.s32.totalorder %v647_v32, 2 }
  0x64   :  { %v471_v3 = vsel %vm350_vm10, %v470_v20, %v469_v58  ;;  %vm663_vm10 = vmor %vm661_vm4, %vm662_vm5  ;;  %vm699_vm15 = vcmp.eq.s32.totalorder %v696_v12, 0  ;;  %vm704_vm5 = vcmp.lt.s32.totalorder %v697_v51, 2 }
  0x65   :  { %v474_v42 = vsel %vm349_vm11, %v2229_v1, %v471_v3  ;;  %v187_v59 = vsel %vm185_vm12, %v173_v8, %v186_v19  ;;  %v342_v35 = vsel %vm340_vm14, %v173_v8, %v186_v19  ;;  %vm665_vm11 = vcmp.lt.s32.totalorder %v2392_v26, 2 }
  0x66   :  { %v476_v7 = vmul.f32 %v474_v42, %v474_v42  ;;  %v191_v39 = vsel %vm184_vm0, %v187_v59, %v190_v30  ;;  %v346_v43 = vsel %vm339_vm1, %v342_v35, %v345_v36  ;;  %vm494_vm12 = vcmp.eq.s32.totalorder %v492_v25, 0 }
  0x67   :  { %v192_v9 = vsel %vm182_vm6, nan, %v191_v39  ;;  %vm649_vm14 = vcmp.eq.s32.totalorder %v647_v32, 0  ;;  %v347_v48 = vsel %vm182_vm6, nan, %v346_v43  ;;  %v664_v53 = vsel %vm663_vm10, 0.5, %v2210_v52 }
  0x68   :  { %v477_v13 = vmul.f32 -0.001358992, %v476_v7  ;;  %v484_v14 = vmul.f32 -0.00019511016, %v476_v7  ;;  %v666_v55 = vsel %vm665_vm11, 0.5, %v2210_v52  ;;  %v673_v58 = vperm.slane %v192_v9, 0 }
  0x69   :  { %v676_v61 = vperm.slane %v347_v48, 0  ;;  %v685_v3 = vmul.f32 %v669_v10, %v664_v53  ;;  %v686_v4 = vmul.f32 %v672_v21, %v666_v55  ;;  %v2436_v19 = vand.u32 3, %v2418_v0 }
  0x6a   :  { %v478_v5 = vadd.f32 0.041655596, %v477_v13  ;;  %v485_v18 = vadd.f32 0.008332121, %v484_v14  ;;  %vm700_vm0 = vcmp.eq.s32.totalorder %v697_v51, 0  ;;  %vm701_vm1 = vcmp.eq.s32.totalorder %v696_v12, 2 }
  0x6b   :  { %vm705_vm6 = vcmp.eq.s32.totalorder %v2436_v19, 0  ;;  %vm708_vm10 = vcmp.lt.s32.totalorder %v2436_v19, 2 }
  0x6c   :  { %v479_v16 = vmul.f32 %v478_v5, %v476_v7  ;;  %v486_v24 = vmul.f32 %v485_v18, %v476_v7  ;;  %v681_v5 = vsel %vm659_vm9, %v2128_v60, %v2129_v63 }
  0x6e   :  { %v480_v28 = vadd.f32 -0.4999988, %v479_v16  ;;  %v487_v54 = vadd.f32 -0.16666654, %v486_v24 }
  0x70   :  { %v481_v27 = vmul.f32 %v480_v28, %v476_v7  ;;  %v488_v37 = vmul.f32 %v487_v54, %v476_v7  ;;  %v2131_v7 = vld [vmem:[#allocation2 + $0x8] ss:$0 sm:$0xff] }
  0x71   :  { %v684_v18 = vsel %vm659_vm9, %v2130_v41, %v2131_v7 }
  0x72   :  { %v482_v23 = vadd.f32 1.0, %v481_v27  ;;  %v489_v45 = vadd.f32 1.0, %v488_v37 }
  0x74   :  { %v490_v46 = vmul.f32 %v489_v45, %v474_v42  ;;  %v498_v47 = vxor.u32 2147483648, %v482_v23 }
  0x76   :  { %v495_v29 = vxor.u32 2147483648, %v490_v46  ;;  %v499_v49 = vsel %vm497_vm3, %v498_v47, %v490_v46  ;;  %v654_v50 = vsel %vm652_vm8, %v498_v47, %v490_v46  ;;  %vm703_vm3 = vcmp.lt.s32.totalorder %v696_v12, 2 }
  0x77   :  { %vm707_vm8 = vcmp.eq.s32.totalorder %v2436_v19, 2 }
  0x78   :  { %v496_v31 = vsel %vm494_vm12, %v482_v23, %v495_v29  ;;  %v651_v56 = vsel %vm649_vm14, %v482_v23, %v495_v29 }
  0x79   :  { %v500_v57 = vsel %vm493_vm2, %v496_v31, %v499_v49  ;;  %v655_v40 = vsel %vm648_vm13, %v651_v56, %v654_v50  ;;  %vm702_vm2 = vcmp.eq.s32.totalorder %v697_v51, 2 }
  0x7a   :  { %v501_v62 = vsel %vm491_vm7, nan, %v500_v57  ;;  %v656_v20 = vsel %vm491_vm7, nan, %v655_v40  ;;  %vm706_vm7 = vcmp.eq.s32.totalorder %v2392_v26, 2 }
  0x7b   :  { %v674_v6 = vperm.slane %v501_v62, 0  ;;  %v677_v42 = vperm.slane %v656_v20, 0 }
  0x7d   :  { %v675_v8 = vsel %vm659_vm9, %v673_v58, %v674_v6  ;;  %v678_v11 = vsel %vm659_vm9, %v676_v61, %v677_v42 }
  0x7e   :  { %v687_v1 = vmul.f32 %v685_v3, %v675_v8  ;;  %v688_v13 = vmul.f32 %v686_v4, %v678_v11  ;;  %v691_v14 = vmul.f32 %v685_v3, %v678_v11  ;;  %v692_v15 = vmul.f32 %v686_v4, %v675_v8 }
  0x80   :  { %v689_v34 = vsub.f32 %v687_v1, %v688_v13  ;;  %v693_v22 = vadd.f32 %v692_v15, %v691_v14 }
  0x82   :  { %v2438_v16 = vadd.f32 %v689_v34, %v681_v5  ;;  %v2440_v24 = vadd.f32 %v693_v22, %v684_v18 }
  0x84   :  { %v2447_v25 = vperm.slane %v2438_v16, 0  ;;  %v2450_v28 = vperm.slane %v2438_v16, 1  ;;  %v713_v54 = vperm.slane %v2438_v16, 2  ;;  %v2454_v59 = vperm.slane %v2438_v16, 3 }
  0x85   :  { %v2457_v30 = vperm.slane %v2440_v24, 0  ;;  %v2460_v32 = vperm.slane %v2440_v24, 1  ;;  %v723_v35 = vperm.slane %v2440_v24, 2  ;;  %v2464_v36 = vperm.slane %v2440_v24, 3 }
  0x86   :  { %v711_v27 = vsel %vm699_vm15, %v2447_v25, %v2450_v28  ;;  %v712_v37 = vsel %vm700_vm0, %v2447_v25, %v2450_v28  ;;  %v715_v39 = vsel %vm701_vm1, %v713_v54, %v2454_v59  ;;  %v716_v23 = vsel %vm702_vm2, %v713_v54, %v2454_v59 }
  0x87   :  { %v2477_v45 = vsel %vm703_vm3, %v711_v27, %v715_v39  ;;  %v2480_v33 = vsel %vm704_vm5, %v712_v37, %v716_v23  ;;  %v721_v2 = vsel %vm699_vm15, %v2457_v30, %v2460_v32  ;;  %v722_v43 = vsel %vm700_vm0, %v2457_v30, %v2460_v32 }
  0x88   :  { %v725_v44 = vsel %vm701_vm1, %v723_v35, %v2464_v36  ;;  %v726_v38 = vsel %vm702_vm2, %v723_v35, %v2464_v36  ;;  %v729_v46 = vsel %vm699_vm15, %v2450_v28, %v713_v54  ;;  %v730_v47 = vsel %vm700_vm0, %v2450_v28, %v713_v54 }
  0x89   :  { %v2497_v9 = vsel %vm703_vm3, %v721_v2, %v725_v44  ;;  %v2500_v48 = vsel %vm704_vm5, %v722_v43, %v726_v38  ;;  %v731_v29 = vsel %vm701_vm1, %v2454_v59, %v2447_v25  ;;  %v732_v49 = vsel %vm702_vm2, %v2454_v59, %v2447_v25 }
  0x8a   :  { %v733_v50 = vsel %vm703_vm3, %v729_v46, %v731_v29  ;;  %v734_v52 = vsel %vm704_vm5, %v730_v47, %v732_v49  ;;  %v735_v53 = vsel %vm699_vm15, %v2460_v32, %v723_v35  ;;  %v736_v55 = vsel %vm700_vm0, %v2460_v32, %v723_v35 }
  0x8b   :  { %v737_v10 = vsel %vm701_vm1, %v2464_v36, %v2457_v30  ;;  %v738_v21 = vsel %vm702_vm2, %v2464_v36, %v2457_v30  ;;  %v2521_v31 = vperm.slane %v2438_v16, 4  ;;  %v2524_v56 = vperm.slane %v2438_v16, 5 }
  0x8c   :  { %v739_v57 = vsel %vm703_vm3, %v735_v53, %v737_v10  ;;  %v740_v40 = vsel %vm704_vm5, %v736_v55, %v738_v21  ;;  %v745_v58 = vperm.slane %v2438_v16, 6  ;;  %v2530_v61 = vperm.slane %v2438_v16, 7 }
  0x8d   :  { %v743_v62 = vsel %vm661_vm4, %v2521_v31, %v2524_v56  ;;  %v744_v20 = vsel %vm705_vm6, %v2521_v31, %v2524_v56  ;;  %v2541_v60 = vperm.slane %v2440_v24, 4  ;;  %v2544_v63 = vperm.slane %v2440_v24, 5 }
  0x8e   :  { %v747_v3 = vsel %vm706_vm7, %v745_v58, %v2530_v61  ;;  %v748_v4 = vsel %vm707_vm8, %v745_v58, %v2530_v61  ;;  %v755_v6 = vperm.slane %v2440_v24, 6  ;;  %v2554_v42 = vperm.slane %v2440_v24, 7 }
  0x8f   :  { %v749_v41 = vsel %vm665_vm11, %v743_v62, %v747_v3  ;;  %v750_v7 = vsel %vm708_vm10, %v744_v20, %v748_v4  ;;  %v753_v8 = vsel %vm661_vm4, %v2541_v60, %v2544_v63  ;;  %v754_v11 = vsel %vm705_vm6, %v2541_v60, %v2544_v63 }
  0x90   :  { %v757_v12 = vsel %vm706_vm7, %v755_v6, %v2554_v42  ;;  %v758_v51 = vsel %vm707_vm8, %v755_v6, %v2554_v42  ;;  %v761_v1 = vsel %vm661_vm4, %v2524_v56, %v745_v58  ;;  %v762_v13 = vsel %vm705_vm6, %v2524_v56, %v745_v58 }
  0x91   :  { %v759_v14 = vsel %vm665_vm11, %v753_v8, %v757_v12  ;;  %v760_v15 = vsel %vm708_vm10, %v754_v11, %v758_v51  ;;  %v763_v5 = vsel %vm706_vm7, %v2530_v61, %v2521_v31  ;;  %v764_v18 = vsel %vm707_vm8, %v2530_v61, %v2521_v31 }
  0x92   :  { %v765_v34 = vsel %vm665_vm11, %v761_v1, %v763_v5  ;;  %v766_v22 = vsel %vm708_vm10, %v762_v13, %v764_v18  ;;  %v767_v54 = vsel %vm661_vm4, %v2544_v63, %v755_v6  ;;  %v768_v35 = vsel %vm705_vm6, %v2544_v63, %v755_v6 }
  0x93   :  { %v769_v27 = vsel %vm706_vm7, %v2554_v42, %v2541_v60  ;;  %v770_v37 = vsel %vm707_vm8, %v2554_v42, %v2541_v60  ;;  %v2611_v39 = vsub.f32 %v733_v50, %v2477_v45  ;;  %v2614_v23 = vsub.f32 %v734_v52, %v2480_v33 }
  0x94   :  { %v771_v2 = vsel %vm665_vm11, %v767_v54, %v769_v27  ;;  %v772_v43 = vsel %vm708_vm10, %v768_v35, %v770_v37  ;;  %v2621_v44 = vsub.f32 %v739_v57, %v2497_v9  ;;  %v2624_v38 = vsub.f32 %v740_v40, %v2500_v48 }
  0x95   :  { %v777_v46 = vsub.f32 %v749_v41, %v765_v34  ;;  %v778_v47 = vsub.f32 %v750_v7, %v766_v22  ;;  %v779_v29 = vsub.f32 %v759_v14, %v771_v2  ;;  %v780_v49 = vsub.f32 %v760_v15, %v772_v43 }
  0x96   :  { %v781_v50 = vsub.f32 %v749_v41, %v2477_v45  ;;  %v782_v52 = vsub.f32 %v750_v7, %v2480_v33  ;;  %v783_v26 = vsub.f32 %v759_v14, %v2497_v9  ;;  %v784_v53 = vsub.f32 %v760_v15, %v2500_v48 }
  0x97   :  { %v785_v19 = vmul.f32 %v779_v29, %v2611_v39  ;;  %v786_v55 = vmul.f32 %v780_v49, %v2614_v23  ;;  %v787_v10 = vmul.f32 %v777_v46, %v2621_v44  ;;  %v788_v21 = vmul.f32 %v778_v47, %v2624_v38 }
  0x98   :  { %v791_v57 = vmul.f32 %v781_v50, %v779_v29  ;;  %v792_v40 = vmul.f32 %v782_v52, %v780_v49  ;;  %v793_v58 = vmul.f32 %v783_v26, %v777_v46  ;;  %v794_v62 = vmul.f32 %v784_v53, %v778_v47 }
  0x99   :  { %v789_v20 = vsub.f32 %v785_v19, %v787_v10  ;;  %v790_v3 = vsub.f32 %v786_v55, %v788_v21  ;;  %v797_v4 = vmul.f32 %v783_v26, %v2611_v39  ;;  %v798_v6 = vmul.f32 %v784_v53, %v2614_v23 }
  0x9a   :  { %v2636_v41 = vsub.f32 %v791_v57, %v793_v58  ;;  %v2638_v7 = vsub.f32 %v792_v40, %v794_v62  ;;  %v799_v8 = vmul.f32 %v781_v50, %v2621_v44  ;;  %v800_v11 = vmul.f32 %v782_v52, %v2624_v38 }
  0x9b   :  { %vm833_vm4 = vcmp.lt.f32.partialorder %v789_v20, 0.0  ;;  %vm834_vm11 = vcmp.lt.f32.partialorder %v790_v3, 0.0  ;;  %v2211_v15 = vmov 1e-08   ;;  %v881_v47 = vsel %vm659_vm9, %v2521_v31, %v2447_v25 }
  0x9c   :  { %v801_v12 = vsub.f32 %v797_v4, %v799_v8  ;;  %v802_v51 = vsub.f32 %v798_v6, %v800_v11  ;;  %v803_v1 = vmul.f32 %v2636_v41, %v789_v20  ;;  %v807_v13 = vsub.f32 %v2636_v41, %v789_v20 }
  0x9d   :  { %v808_v14 = vsub.f32 %v2638_v7, %v790_v3  ;;  %v835_v5 = vsel %vm833_vm4, -1e-08, %v2211_v15  ;;  %v836_v18 = vsel %vm834_vm11, -1e-08, %v2211_v15  ;;  %v804_v34 = vmul.f32 %v2638_v7, %v790_v3 }
  0x9e   :  { %v815_v22 = vmul.f32 %v801_v12, %v789_v20  ;;  %v809_v54 = vmul.f32 %v807_v13, %v789_v20  ;;  %v816_v35 = vmul.f32 %v802_v51, %v790_v3  ;;  %v819_v27 = vsub.f32 %v801_v12, %v789_v20 }
  0x9f   :  { %v820_v37 = vsub.f32 %v802_v51, %v790_v3  ;;  %v810_v2 = vmul.f32 %v808_v14, %v790_v3  ;;  %v837_v43 = vadd.f32 %v835_v5, %v789_v20  ;;  %v2646_v46 = vadd.f32 %v836_v18, %v790_v3 }
  0xa0   :  { %vm805_vm12 = vcmp.gt.f32.partialorder %v803_v1, 0.0  ;;  %vm806_vm13 = vcmp.gt.f32.partialorder %v804_v34, 0.0  ;;  %v821_v29 = vmul.f32 %v819_v27, %v789_v20  ;;  %vm811_vm14 = vcmp.lt.f32.partialorder %v809_v54, 0.0 }
  0xa1   :  { %v822_v49 = vmul.f32 %v820_v37, %v790_v3  ;;  %2132 = vrcp.f32 %v837_v43  ;;  %vm817_vm15 = vcmp.gt.f32.partialorder %v815_v22, 0.0  ;;  %vm818_vm0 = vcmp.gt.f32.partialorder %v816_v35, 0.0 }
  0xa2   :  { %2134 = vrcp.f32 %v2646_v46  ;;  %vm812_vm1 = vcmp.lt.f32.partialorder %v810_v2, 0.0  ;;  %vm844_vm2 = vweird.f32 %v837_v43  ;;  %v848_v50 = vand.u32 2147483647, %v837_v43 }
  0xa3   :  { %v850_v52 = vand.u32 2147483648, %v837_v43  ;;  %v882_v26 = vsel %vm659_vm9, %v2541_v60, %v2457_v30  ;;  %v883_v25 = vsel %vm659_vm9, %v2524_v56, %v2450_v28  ;;  %v884_v31 = vsel %vm659_vm9, %v2544_v63, %v2460_v32  ;;  %vm2687_vm8 = vmand %vm806_vm13, %vm812_vm1 }
  0xa4   :  { %v885_v53 = vsel %vm659_vm9, %v2530_v61, %v2454_v59  ;;  %vm823_vm3 = vcmp.lt.f32.partialorder %v821_v29, 0.0  ;;  %vm824_vm5 = vcmp.lt.f32.partialorder %v822_v49, 0.0  ;;  %v886_v30 = vsel %vm659_vm9, %v2554_v42, %v2464_v36  ;;  %vm2680_vm9 = vmand %vm805_vm12, %vm811_vm14 }
  0xa5   :  { %v887_v60 = vsub.f32 %v883_v25, %v881_v47  ;;  %vm859_vm6 = vweird.f32 %v2646_v46  ;;  %v863_v28 = vand.u32 2147483647, %v2646_v46  ;;  %v888_v56 = vsub.f32 %v884_v31, %v882_v26  ;;  %vm2693_vm10 = vmand %vm817_vm15, %vm823_vm3 }
  0xa6   :  { %v889_v19 = vsub.f32 %v885_v53, %v881_v47  ;;  %v890_v63 = vsub.f32 %v886_v30, %v882_v26  ;;  %v891_v55 = vsub.f32 %v2438_v16, %v881_v47  ;;  %v892_v59 = vsub.f32 %v2440_v24, %v882_v26  ;;  %vm2699_vm11 = vmand %vm818_vm0, %vm824_vm5 }
  0xa7   :  { %v2133_v32 = vpop.eup %2132  ;;  %v896_v61 = vmul.f32 %v887_v60, %v887_v60  ;;  %v865_v57 = vand.u32 2147483648, %v2646_v46  ;;  %v897_v36 = vmul.f32 %v888_v56, %v888_v56  ;;  %vm2703_vm12 = vcmp.eq.f32.partialorder %v848_v50, 8.507059e+37  ;;  %vm827_vm1 = vmand %vm2680_vm9, %vm2693_vm10 }
  0xa8   :  { %v2135_v10 = vpop.eup %2134  ;;  %v840_v21 = vmul.f32 %v2133_v32, %v837_v43  ;;  %vm845_vm7 = vweird.f32 %v2133_v32  ;;  %v893_v58 = vmul.f32 %v891_v55, %v887_v60  ;;  %v894_v62 = vmul.f32 %v892_v59, %v888_v56  ;;  %vm828_vm5 = vmand %vm2687_vm8, %vm2699_vm11 }
  0xa9   :  { %v855_v40 = vmul.f32 %v2135_v10, %v2646_v46  ;;  %v902_v20 = vmul.f32 %v889_v19, %v889_v19  ;;  %v898_v6 = vadd.f32 %v897_v36, %v896_v61  ;;  %v899_v8 = vmul.f32 %v891_v55, %v889_v19  ;;  %vm2709_vm13 = vmor %vm844_vm2, %vm845_vm7 }
  0xaa   :  { %v841_v4 = vsub.f32 1.0, %v840_v21  ;;  %v900_v11 = vmul.f32 %v892_v59, %v890_v63  ;;  %vm860_vm4 = vweird.f32 %v2135_v10  ;;  %v895_v1 = vadd.f32 %v894_v62, %v893_v58 }
  0xab   :  { %v856_v51 = vsub.f32 1.0, %v855_v40  ;;  %v903_v13 = vmul.f32 %v890_v63, %v890_v63  ;;  %v905_v18 = vmul.f32 -1e-06, %v898_v6  ;;  %v907_v34 = vmul.f32 1.000001, %v898_v6  ;;  %vm2715_vm14 = vmor %vm859_vm6, %vm860_vm4 }
  0xac   :  { %v842_v15 = vmul.f32 %v2133_v32, %v841_v4  ;;  %v851_v54 = vor.u32 1.1754944e-38, %v850_v52  ;;  %v901_v35 = vadd.f32 %v900_v11, %v899_v8  ;;  %v866_v29 = vor.u32 1.1754944e-38, %v865_v57 }
  0xad   :  { %v857_v27 = vmul.f32 %v2135_v10, %v856_v51  ;;  %v904_v37 = vadd.f32 %v903_v13, %v902_v20  ;;  %vm906_vm15 = vcmp.gt.f32.partialorder %v895_v1, %v905_v18  ;;  %vm908_vm0 = vcmp.lt.f32.partialorder %v895_v1, %v907_v34 }
  0xae   :  { %v843_v2 = vadd.f32 %v2133_v32, %v842_v15  ;;  %vm864_vm2 = vcmp.eq.f32.partialorder %v863_v28, 8.507059e+37  ;;  %vm2725_vm3 = vmand %vm906_vm15, %vm908_vm0  ;;  %v2212_v30 = vmov 0.0   ;;  %vm1011_vm15 = vcmp.gt.s32.totalorder %v2389_v17, 0 }
  0xaf   :  { %v858_v43 = vadd.f32 %v2135_v10, %v857_v27  ;;  %v910_v49 = vmul.f32 -1e-06, %v904_v37  ;;  %v912_v50 = vmul.f32 1.000001, %v904_v37  ;;  %v2744_v60 = vsel %vm827_vm1, 1.0, %v2212_v30 }
  0xb0   :  { %v847_v52 = vsel %vm2709_vm13, %v2133_v32, %v843_v2  ;;  %v2755_v32 = vsel %vm828_vm5, 1.0, %v2212_v30  ;;  %vm995_vm13 = vcmp.gt.f32.partialorder %v2744_v60, 0.5  ;;  %vm1036_vm1 = vcmp.gt.s32.totalorder %v2389_v17, 1 }
  0xb1   :  { %v852_v26 = vsel %vm2703_vm12, %v851_v54, %v847_v52  ;;  %v862_v25 = vsel %vm2715_vm14, %v2135_v10, %v858_v43  ;;  %vm911_vm6 = vcmp.gt.f32.partialorder %v901_v35, %v910_v49  ;;  %vm913_vm7 = vcmp.lt.f32.partialorder %v901_v35, %v912_v50 }
  0xb2   :  { %v853_v31 = vmul.f32 %v852_v26, %v2636_v41  ;;  %v867_v53 = vsel %vm864_vm2, %v866_v29, %v862_v25  ;;  %vm914_vm4 = vmand %vm911_vm6, %vm913_vm7  ;;  %vm996_vm14 = vcmp.gt.f32.partialorder %v2755_v32, 0.5 }
  0xb3   :  { %v868_v28 = vmul.f32 %v867_v53, %v2638_v7  ;;  %vm915_vm8 = vmand %vm2725_vm3, %vm914_vm4 }
  0xb4   :  { %v869_v56 = vmul.f32 %v853_v31, %v2611_v39  ;;  %v875_v41 = vmul.f32 %v853_v31, %v2621_v44  ;;  %v2752_v19 = vsel %vm915_vm8, 1.0, %v2212_v30 }
  0xb5   :  { %v870_v63 = vmul.f32 %v868_v28, %v2614_v23  ;;  %v876_v55 = vmul.f32 %v868_v28, %v2624_v38  ;;  %v924_v61 = vadd.f32 %v2752_v19, %v2744_v60  ;;  %v2767_v10 = vmul.f32 %v2752_v19, %v2438_v16 }
  0xb6   :  { %v871_v59 = vadd.f32 %v869_v56, %v2477_v45  ;;  %v877_v7 = vadd.f32 %v875_v41, %v2497_v9  ;;  %v2773_v45 = vmul.f32 %v2752_v19, %v2440_v24  ;;  %vm994_vm10 = vcmp.gt.f32.partialorder %v2752_v19, 0.5 }
  0xb7   :  { %v872_v39 = vadd.f32 %v870_v63, %v2480_v33  ;;  %v878_v44 = vadd.f32 %v876_v55, %v2500_v48  ;;  %v925_v9 = vadd.f32 %v2755_v32, %v924_v61 }
  0xb8   :  { %v873_v21 = vmul.f32 %v2744_v60, %v871_v59  ;;  %v879_v23 = vmul.f32 %v2744_v60, %v877_v7 }
  0xb9   :  { %v874_v38 = vmul.f32 %v2755_v32, %v872_v39  ;;  %v880_v33 = vmul.f32 %v2755_v32, %v878_v44  ;;  %v926_v36 = vrot.slane %v925_v9, 4 }
  0xba   :  { %v2779_v48 = vmul.f32 %v2744_v60, %v873_v21  ;;  %v2782_v57 = vmul.f32 %v2744_v60, %v879_v23  ;;  %v2814_v60 = vadd.s32 16, %v2389_v17 }
  0xbb   :  { %v2785_v42 = vmul.f32 %v2755_v32, %v874_v38  ;;  %v2788_v40 = vmul.f32 %v2755_v32, %v880_v33  ;;  %v927_v58 = vadd.f32 %v926_v36, %v925_v9 }
  0xbc   :  { %v934_v62 = vadd.f32 %v2779_v48, %v2767_v10  ;;  %v943_v20 = vadd.f32 %v2782_v57, %v2773_v45 }
  0xbd   :  { %v928_v3 = vrot.slane %v927_v58, 2 }
  0xbe   :  { %v935_v4 = vadd.f32 %v934_v62, %v2785_v42  ;;  %v944_v6 = vadd.f32 %v943_v20, %v2788_v40 }
  0xbf   :  { %v929_v8 = vadd.f32 %v928_v3, %v927_v58 }
  0xc0   :  { %v936_v11 = vrot.slane %v935_v4, 4  ;;  %v945_v12 = vrot.slane %v944_v6, 4 }
  0xc1   :  { %v930_v51 = vrot.slane %v929_v8, 1 }
  0xc2   :  { %v937_v1 = vadd.f32 %v936_v11, %v935_v4  ;;  %v946_v13 = vadd.f32 %v945_v12, %v944_v6 }
  0xc3   :  { %v2796_v14 = vadd.f32 %v930_v51, %v929_v8 }
  0xc4   :  { %v938_v15 = vrot.slane %v937_v1, 2  ;;  %v947_v5 = vrot.slane %v946_v13, 2 }
  0xc5   :  { %v932_v18 = vmax.f32 %v2796_v14, 1.0 }
  0xc6   :  { %v939_v34 = vadd.f32 %v938_v15, %v937_v1  ;;  %v948_v22 = vadd.f32 %v947_v5, %v946_v13 }
  0xc7   :  { %2136 = vrcp.f32 %v932_v18 }
  0xc8   :  { %v940_v54 = vrot.slane %v939_v34, 1  ;;  %v949_v27 = vrot.slane %v948_v22, 1 }
  0xca   :  { %v941_v35 = vadd.f32 %v940_v54, %v939_v34  ;;  %v950_v37 = vadd.f32 %v949_v27, %v948_v22 }
  0xcd   :  { %v2137_v2 = vpop.eup %2136 }
  0xce   :  { %v942_v47 = vmul.f32 %v2137_v2, %v941_v35  ;;  %v951_v29 = vmul.f32 %v2137_v2, %v950_v37 }
  0xd0   :  { %v952_v43 = vsub.f32 %v2438_v16, %v942_v47  ;;  %v953_v49 = vsub.f32 %v873_v21, %v942_v47  ;;  %v954_v50 = vsub.f32 %v874_v38, %v942_v47  ;;  %v955_v52 = vsub.f32 %v2440_v24, %v951_v29 }
  0xd1   :  { %v956_v46 = vsub.f32 %v879_v23, %v951_v29  ;;  %v957_v26 = vsub.f32 %v880_v33, %v951_v29 }
  0xd2   :  { %v958_v25 = vmul.f32 %v952_v43, %v952_v43  ;;  %v959_v31 = vmul.f32 %v953_v49, %v953_v49  ;;  %v960_v53 = vmul.f32 %v954_v50, %v954_v50  ;;  %v961_v28 = vmul.f32 %v955_v52, %v955_v52 }
  0xd3   :  { %v962_v56 = vmul.f32 %v956_v46, %v956_v46  ;;  %v963_v41 = vmul.f32 %v957_v26, %v957_v26  ;;  %v973_v44 = vand.u32 2147483647, %v952_v43  ;;  %v974_v21 = vand.u32 2147483647, %v953_v49 }
  0xd4   :  { %v964_v63 = vadd.f32 %v961_v28, %v958_v25  ;;  %v975_v9 = vand.u32 2147483647, %v954_v50  ;;  %vm982_vm9 = vcmp.ge.f32.partialorder %v955_v52, 0.0  ;;  %vm983_vm11 = vcmp.ge.f32.partialorder %v956_v46, 0.0 }
  0xd5   :  { %v965_v55 = vadd.f32 %v962_v56, %v959_v31  ;;  %v966_v59 = vadd.f32 %v963_v41, %v960_v53  ;;  %v976_v23 = vmul.f32 %v973_v44, %v952_v43  ;;  %v977_v38 = vmul.f32 %v974_v21, %v953_v49 }
  0xd6   :  { %v967_v7 = vadd.f32 1e-08, %v964_v63  ;;  %v978_v33 = vmul.f32 %v975_v9, %v954_v50  ;;  %vm984_vm12 = vcmp.ge.f32.partialorder %v957_v26, 0.0 }
  0xd7   :  { %v968_v61 = vadd.f32 1e-08, %v965_v55  ;;  %v969_v39 = vadd.f32 1e-08, %v966_v59 }
  0xd8   :  { %2138 = vrcp.f32 %v967_v7 }
  0xd9   :  { %2140 = vrcp.f32 %v968_v61 }
  0xda   :  { %2142 = vrcp.f32 %v969_v39 }
  0xde   :  { %v2139_v36 = vpop.eup %2138 }
  0xdf   :  { %v2141_v58 = vpop.eup %2140  ;;  %v979_v62 = vmul.f32 %v2139_v36, %v976_v23 }
  0xe0   :  { %v2143_v20 = vpop.eup %2142  ;;  %v980_v3 = vmul.f32 %v2141_v58, %v977_v38 }
  0xe1   :  { %v981_v4 = vmul.f32 %v2143_v20, %v978_v33  ;;  %v985_v6 = vsub.f32 0.0, %v979_v62  ;;  %v988_v8 = vadd.f32 2.0, %v979_v62 }
  0xe2   :  { %v986_v11 = vsub.f32 0.0, %v980_v3  ;;  %v989_v12 = vadd.f32 2.0, %v980_v3 }
  0xe3   :  { %v987_v51 = vsub.f32 0.0, %v981_v4  ;;  %v990_v1 = vadd.f32 2.0, %v981_v4  ;;  %v991_v13 = vsel %vm982_vm9, %v985_v6, %v988_v8 }
  0xe4   :  { %v992_v15 = vsel %vm983_vm11, %v986_v11, %v989_v12  ;;  %v2804_v5 = vsel %vm994_vm10, %v991_v13, 1e+09 }
  0xe5   :  { %v993_v18 = vsel %vm984_vm12, %v987_v51, %v990_v1  ;;  %v2806_v34 = vsel %vm995_vm13, %v992_v15, 1e+09  ;;  %v1004_v19 = vperm.slane %v2804_v5, 0  ;;  %v1029_v54 = vperm.slane %v2804_v5, 1 }
  0xe6   :  { %v2809_v22 = vsel %vm996_vm14, %v993_v18, 1e+09  ;;  %v1001_v32 = vmul.f32 0.0, %v2804_v5  ;;  %v1002_v27 = vmul.f32 0.0, %v2806_v34  ;;  %v1054_v35 = vperm.slane %v2804_v5, 2 }
  0xe7   :  { %vm1005_vm0 = vcmp.lt.f32.partialorder %v1004_v19, %v2804_v5  ;;  %vm1006_vm3 = vcmp.lt.f32.partialorder %v1004_v19, %v2806_v34  ;;  %vm1008_vm5 = vcmp.eq.f32.partialorder %v1004_v19, %v2804_v5  ;;  %vm1009_vm6 = vcmp.eq.f32.partialorder %v1004_v19, %v2806_v34 }
  0xe8   :  { %vm1007_vm7 = vcmp.lt.f32.partialorder %v1004_v19, %v2809_v22  ;;  %vm1010_vm4 = vcmp.eq.f32.partialorder %v1004_v19, %v2809_v22  ;;  %vm1014_vm8 = vmand %vm1008_vm5, %vm1011_vm15  ;;  %v1003_v37 = vmul.f32 0.0, %v2809_v22  ;;  %vm1030_vm10 = vcmp.lt.f32.partialorder %v1029_v54, %v2804_v5 }
  0xe9   :  { %vm1017_vm9 = vmor %vm1005_vm0, %vm1014_vm8  ;;  %vm1033_vm11 = vcmp.eq.f32.partialorder %v1029_v54, %v2804_v5  ;;  %vm1086_vm12 = vcmp.gt.s32.totalorder %v2389_v17, 3  ;;  %vm1031_vm14 = vcmp.lt.f32.partialorder %v1029_v54, %v2806_v34  ;;  %vm1032_vm2 = vcmp.lt.f32.partialorder %v1029_v54, %v2809_v22 }
  0xea   :  { %vm1018_vm13 = vmor %vm1006_vm3, %vm1009_vm6  ;;  %v2038_v2 = vsel %vm1017_vm9, 1.0, %v2212_v30  ;;  %vm1034_vm15 = vcmp.eq.f32.partialorder %v1029_v54, %v2806_v34  ;;  %vm1035_vm0 = vcmp.eq.f32.partialorder %v1029_v54, %v2809_v22  ;;  %v1079_v43 = vperm.slane %v2804_v5, 3 }
  0xeb   :  { %vm1019_vm5 = vmor %vm1007_vm7, %vm1010_vm4  ;;  %v2039_v47 = vsel %vm1018_vm13, 1.0, %v2212_v30  ;;  %v1026_v29 = vadd.f32 %v2038_v2, %v1001_v32  ;;  %vm1055_vm6 = vcmp.lt.f32.partialorder %v1054_v35, %v2804_v5  ;;  %vm1056_vm8 = vcmp.lt.f32.partialorder %v1054_v35, %v2806_v34 }
  0xec   :  { %v2040_v49 = vsel %vm1019_vm5, 1.0, %v2212_v30  ;;  %v1027_v50 = vadd.f32 %v2039_v47, %v1002_v27  ;;  %vm1039_vm3 = vmand %vm1033_vm11, %vm1036_vm1  ;;  %vm1057_vm4 = vcmp.lt.f32.partialorder %v1054_v35, %v2809_v22  ;;  %vm1058_vm9 = vcmp.eq.f32.partialorder %v1054_v35, %v2804_v5 }
  0xed   :  { %v1028_v52 = vadd.f32 %v2040_v49, %v1003_v37  ;;  %vm1042_vm7 = vmor %vm1030_vm10, %vm1039_vm3  ;;  %vm1059_vm13 = vcmp.eq.f32.partialorder %v1054_v35, %v2806_v34  ;;  %vm1060_vm11 = vcmp.eq.f32.partialorder %v1054_v35, %v2809_v22  ;;  %v2856_v26 = vperm.slane %v2804_v5, 4 }
  0xee   :  { %vm1043_vm1 = vmor %vm1031_vm14, %vm1034_vm15  ;;  %v2041_v46 = vsel %vm1042_vm7, 1.0, %v2212_v30  ;;  %v2859_v25 = vperm.slane %v2804_v5, 5  ;;  %v2868_v28 = vperm.slane %v2804_v5, 6  ;;  %vm3623_vm15 = vcmp.gt.s32.totalorder %v2389_v17, 2 }
  0xef   :  { %vm1044_vm10 = vmor %vm1032_vm2, %vm1035_vm0  ;;  %v2042_v31 = vsel %vm1043_vm1, 1.0, %v2212_v30  ;;  %v1051_v53 = vadd.f32 %v2041_v46, %v1026_v29  ;;  %vm1081_vm7 = vcmp.lt.f32.partialorder %v1079_v43, %v2806_v34  ;;  %vm1082_vm2 = vcmp.lt.f32.partialorder %v1079_v43, %v2809_v22 }
  0xf0   :  { %v2043_v56 = vsel %vm1044_vm10, 1.0, %v2212_v30  ;;  %v1052_v41 = vadd.f32 %v2042_v31, %v1027_v50  ;;  %vm1064_vm3 = vmand %vm1058_vm9, %vm3623_vm15  ;;  %vm1083_vm1 = vcmp.eq.f32.partialorder %v1079_v43, %v2804_v5  ;;  %vm1084_vm5 = vcmp.eq.f32.partialorder %v1079_v43, %v2806_v34 }
  0xf1   :  { %v1053_v63 = vadd.f32 %v2043_v56, %v1028_v52  ;;  %vm1067_vm0 = vmor %vm1055_vm6, %vm1064_vm3  ;;  %vm1085_vm10 = vcmp.eq.f32.partialorder %v1079_v43, %v2809_v22  ;;  %vm1105_vm15 = vcmp.lt.f32.partialorder %v2856_v26, %v2804_v5  ;;  %vm1131_vm6 = vcmp.lt.f32.partialorder %v2859_v25, %v2806_v34 }
  0xf2   :  { %vm1068_vm9 = vmor %vm1056_vm8, %vm1059_vm13  ;;  %v2044_v55 = vsel %vm1067_vm0, 1.0, %v2212_v30  ;;  %vm1108_vm8 = vcmp.eq.f32.partialorder %v2856_v26, %v2804_v5  ;;  %vm1133_vm13 = vcmp.eq.f32.partialorder %v2859_v25, %v2804_v5  ;;  %v2931_v9 = vperm.slane %v2804_v5, 7 }
  0xf3   :  { %vm1069_vm14 = vmor %vm1057_vm4, %vm1060_vm11  ;;  %v2045_v59 = vsel %vm1068_vm9, 1.0, %v2212_v30  ;;  %v1076_v7 = vadd.f32 %v2044_v55, %v1051_v53  ;;  %vm1110_vm4 = vcmp.eq.f32.partialorder %v2856_v26, %v2809_v22  ;;  %vm1130_vm11 = vcmp.lt.f32.partialorder %v2859_v25, %v2804_v5 }
  0xf4   :  { %v2046_v61 = vsel %vm1069_vm14, 1.0, %v2212_v30  ;;  %v1077_v39 = vadd.f32 %v2045_v59, %v1052_v41  ;;  %vm1089_vm0 = vmand %vm1083_vm1, %vm1086_vm12  ;;  %vm3624_vm9 = vcmp.lt.f32.partialorder %v1079_v43, %v2804_v5  ;;  %v2962_v62 = vperm.slane %v2806_v34, 0 }
  0xf5   :  { %v1078_v44 = vadd.f32 %v2046_v61, %v1053_v63  ;;  %vm1092_vm3 = vmor %vm3624_vm9, %vm1089_vm0  ;;  %vm1134_vm0 = vcmp.eq.f32.partialorder %v2859_v25, %v2806_v34  ;;  %vm1135_vm9 = vcmp.eq.f32.partialorder %v2859_v25, %v2809_v22  ;;  %v2976_v3 = vperm.slane %v2806_v34, 1 }
  0xf6   :  { %vm1093_vm1 = vmor %vm1081_vm7, %vm1084_vm5  ;;  %v2047_v21 = vsel %vm1092_vm3, 1.0, %v2212_v30  ;;  %vm3625_vm3 = vcmp.gt.s32.totalorder %v2389_v17, 4  ;;  %vm3628_vm7 = vcmp.lt.f32.partialorder %v2856_v26, %v2809_v22  ;;  %v3033_v19 = vperm.slane %v2806_v34, 2 }
  0xf7   :  { %vm1094_vm12 = vmor %vm1082_vm2, %vm1085_vm10  ;;  %v2048_v23 = vsel %vm1093_vm1, 1.0, %v2212_v30  ;;  %v1101_v38 = vadd.f32 %v2047_v21, %v1076_v7  ;;  %vm1158_vm10 = vcmp.eq.f32.partialorder %v2868_v28, %v2804_v5  ;;  %vm3627_vm2 = vcmp.lt.f32.partialorder %v2856_v26, %v2806_v34 }
  0xf8   :  { %v2049_v33 = vsel %vm1094_vm12, 1.0, %v2212_v30  ;;  %v1102_v36 = vadd.f32 %v2048_v23, %v1077_v39  ;;  %vm1114_vm14 = vmand %vm1108_vm8, %vm3625_vm3  ;;  %vm1180_vm8 = vcmp.lt.f32.partialorder %v2931_v9, %v2804_v5  ;;  %vm3626_vm3 = vcmp.eq.f32.partialorder %v2856_v26, %v2806_v34 }
  0xf9   :  { %v1103_v58 = vadd.f32 %v2049_v33, %v1078_v44  ;;  %vm1117_vm12 = vmor %vm1105_vm15, %vm1114_vm14  ;;  %vm1181_vm15 = vcmp.lt.f32.partialorder %v2931_v9, %v2806_v34  ;;  %vm3629_vm14 = vcmp.gt.s32.totalorder %v2389_v17, 5  ;;  %v2059_v12 = vsel %vm1180_vm8, 1.0, %v2212_v30 }
  0xfa   :  { %vm1118_vm1 = vmor %vm3627_vm2, %vm3626_vm3  ;;  %v2050_v20 = vsel %vm1117_vm12, 1.0, %v2212_v30  ;;  %vm1184_vm2 = vcmp.eq.f32.partialorder %v2931_v9, %v2806_v34  ;;  %vm1205_vm12 = vcmp.lt.f32.partialorder %v2962_v62, %v2804_v5  ;;  %v1304_v56 = vperm.slane %v2806_v34, 4 }
  0xfb   :  { %vm1119_vm5 = vmor %vm3628_vm7, %vm1110_vm4  ;;  %v2051_v4 = vsel %vm1118_vm1, 1.0, %v2212_v30  ;;  %v1126_v6 = vadd.f32 %v2050_v20, %v1101_v38  ;;  %vm1185_vm7 = vcmp.eq.f32.partialorder %v2931_v9, %v2809_v22  ;;  %vm1206_vm1 = vcmp.lt.f32.partialorder %v2962_v62, %v2806_v34 }
  0xfc   :  { %v2052_v8 = vsel %vm1119_vm5, 1.0, %v2212_v30  ;;  %v1127_v11 = vadd.f32 %v2051_v4, %v1102_v36  ;;  %vm1139_vm4 = vmand %vm1133_vm13, %vm3629_vm14  ;;  %vm1209_vm13 = vcmp.eq.f32.partialorder %v2962_v62, %v2806_v34  ;;  %v2062_v13 = vsel %vm1205_vm12, 1.0, %v2212_v30 }
  0xfd   :  { %v1128_v51 = vadd.f32 %v2052_v8, %v1103_v58  ;;  %vm1142_vm5 = vmor %vm1130_vm11, %vm1139_vm4  ;;  %vm1230_vm14 = vcmp.lt.f32.partialorder %v2976_v3, %v2804_v5  ;;  %vm3630_vm4 = vcmp.lt.f32.partialorder %v2859_v25, %v2809_v22  ;;  %vm1255_vm11 = vcmp.lt.f32.partialorder %v3033_v19, %v2804_v5 }
  0xfe   :  { %vm1143_vm8 = vmor %vm1131_vm6, %vm1134_vm0  ;;  %v2053_v1 = vsel %vm1142_vm5, 1.0, %v2212_v30  ;;  %vm3631_vm0 = vcmp.gt.s32.totalorder %v2389_v17, 6  ;;  %v3054_v17 = vperm.slane %v2806_v34, 3  ;;  %v2065_v37 = vsel %vm1230_vm14, 1.0, %v2212_v30 }
  0xff   :  { %vm1144_vm3 = vmor %vm3630_vm4, %vm1135_vm9  ;;  %v2054_v15 = vsel %vm1143_vm8, 1.0, %v2212_v30  ;;  %v1151_v18 = vadd.f32 %v2053_v1, %v1126_v6  ;;  %vm3635_vm8 = vcmp.eq.f32.partialorder %v2868_v28, %v2809_v22  ;;  %vm3636_vm5 = vcmp.lt.f32.partialorder %v2868_v28, %v2809_v22 }
 0x100   :  { %v2055_v54 = vsel %vm1144_vm3, 1.0, %v2212_v30  ;;  %v1152_v32 = vadd.f32 %v2054_v15, %v1127_v11  ;;  %vm1164_vm12 = vmand %vm1158_vm10, %vm3631_vm0  ;;  %vm3632_vm3 = vcmp.lt.f32.partialorder %v2868_v28, %v2804_v5  ;;  %vm3633_vm10 = vcmp.eq.f32.partialorder %v2868_v28, %v2806_v34 }
 0x101   :  { %v1153_v27 = vadd.f32 %v2055_v54, %v1128_v51  ;;  %vm1167_vm4 = vmor %vm3632_vm3, %vm1164_vm12  ;;  %vm3634_vm0 = vcmp.lt.f32.partialorder %v2868_v28, %v2806_v34  ;;  %vm1256_vm12 = vcmp.lt.f32.partialorder %v3033_v19, %v2806_v34  ;;  %vm1262_vm3 = vcmp.gt.s32.totalorder %v2418_v0, 10 }
 0x102   :  { %vm1168_vm9 = vmor %vm3634_vm0, %vm3633_vm10  ;;  %v2056_v35 = vsel %vm1167_vm4, 1.0, %v2212_v30  ;;  %vm1257_vm4 = vcmp.lt.f32.partialorder %v3033_v19, %v2809_v22  ;;  %vm1259_vm14 = vcmp.eq.f32.partialorder %v3033_v19, %v2806_v34  ;;  %vm1260_vm10 = vcmp.eq.f32.partialorder %v3033_v19, %v2809_v22 }
 0x103   :  { %vm1169_vm6 = vmor %vm3636_vm5, %vm3635_vm8  ;;  %v2057_v2 = vsel %vm1168_vm9, 1.0, %v2212_v30  ;;  %v1176_v47 = vadd.f32 %v2056_v35, %v1151_v18  ;;  %v2068_v49 = vsel %vm1255_vm11, 1.0, %v2212_v30  ;;  %vm1280_vm5 = vcmp.lt.f32.partialorder %v3054_v17, %v2804_v5 }
 0x104   :  { %v2058_v29 = vsel %vm1169_vm6, 1.0, %v2212_v30  ;;  %v1177_v43 = vadd.f32 %v2057_v2, %v1152_v32  ;;  %vm1193_vm9 = vmor %vm1181_vm15, %vm1184_vm2  ;;  %vm3637_vm6 = vcmp.lt.f32.partialorder %v2931_v9, %v2809_v22  ;;  %vm3638_vm11 = vcmp.gt.s32.totalorder %v2418_v0, 8 }
 0x105   :  { %v1178_v50 = vadd.f32 %v2058_v29, %v1153_v27  ;;  %vm1194_vm8 = vmor %vm3637_vm6, %vm1185_vm7  ;;  %v2060_v52 = vsel %vm1193_vm9, 1.0, %v2212_v30  ;;  %v1201_v46 = vadd.f32 %v2059_v12, %v1176_v47  ;;  %v2071_v28 = vsel %vm1280_vm5, 1.0, %v2212_v30 }
 0x106   :  { %v2061_v26 = vsel %vm1194_vm8, 1.0, %v2212_v30  ;;  %v1202_v25 = vadd.f32 %v2060_v52, %v1177_v43  ;;  %vm1215_vm0 = vmand %vm1209_vm13, %vm3638_vm11  ;;  %vm3639_vm13 = vcmp.eq.f32.partialorder %v2962_v62, %v2809_v22  ;;  %vm3640_vm11 = vcmp.lt.f32.partialorder %v2962_v62, %v2809_v22 }
 0x107   :  { %v1203_v31 = vadd.f32 %v2061_v26, %v1178_v50  ;;  %vm1218_vm8 = vmor %vm1206_vm1, %vm1215_vm0  ;;  %v1226_v53 = vadd.f32 %v2062_v13, %v1201_v46  ;;  %v3135_v63 = vperm.slane %v2806_v34, 5  ;;  %v3138_v55 = vperm.slane %v2806_v34, 6 }
 0x108   :  { %vm1219_vm7 = vmor %vm3640_vm11, %vm3639_vm13  ;;  %v2063_v41 = vsel %vm1218_vm8, 1.0, %v2212_v30  ;;  %vm3641_vm1 = vcmp.gt.s32.totalorder %v2418_v0, 9  ;;  %vm3642_vm5 = vcmp.eq.f32.partialorder %v2976_v3, %v2806_v34  ;;  %vm1305_vm8 = vcmp.lt.f32.partialorder %v1304_v56, %v2804_v5 }
 0x109   :  { %v2064_v59 = vsel %vm1219_vm7, 1.0, %v2212_v30  ;;  %v1227_v7 = vadd.f32 %v2063_v41, %v1202_v25  ;;  %vm1240_vm0 = vmand %vm3642_vm5, %vm3641_vm1  ;;  %v1251_v61 = vadd.f32 %v2065_v37, %v1226_v53  ;;  %vm3643_vm13 = vcmp.lt.f32.partialorder %v2976_v3, %v2806_v34 }
 0x10a   :  { %v1228_v39 = vadd.f32 %v2064_v59, %v1203_v31  ;;  %vm1243_vm11 = vmor %vm3643_vm13, %vm1240_vm0  ;;  %vm1306_vm9 = vcmp.lt.f32.partialorder %v1304_v56, %v2806_v34  ;;  %vm1307_vm15 = vcmp.lt.f32.partialorder %v1304_v56, %v2809_v22  ;;  %vm1309_vm7 = vcmp.eq.f32.partialorder %v1304_v56, %v2806_v34 }
 0x10b   :  { %vm3644_vm6 = vcmp.eq.f32.partialorder %v2976_v3, %v2809_v22  ;;  %vm3645_vm1 = vcmp.lt.f32.partialorder %v2976_v3, %v2809_v22  ;;  %v2066_v44 = vsel %vm1243_vm11, 1.0, %v2212_v30  ;;  %v1276_v21 = vadd.f32 %v2068_v49, %v1251_v61  ;;  %vm1265_vm13 = vmand %vm1259_vm14, %vm1262_vm3 }
 0x10c   :  { %vm1244_vm5 = vmor %vm3645_vm1, %vm3644_vm6  ;;  %vm1310_vm0 = vcmp.eq.f32.partialorder %v1304_v56, %v2809_v22  ;;  %v2074_v9 = vsel %vm1305_vm8, 1.0, %v2212_v30  ;;  %v1252_v38 = vadd.f32 %v2066_v44, %v1227_v7  ;;  %vm1330_vm2 = vcmp.lt.f32.partialorder %v3135_v63, %v2804_v5 }
 0x10d   :  { %v2067_v23 = vsel %vm1244_vm5, 1.0, %v2212_v30  ;;  %vm1331_vm6 = vcmp.lt.f32.partialorder %v3135_v63, %v2806_v34  ;;  %vm1268_vm8 = vmor %vm1256_vm12, %vm1265_vm13  ;;  %v1301_v36 = vadd.f32 %v2071_v28, %v1276_v21  ;;  %vm1334_vm1 = vcmp.eq.f32.partialorder %v3135_v63, %v2806_v34 }
 0x10e   :  { %v1253_v33 = vadd.f32 %v2067_v23, %v1228_v39  ;;  %vm1269_vm3 = vmor %vm1257_vm4, %vm1260_vm10  ;;  %v2069_v58 = vsel %vm1268_vm8, 1.0, %v2212_v30  ;;  %v2077_v62 = vsel %vm1330_vm2, 1.0, %v2212_v30  ;;  %vm1355_vm12 = vcmp.lt.f32.partialorder %v3138_v55, %v2804_v5 }
 0x10f   :  { %v2070_v20 = vsel %vm1269_vm3, 1.0, %v2212_v30  ;;  %v1277_v3 = vadd.f32 %v2069_v58, %v1252_v38  ;;  %vm3646_vm5 = vcmp.gt.s32.totalorder %v2418_v0, 11  ;;  %vm3647_vm13 = vcmp.eq.f32.partialorder %v3054_v17, %v2806_v34 }
 0x110   :  { %vm1290_vm11 = vmand %vm3647_vm13, %vm3646_vm5  ;;  %v1326_v4 = vadd.f32 %v2074_v9, %v1301_v36  ;;  %v1278_v6 = vadd.f32 %v2070_v20, %v1253_v33  ;;  %vm3648_vm10 = vcmp.lt.f32.partialorder %v3054_v17, %v2806_v34  ;;  %vm1359_vm3 = vcmp.eq.f32.partialorder %v3138_v55, %v2806_v34 }
 0x111   :  { %vm1293_vm2 = vmor %vm3648_vm10, %vm1290_vm11  ;;  %vm1360_vm14 = vcmp.eq.f32.partialorder %v3138_v55, %v2809_v22  ;;  %vm3649_vm5 = vcmp.eq.f32.partialorder %v3054_v17, %v2809_v22  ;;  %vm3650_vm13 = vcmp.lt.f32.partialorder %v3054_v17, %v2809_v22  ;;  %vm1362_vm11 = vcmp.gt.s32.totalorder %v2418_v0, 14 }
 0x112   :  { %vm1294_vm4 = vmor %vm3650_vm13, %vm3649_vm5  ;;  %v2072_v8 = vsel %vm1293_vm2, 1.0, %v2212_v30  ;;  %v1351_v11 = vadd.f32 %v2077_v62, %v1326_v4  ;;  %v2080_v12 = vsel %vm1355_vm12, 1.0, %v2212_v30  ;;  %vm3651_vm10 = vcmp.gt.s32.totalorder %v2418_v0, 12 }
 0x113   :  { %v2073_v51 = vsel %vm1294_vm4, 1.0, %v2212_v30  ;;  %v1302_v1 = vadd.f32 %v2072_v8, %v1277_v3  ;;  %vm1315_vm8 = vmand %vm1309_vm7, %vm3651_vm10  ;;  %v1379_v13 = vperm.slane %v2806_v34, 7  ;;  %v1404_v15 = vperm.slane %v2809_v22, 0 }
 0x114   :  { %v1303_v18 = vadd.f32 %v2073_v51, %v1278_v6  ;;  %vm1318_vm2 = vmor %vm1306_vm9, %vm1315_vm8  ;;  %v1376_v19 = vadd.f32 %v2080_v12, %v1351_v11  ;;  %vm1413_vm5 = vcmp.gt.s32.totalorder %v2814_v60, 16  ;;  %v1429_v54 = vperm.slane %v2809_v22, 1 }
 0x115   :  { %vm1319_vm12 = vmor %vm1307_vm15, %vm1310_vm0  ;;  %v2075_v32 = vsel %vm1318_vm2, 1.0, %v2212_v30  ;;  %vm1380_vm7 = vcmp.lt.f32.partialorder %v1379_v13, %v2804_v5  ;;  %vm1381_vm4 = vcmp.lt.f32.partialorder %v1379_v13, %v2806_v34  ;;  %vm1382_vm13 = vcmp.lt.f32.partialorder %v1379_v13, %v2809_v22 }
 0x116   :  { %v2076_v27 = vsel %vm1319_vm12, 1.0, %v2212_v30  ;;  %v1327_v17 = vadd.f32 %v2075_v32, %v1302_v1  ;;  %vm3652_vm9 = vcmp.gt.s32.totalorder %v2418_v0, 13  ;;  %vm1385_vm10 = vcmp.eq.f32.partialorder %v1379_v13, %v2809_v22 }
 0x117   :  { %vm1340_vm8 = vmand %vm1334_vm1, %vm3652_vm9  ;;  %v2083_v35 = vsel %vm1380_vm7, 1.0, %v2212_v30  ;;  %v1328_v37 = vadd.f32 %v2076_v27, %v1303_v18  ;;  %v2084_v2 = vsel %vm1381_vm4, 1.0, %v2212_v30  ;;  %vm1405_vm0 = vcmp.lt.f32.partialorder %v1404_v15, %v2804_v5 }
 0x118   :  { %vm1343_vm15 = vmor %vm1331_vm6, %vm1340_vm8  ;;  %v1401_v47 = vadd.f32 %v2083_v35, %v1376_v19  ;;  %vm3653_vm2 = vcmp.eq.f32.partialorder %v3135_v63, %v2809_v22  ;;  %vm3654_vm1 = vcmp.lt.f32.partialorder %v3135_v63, %v2809_v22  ;;  %vm1406_vm7 = vcmp.lt.f32.partialorder %v1404_v15, %v2806_v34 }
 0x119   :  { %vm1344_vm12 = vmor %vm3654_vm1, %vm3653_vm2  ;;  %v2078_v29 = vsel %vm1343_vm15, 1.0, %v2212_v30  ;;  %vm1407_vm9 = vcmp.lt.f32.partialorder %v1404_v15, %v2809_v22  ;;  %vm1410_vm6 = vcmp.eq.f32.partialorder %v1404_v15, %v2809_v22  ;;  %v2086_v50 = vsel %vm1405_vm0, 1.0, %v2212_v30 }
 0x11a   :  { %v2079_v43 = vsel %vm1344_vm12, 1.0, %v2212_v30  ;;  %v1352_v49 = vadd.f32 %v2078_v29, %v1327_v17  ;;  %vm1365_vm4 = vmand %vm1359_vm3, %vm1362_vm11  ;;  %v2087_v52 = vsel %vm1406_vm7, 1.0, %v2212_v30  ;;  %vm3655_vm8 = vcmp.lt.f32.partialorder %v3138_v55, %v2806_v34 }
 0x11b   :  { %v1353_v46 = vadd.f32 %v2079_v43, %v1328_v37  ;;  %vm1368_vm15 = vmor %vm3655_vm8, %vm1365_vm4  ;;  %v1426_v26 = vadd.f32 %v2086_v50, %v1401_v47  ;;  %vm1430_vm2 = vcmp.lt.f32.partialorder %v1429_v54, %v2804_v5  ;;  %vm1431_vm1 = vcmp.lt.f32.partialorder %v1429_v54, %v2806_v34 }
 0x11c   :  { %vm3656_vm3 = vcmp.lt.f32.partialorder %v3138_v55, %v2809_v22  ;;  %v2081_v0 = vsel %vm1368_vm15, 1.0, %v2212_v30  ;;  %vm1432_vm0 = vcmp.lt.f32.partialorder %v1429_v54, %v2809_v22  ;;  %vm1435_vm12 = vcmp.eq.f32.partialorder %v1429_v54, %v2809_v22  ;;  %vm1394_vm4 = vmor %vm1382_vm13, %vm1385_vm10 }
 0x11d   :  { %vm1369_vm11 = vmor %vm3656_vm3, %vm1360_vm14  ;;  %vm1438_vm7 = vcmp.gt.s32.totalorder %v2814_v60, 17  ;;  %v1377_v31 = vadd.f32 %v2081_v0, %v1352_v49  ;;  %v2089_v53 = vsel %vm1430_vm2, 1.0, %v2212_v30  ;;  %v2090_v28 = vsel %vm1431_vm1, 1.0, %v2212_v30 }
 0x11e   :  { %v2082_v25 = vsel %vm1369_vm11, 1.0, %v2212_v30  ;;  %v2085_v41 = vsel %vm1394_vm4, 1.0, %v2212_v30  ;;  %vm1416_vm14 = vmand %vm1410_vm6, %vm1413_vm5  ;;  %v1451_v63 = vadd.f32 %v2089_v53, %v1426_v26  ;;  %v1454_v55 = vperm.slane %v2809_v22, 2 }
 0x11f   :  { %v1378_v56 = vadd.f32 %v2082_v25, %v1353_v46  ;;  %v1402_v59 = vadd.f32 %v2084_v2, %v1377_v31  ;;  %vm1419_vm8 = vmor %vm1407_vm9, %vm1416_vm14  ;;  %vm1463_vm13 = vcmp.gt.s32.totalorder %v2814_v60, 18  ;;  %v1479_v7 = vperm.slane %v2809_v22, 3 }
 0x120   :  { %vm1488_vm10 = vcmp.gt.s32.totalorder %v2814_v60, 19  ;;  %v2088_v39 = vsel %vm1419_vm8, 1.0, %v2212_v30  ;;  %vm1441_vm5 = vmand %vm1435_vm12, %vm1438_vm7  ;;  %vm1455_vm6 = vcmp.lt.f32.partialorder %v1454_v55, %v2804_v5  ;;  %vm1456_vm15 = vcmp.lt.f32.partialorder %v1454_v55, %v2806_v34 }
 0x121   :  { %v1403_v61 = vadd.f32 %v2085_v41, %v1378_v56  ;;  %v1427_v44 = vadd.f32 %v2087_v52, %v1402_v59  ;;  %vm1444_vm9 = vmor %vm1432_vm0, %vm1441_vm5  ;;  %vm1457_vm2 = vcmp.lt.f32.partialorder %v1454_v55, %v2809_v22  ;;  %vm1460_vm1 = vcmp.eq.f32.partialorder %v1454_v55, %v2809_v22 }
 0x122   :  { %v2092_v21 = vsel %vm1455_vm6, 1.0, %v2212_v30  ;;  %v2091_v23 = vsel %vm1444_vm9, 1.0, %v2212_v30  ;;  %vm1466_vm3 = vmand %vm1460_vm1, %vm1463_vm13  ;;  %v2093_v38 = vsel %vm1456_vm15, 1.0, %v2212_v30  ;;  %vm1480_vm12 = vcmp.lt.f32.partialorder %v1479_v7, %v2804_v5 }
 0x123   :  { %v1428_v9 = vadd.f32 %v2088_v39, %v1403_v61  ;;  %v1476_v33 = vadd.f32 %v2092_v21, %v1451_v63  ;;  %v1452_v36 = vadd.f32 %v2090_v28, %v1427_v44  ;;  %vm1469_vm11 = vmor %vm1457_vm2, %vm1466_vm3  ;;  %vm1481_vm0 = vcmp.lt.f32.partialorder %v1479_v7, %v2806_v34 }
 0x124   :  { %vm1482_vm7 = vcmp.lt.f32.partialorder %v1479_v7, %v2809_v22  ;;  %v2094_v62 = vsel %vm1469_vm11, 1.0, %v2212_v30  ;;  %vm1485_vm4 = vcmp.eq.f32.partialorder %v1479_v7, %v2809_v22  ;;  %v2095_v20 = vsel %vm1480_vm12, 1.0, %v2212_v30 }
 0x125   :  { %v1453_v58 = vadd.f32 %v2091_v23, %v1428_v9  ;;  %v1477_v3 = vadd.f32 %v2093_v38, %v1452_v36  ;;  %vm1491_vm14 = vmand %vm1485_vm4, %vm1488_vm10  ;;  %v2096_v4 = vsel %vm1481_vm0, 1.0, %v2212_v30  ;;  %v1501_v6 = vadd.f32 %v2095_v20, %v1476_v33 }
 0x126   :  { %v1504_v8 = vperm.slane %v2809_v22, 4  ;;  %vm1494_vm8 = vmor %vm1482_vm7, %vm1491_vm14  ;;  %vm1513_vm13 = vcmp.gt.s32.totalorder %v2814_v60, 20  ;;  %v1529_v12 = vperm.slane %v2809_v22, 5  ;;  %vm1538_vm5 = vcmp.gt.s32.totalorder %v2814_v60, 21 }
 0x127   :  { %v1478_v11 = vadd.f32 %v2094_v62, %v1453_v58  ;;  %v2097_v51 = vsel %vm1494_vm8, 1.0, %v2212_v30  ;;  %v1502_v1 = vadd.f32 %v2096_v4, %v1477_v3  ;;  %v1554_v37 = vperm.slane %v2809_v22, 6 }
 0x128   :  { %vm1505_vm6 = vcmp.lt.f32.partialorder %v1504_v8, %v2804_v5  ;;  %vm1506_vm10 = vcmp.lt.f32.partialorder %v1504_v8, %v2806_v34  ;;  %vm1507_vm15 = vcmp.lt.f32.partialorder %v1504_v8, %v2809_v22  ;;  %vm1510_vm9 = vcmp.eq.f32.partialorder %v1504_v8, %v2809_v22 }
 0x129   :  { %v1503_v13 = vadd.f32 %v2097_v51, %v1478_v11  ;;  %v2098_v15 = vsel %vm1505_vm6, 1.0, %v2212_v30  ;;  %vm1516_vm2 = vmand %vm1510_vm9, %vm1513_vm13  ;;  %v2099_v18 = vsel %vm1506_vm10, 1.0, %v2212_v30  ;;  %vm1530_vm1 = vcmp.lt.f32.partialorder %v1529_v12, %v2804_v5 }
 0x12a   :  { %v1526_v19 = vadd.f32 %v2098_v15, %v1501_v6  ;;  %vm1531_vm3 = vcmp.lt.f32.partialorder %v1529_v12, %v2806_v34  ;;  %vm1519_vm11 = vmor %vm1507_vm15, %vm1516_vm2  ;;  %v1527_v54 = vadd.f32 %v2099_v18, %v1502_v1  ;;  %vm1532_vm12 = vcmp.lt.f32.partialorder %v1529_v12, %v2809_v22 }
 0x12b   :  { %vm1535_vm0 = vcmp.eq.f32.partialorder %v1529_v12, %v2809_v22  ;;  %v2101_v32 = vsel %vm1530_vm1, 1.0, %v2212_v30  ;;  %v2100_v27 = vsel %vm1519_vm11, 1.0, %v2212_v30  ;;  %v2102_v17 = vsel %vm1531_vm3, 1.0, %v2212_v30 }
 0x12c   :  { %vm1541_vm7 = vmand %vm1535_vm0, %vm1538_vm5  ;;  %v1551_v35 = vadd.f32 %v2101_v32, %v1526_v19  ;;  %v1528_v2 = vadd.f32 %v2100_v27, %v1503_v13  ;;  %v1552_v47 = vadd.f32 %v2102_v17, %v1527_v54  ;;  %vm1563_vm14 = vcmp.gt.s32.totalorder %v2814_v60, 22 }
 0x12d   :  { %vm1544_vm4 = vmor %vm1532_vm12, %vm1541_vm7  ;;  %v1579_v29 = vperm.slane %v2809_v22, 7  ;;  %vm1555_vm8 = vcmp.lt.f32.partialorder %v1554_v37, %v2804_v5  ;;  %vm1556_vm13 = vcmp.lt.f32.partialorder %v1554_v37, %v2806_v34  ;;  %vm1557_vm5 = vcmp.lt.f32.partialorder %v1554_v37, %v2809_v22 }
 0x12e   :  { %v2103_v43 = vsel %vm1544_vm4, 1.0, %v2212_v30  ;;  %vm1560_vm6 = vcmp.eq.f32.partialorder %v1554_v37, %v2809_v22  ;;  %v2104_v50 = vsel %vm1555_vm8, 1.0, %v2212_v30  ;;  %v2105_v52 = vsel %vm1556_vm13, 1.0, %v2212_v30 }
 0x12f   :  { %v1553_v49 = vadd.f32 %v2103_v43, %v1528_v2  ;;  %vm1566_vm10 = vmand %vm1560_vm6, %vm1563_vm14  ;;  %v1576_v46 = vadd.f32 %v2104_v50, %v1551_v35  ;;  %v1577_v60 = vadd.f32 %v2105_v52, %v1552_v47  ;;  %vm1580_vm15 = vcmp.lt.f32.partialorder %v1579_v29, %v2804_v5 }
 0x130   :  { %vm1581_vm9 = vcmp.lt.f32.partialorder %v1579_v29, %v2806_v34  ;;  %vm1569_vm2 = vmor %vm1557_vm5, %vm1566_vm10  ;;  %vm1582_vm1 = vcmp.lt.f32.partialorder %v1579_v29, %v2809_v22  ;;  %v2107_v26 = vsel %vm1580_vm15, 1.0, %v2212_v30 }
 0x131   :  { %v2108_v0 = vsel %vm1581_vm9, 1.0, %v2212_v30  ;;  %v2106_v25 = vsel %vm1569_vm2, 1.0, %v2212_v30  ;;  %v2109_v31 = vsel %vm1582_vm1, 1.0, %v2212_v30  ;;  %v3363_v53 = vadd.f32 %v2107_v26, %v1576_v46 }
 0x132   :  { %v3365_v28 = vadd.f32 %v2108_v0, %v1577_v60  ;;  %v1578_v56 = vadd.f32 %v2106_v25, %v1553_v49 }
 0x133   :  { %vm1604_vm3 = vcmp.eq.f32.partialorder %v3363_v53, 0.0  ;;  %vm1629_vm12 = vcmp.eq.f32.partialorder %v3363_v53, 1.0  ;;  %vm1654_vm14 = vcmp.eq.f32.partialorder %v3363_v53, 2.0  ;;  %vm1679_vm5 = vcmp.eq.f32.partialorder %v3363_v53, 3.0 }
 0x134   :  { %vm1605_vm11 = vcmp.eq.f32.partialorder %v3365_v28, 0.0  ;;  %vm1630_vm0 = vcmp.eq.f32.partialorder %v3365_v28, 1.0  ;;  %v3371_v5 = vadd.f32 %v2109_v31, %v1578_v56  ;;  %v1607_v34 = vsel %vm1604_vm3, %v2767_v10, 0.0 }
 0x135   :  { %v1608_v22 = vsel %vm1605_vm11, %v2779_v48, 0.0  ;;  %v1618_v30 = vsel %vm1604_vm3, %v2773_v45, 0.0  ;;  %v1619_v63 = vsel %vm1605_vm11, %v2782_v57, 0.0  ;;  %v1632_v55 = vsel %vm1629_vm12, %v2767_v10, 0.0 }
 0x136   :  { %v1610_v41 = vadd.f32 %v1608_v22, %v1607_v34  ;;  %v1633_v59 = vsel %vm1630_vm0, %v2779_v48, 0.0  ;;  %vm1606_vm7 = vcmp.eq.f32.partialorder %v3371_v5, 0.0  ;;  %v1621_v7 = vadd.f32 %v1619_v63, %v1618_v30 }
 0x137   :  { %vm1631_vm4 = vcmp.eq.f32.partialorder %v3371_v5, 1.0  ;;  %v1635_v61 = vadd.f32 %v1633_v59, %v1632_v55  ;;  %v1609_v39 = vsel %vm1606_vm7, %v2785_v42, 0.0  ;;  %v1620_v44 = vsel %vm1606_vm7, %v2788_v40, 0.0 }
 0x138   :  { %v1634_v21 = vsel %vm1631_vm4, %v2785_v42, 0.0  ;;  %v1643_v9 = vsel %vm1629_vm12, %v2773_v45, 0.0  ;;  %v1611_v23 = vadd.f32 %v1610_v41, %v1609_v39  ;;  %v1622_v38 = vadd.f32 %v1621_v7, %v1620_v44 }
 0x139   :  { %v1636_v33 = vadd.f32 %v1635_v61, %v1634_v21  ;;  %v1644_v36 = vsel %vm1630_vm0, %v2782_v57, 0.0  ;;  %v1645_v58 = vsel %vm1631_vm4, %v2788_v40, 0.0  ;;  %vm1655_vm8 = vcmp.eq.f32.partialorder %v3365_v28, 2.0 }
 0x13a   :  { %v1646_v62 = vadd.f32 %v1644_v36, %v1643_v9  ;;  %v1612_v20 = vrot.slane %v1611_v23, 4  ;;  %v1623_v3 = vrot.slane %v1622_v38, 4  ;;  %vm1656_vm13 = vcmp.eq.f32.partialorder %v3371_v5, 2.0 }
 0x13b   :  { %v1637_v4 = vrot.slane %v1636_v33, 4  ;;  %v1657_v8 = vsel %vm1654_vm14, %v2767_v10, 0.0  ;;  %v1658_v11 = vsel %vm1655_vm8, %v2779_v48, 0.0  ;;  %v1659_v12 = vsel %vm1656_vm13, %v2785_v42, 0.0 }
 0x13c   :  { %v1647_v6 = vadd.f32 %v1646_v62, %v1645_v58  ;;  %v1613_v51 = vadd.f32 %v1612_v20, %v1611_v23  ;;  %v1624_v1 = vadd.f32 %v1623_v3, %v1622_v38  ;;  %v1660_v15 = vadd.f32 %v1658_v11, %v1657_v8 }
 0x13d   :  { %v1638_v13 = vadd.f32 %v1637_v4, %v1636_v33  ;;  %v1668_v19 = vsel %vm1654_vm14, %v2773_v45, 0.0  ;;  %v1669_v54 = vsel %vm1655_vm8, %v2782_v57, 0.0  ;;  %v1670_v32 = vsel %vm1656_vm13, %v2788_v40, 0.0 }
 0x13e   :  { %v1648_v18 = vrot.slane %v1647_v6, 4  ;;  %v1614_v27 = vrot.slane %v1613_v51, 2  ;;  %v1625_v17 = vrot.slane %v1624_v1, 2  ;;  %v1661_v37 = vadd.f32 %v1660_v15, %v1659_v12 }
 0x13f   :  { %v1639_v35 = vrot.slane %v1638_v13, 2  ;;  %v1671_v47 = vadd.f32 %v1669_v54, %v1668_v19  ;;  %vm1680_vm6 = vcmp.eq.f32.partialorder %v3365_v28, 3.0  ;;  %v1682_v25 = vsel %vm1679_vm5, %v2767_v10, 0.0 }
 0x140   :  { %v1649_v2 = vadd.f32 %v1648_v18, %v1647_v6  ;;  %v1615_v29 = vadd.f32 %v1614_v27, %v1613_v51  ;;  %v1626_v43 = vadd.f32 %v1625_v17, %v1624_v1  ;;  %v1662_v50 = vrot.slane %v1661_v37, 4 }
 0x141   :  { %v1640_v49 = vadd.f32 %v1639_v35, %v1638_v13  ;;  %v1672_v46 = vadd.f32 %v1671_v47, %v1670_v32  ;;  %vm1681_vm10 = vcmp.eq.f32.partialorder %v3371_v5, 3.0  ;;  %v1683_v34 = vsel %vm1680_vm6, %v2779_v48, 0.0 }
 0x142   :  { %v1650_v52 = vrot.slane %v1649_v2, 2  ;;  %v1616_v60 = vrot.slane %v1615_v29, 1  ;;  %v1627_v26 = vrot.slane %v1626_v43, 1  ;;  %v1663_v0 = vadd.f32 %v1662_v50, %v1661_v37 }
 0x143   :  { %v1673_v56 = vrot.slane %v1672_v46, 4  ;;  %v1641_v30 = vrot.slane %v1640_v49, 1  ;;  %v1684_v63 = vsel %vm1681_vm10, %v2785_v42, 0.0  ;;  %v1685_v7 = vadd.f32 %v1683_v34, %v1682_v25 }
 0x144   :  { %v1651_v31 = vadd.f32 %v1650_v52, %v1649_v2  ;;  %v3413_v22 = vadd.f32 %v1616_v60, %v1615_v29  ;;  %v1664_v41 = vrot.slane %v1663_v0, 2  ;;  %v3416_v55 = vadd.f32 %v1627_v26, %v1626_v43 }
 0x145   :  { %v1674_v59 = vadd.f32 %v1673_v56, %v1672_v46  ;;  %v1693_v61 = vsel %vm1679_vm5, %v2773_v45, 0.0  ;;  %v1694_v21 = vsel %vm1680_vm6, %v2782_v57, 0.0  ;;  %v1695_v9 = vsel %vm1681_vm10, %v2788_v40, 0.0 }
 0x146   :  { %v1652_v39 = vrot.slane %v1651_v31, 1  ;;  %v1665_v44 = vadd.f32 %v1664_v41, %v1663_v0  ;;  %v1686_v38 = vadd.f32 %v1685_v7, %v1684_v63  ;;  %v1696_v33 = vadd.f32 %v1694_v21, %v1693_v61 }
 0x147   :  { %v1675_v23 = vrot.slane %v1674_v59, 2  ;;  %vm1704_vm15 = vcmp.eq.f32.partialorder %v3363_v53, 4.0  ;;  %v3426_v36 = vadd.f32 %v1641_v30, %v1640_v49  ;;  %vm1705_vm9 = vcmp.eq.f32.partialorder %v3365_v28, 4.0 }
 0x148   :  { %vm1706_vm2 = vcmp.eq.f32.partialorder %v3371_v5, 4.0  ;;  %v1707_v58 = vsel %vm1704_vm15, %v2767_v10, 0.0  ;;  %v1687_v20 = vrot.slane %v1686_v38, 4  ;;  %v1697_v3 = vadd.f32 %v1696_v33, %v1695_v9 }
 0x149   :  { %v1676_v62 = vadd.f32 %v1675_v23, %v1674_v59  ;;  %v1708_v4 = vsel %vm1705_vm9, %v2779_v48, 0.0  ;;  %v3432_v6 = vadd.f32 %v1652_v39, %v1651_v31  ;;  %v1709_v8 = vsel %vm1706_vm2, %v2785_v42, 0.0 }
 0x14a   :  { %v1710_v11 = vadd.f32 %v1708_v4, %v1707_v58  ;;  %v1718_v12 = vsel %vm1704_vm15, %v2773_v45, 0.0  ;;  %v1666_v51 = vrot.slane %v1665_v44, 1  ;;  %v1688_v1 = vadd.f32 %v1687_v20, %v1686_v38 }
 0x14b   :  { %v1698_v13 = vrot.slane %v1697_v3, 4  ;;  %v1719_v15 = vsel %vm1705_vm9, %v2782_v57, 0.0  ;;  %v1677_v18 = vrot.slane %v1676_v62, 1  ;;  %v1720_v54 = vsel %vm1706_vm2, %v2788_v40, 0.0 }
 0x14c   :  { %v1711_v19 = vadd.f32 %v1710_v11, %v1709_v8  ;;  %v1721_v32 = vadd.f32 %v1719_v15, %v1718_v12  ;;  %v1689_v27 = vrot.slane %v1688_v1, 2  ;;  %vm1729_vm1 = vcmp.eq.f32.partialorder %v3363_v53, 5.0 }
 0x14d   :  { %v1699_v17 = vadd.f32 %v1698_v13, %v1697_v3  ;;  %vm1730_vm3 = vcmp.eq.f32.partialorder %v3365_v28, 5.0  ;;  %vm1731_vm11 = vcmp.eq.f32.partialorder %v3371_v5, 5.0  ;;  %v1732_v2 = vsel %vm1729_vm1, %v2767_v10, 0.0 }
 0x14e   :  { %v1712_v35 = vrot.slane %v1711_v19, 4  ;;  %v1722_v37 = vadd.f32 %v1721_v32, %v1720_v54  ;;  %v1690_v47 = vadd.f32 %v1689_v27, %v1688_v1  ;;  %v1733_v43 = vsel %vm1730_vm3, %v2779_v48, 0.0 }
 0x14f   :  { %v1700_v29 = vrot.slane %v1699_v17, 2  ;;  %v1734_v49 = vsel %vm1731_vm11, %v2785_v42, 0.0  ;;  %v1735_v46 = vadd.f32 %v1733_v43, %v1732_v2  ;;  %v1743_v60 = vsel %vm1729_vm1, %v2773_v45, 0.0 }
 0x150   :  { %v1713_v50 = vadd.f32 %v1712_v35, %v1711_v19  ;;  %v1723_v52 = vrot.slane %v1722_v37, 4  ;;  %v1691_v26 = vrot.slane %v1690_v47, 1  ;;  %v1744_v25 = vsel %vm1730_vm3, %v2782_v57, 0.0 }
 0x151   :  { %v1701_v0 = vadd.f32 %v1700_v29, %v1699_v17  ;;  %v1745_v31 = vsel %vm1731_vm11, %v2788_v40, 0.0  ;;  %v1736_v30 = vadd.f32 %v1735_v46, %v1734_v49  ;;  %v1746_v41 = vadd.f32 %v1744_v25, %v1743_v60 }
 0x152   :  { %v1714_v56 = vrot.slane %v1713_v50, 2  ;;  %v1724_v34 = vadd.f32 %v1723_v52, %v1722_v37  ;;  %v3451_v63 = vadd.f32 %v1666_v51, %v1665_v44  ;;  %vm1754_vm12 = vcmp.eq.f32.partialorder %v3363_v53, 6.0 }
 0x153   :  { %v1702_v59 = vrot.slane %v1701_v0, 1  ;;  %vm1755_vm0 = vcmp.eq.f32.partialorder %v3365_v28, 6.0  ;;  %v1737_v39 = vrot.slane %v1736_v30, 4  ;;  %v1747_v21 = vadd.f32 %v1746_v41, %v1745_v31 }
 0x154   :  { %v1715_v7 = vadd.f32 %v1714_v56, %v1713_v50  ;;  %v1725_v61 = vrot.slane %v1724_v34, 2  ;;  %v3455_v9 = vadd.f32 %v1677_v18, %v1676_v62  ;;  %v3457_v23 = vadd.f32 %v1691_v26, %v1690_v47 }
 0x155   :  { %v1757_v38 = vsel %vm1754_vm12, %v2767_v10, 0.0  ;;  %v1758_v44 = vsel %vm1755_vm0, %v2779_v48, 0.0  ;;  %v1738_v58 = vadd.f32 %v1737_v39, %v1736_v30  ;;  %v1748_v20 = vrot.slane %v1747_v21, 4 }
 0x156   :  { %v1726_v33 = vadd.f32 %v1725_v61, %v1724_v34  ;;  %vm1756_vm7 = vcmp.eq.f32.partialorder %v3371_v5, 6.0  ;;  %v1760_v4 = vadd.f32 %v1758_v44, %v1757_v38  ;;  %v1768_v62 = vsel %vm1754_vm12, %v2773_v45, 0.0 }
 0x157   :  { %v1759_v3 = vsel %vm1756_vm7, %v2785_v42, 0.0  ;;  %v1769_v8 = vsel %vm1755_vm0, %v2782_v57, 0.0  ;;  %v3473_v11 = vadd.f32 %v1702_v59, %v1701_v0  ;;  %v1716_v12 = vrot.slane %v1715_v7, 1 }
 0x158   :  { %v1739_v51 = vrot.slane %v1738_v58, 2  ;;  %v1749_v1 = vadd.f32 %v1748_v20, %v1747_v21  ;;  %v1727_v13 = vrot.slane %v1726_v33, 1  ;;  %v1761_v15 = vadd.f32 %v1760_v4, %v1759_v3 }
 0x159   :  { %v1770_v18 = vsel %vm1756_vm7, %v2788_v40, 0.0  ;;  %v1771_v19 = vadd.f32 %v1769_v8, %v1768_v62  ;;  %vm1779_vm4 = vcmp.eq.f32.partialorder %v3363_v53, 7.0  ;;  %vm1780_vm14 = vcmp.eq.f32.partialorder %v3365_v28, 7.0 }
 0x15a   :  { %v1740_v54 = vadd.f32 %v1739_v51, %v1738_v58  ;;  %v1750_v32 = vrot.slane %v1749_v1, 2  ;;  %v1762_v27 = vrot.slane %v1761_v15, 4  ;;  %vm1781_vm8 = vcmp.eq.f32.partialorder %v3371_v5, 7.0 }
 0x15b   :  { %v1772_v17 = vadd.f32 %v1771_v19, %v1770_v18  ;;  %v1782_v35 = vsel %vm1779_vm4, %v2767_v10, 0.0  ;;  %v3480_v37 = vadd.f32 %v1716_v12, %v1715_v7  ;;  %v1783_v47 = vsel %vm1780_vm14, %v2779_v48, 0.0 }
 0x15c   :  { %v1751_v2 = vadd.f32 %v1750_v32, %v1749_v1  ;;  %v1784_v29 = vsel %vm1781_vm8, %v2785_v42, 0.0  ;;  %v1763_v43 = vadd.f32 %v1762_v27, %v1761_v15  ;;  %v1785_v50 = vadd.f32 %v1783_v47, %v1782_v35 }
 0x15d   :  { %v1773_v49 = vrot.slane %v1772_v17, 4  ;;  %v1793_v52 = vsel %vm1779_vm4, %v2773_v45, 0.0  ;;  %v3485_v46 = vadd.f32 %v1727_v13, %v1726_v33  ;;  %v1741_v60 = vrot.slane %v1740_v54, 1 }
 0x15e   :  { %v1794_v26 = vsel %vm1780_vm14, %v2782_v57, 0.0  ;;  %v1795_v0 = vsel %vm1781_vm8, %v2788_v40, 0.0  ;;  %v1764_v25 = vrot.slane %v1763_v43, 2  ;;  %v1786_v56 = vadd.f32 %v1785_v50, %v1784_v29 }
 0x15f   :  { %v1774_v31 = vadd.f32 %v1773_v49, %v1772_v17  ;;  %v1796_v34 = vadd.f32 %v1794_v26, %v1793_v52  ;;  %v1752_v30 = vrot.slane %v1751_v2, 1  ;;  %vm1804_vm13 = vcmp.eq.f32.partialorder %v3363_v53, 8.0 }
 0x160   :  { %vm1805_vm5 = vcmp.eq.f32.partialorder %v3365_v28, 8.0  ;;  %vm1806_vm6 = vcmp.eq.f32.partialorder %v3371_v5, 8.0  ;;  %v1765_v41 = vadd.f32 %v1764_v25, %v1763_v43  ;;  %v1787_v7 = vrot.slane %v1786_v56, 4 }
 0x161   :  { %v1775_v59 = vrot.slane %v1774_v31, 2  ;;  %v1797_v61 = vadd.f32 %v1796_v34, %v1795_v0  ;;  %v1807_v39 = vsel %vm1804_vm13, %v2767_v10, 0.0  ;;  %v1808_v21 = vsel %vm1805_vm5, %v2779_v48, 0.0 }
 0x162   :  { %v1809_v38 = vsel %vm1806_vm6, %v2785_v42, 0.0  ;;  %v1818_v53 = vsel %vm1804_vm13, %v2773_v45, 0.0  ;;  %v1766_v44 = vrot.slane %v1765_v41, 1  ;;  %v1788_v58 = vadd.f32 %v1787_v7, %v1786_v56 }
 0x163   :  { %v1776_v33 = vadd.f32 %v1775_v59, %v1774_v31  ;;  %v1798_v20 = vrot.slane %v1797_v61, 4  ;;  %v3500_v3 = vadd.f32 %v1741_v60, %v1740_v54  ;;  %v1810_v4 = vadd.f32 %v1808_v21, %v1807_v39 }
 0x164   :  { %v1819_v10 = vsel %vm1805_vm5, %v2782_v57, 0.0  ;;  %v1829_v48 = vmul.f32 %v3432_v6, %v3413_v22  ;;  %v1789_v8 = vrot.slane %v1788_v58, 2  ;;  %v1820_v45 = vsel %vm1806_vm6, %v2788_v40, 0.0 }
 0x165   :  { %v1777_v62 = vrot.slane %v1776_v33, 1  ;;  %v1799_v12 = vadd.f32 %v1798_v20, %v1797_v61  ;;  %v1811_v42 = vadd.f32 %v1810_v4, %v1809_v38  ;;  %v1821_v51 = vadd.f32 %v1819_v10, %v1818_v53 }
 0x166   :  { %v1830_v1 = vmul.f32 %v3426_v36, %v3416_v55  ;;  %v1832_v13 = vmul.f32 %v3455_v9, %v3426_v36  ;;  %v3514_v28 = vadd.f32 %v1752_v30, %v1751_v2  ;;  %v3516_v57 = vadd.f32 %v1766_v44, %v1765_v41 }
 0x167   :  { %v1790_v15 = vadd.f32 %v1789_v8, %v1788_v58  ;;  %v1800_v18 = vrot.slane %v1799_v12, 2  ;;  %v1812_v19 = vrot.slane %v1811_v42, 4  ;;  %v1822_v54 = vadd.f32 %v1821_v51, %v1820_v45 }
 0x168   :  { %v1831_v32 = vsub.f32 %v1829_v48, %v1830_v1  ;;  %v1834_v40 = vmul.f32 %v3451_v63, %v3432_v6  ;;  %v3520_v5 = vadd.f32 %v1777_v62, %v1776_v33  ;;  %v1836_v35 = vmul.f32 %v3473_v11, %v3451_v63 }
 0x169   :  { %v1791_v27 = vrot.slane %v1790_v15, 1  ;;  %v1801_v17 = vadd.f32 %v1800_v18, %v1799_v12  ;;  %v1813_v47 = vadd.f32 %v1812_v19, %v1811_v42  ;;  %v1823_v2 = vrot.slane %v1822_v54, 4 }
 0x16a   :  { %v1833_v29 = vadd.f32 %v1832_v13, %v1831_v32  ;;  %v1838_v43 = vmul.f32 %v3457_v23, %v3455_v9  ;;  %v1840_v52 = vmul.f32 %v3485_v46, %v3457_v23  ;;  %v1842_v60 = vmul.f32 %v3480_v37, %v3473_v11 }
 0x16b   :  { %v3526_v49 = vadd.f32 %v1791_v27, %v1790_v15  ;;  %v1802_v50 = vrot.slane %v1801_v17, 1  ;;  %v1814_v26 = vrot.slane %v1813_v47, 2  ;;  %v1824_v0 = vadd.f32 %v1823_v2, %v1822_v54 }
 0x16c   :  { %v1835_v25 = vsub.f32 %v1833_v29, %v1834_v40  ;;  %v1844_v31 = vmul.f32 %v3514_v28, %v3480_v37  ;;  %v1846_v34 = vmul.f32 %v3500_v3, %v3485_v46  ;;  %v1848_v30 = vmul.f32 %v3520_v5, %v3500_v3 }
 0x16d   :  { %v3534_v56 = vadd.f32 %v1802_v50, %v1801_v17  ;;  %v1860_v41 = vmul.f32 0.0, %v2796_v14  ;;  %v1815_v59 = vadd.f32 %v1814_v26, %v1813_v47  ;;  %v1825_v7 = vrot.slane %v1824_v0, 2  ;;  %v30_v17 = vld [vmem:[#allocation2 + $0x5] sm:$0x1]  ;;  %v34_v50 = vld [vmem:[#allocation2 + $0x9] sm:$0x1] }
 0x16e   :  { %v1837_v61 = vadd.f32 %v1836_v35, %v1835_v25  ;;  %vm1861_vm10 = vcmp.eq.f32.partialorder %v2796_v14, 1.0  ;;  %v3544_v39 = vmul.f32 %v3516_v57, %v3514_v28  ;;  %vm1866_vm15 = vcmp.eq.f32.partialorder %v2796_v14, 2.0  ;;  %v3568_v35 = vld [vmem:[#allocation2 + $0xc] sm:$0x1] }
 0x16f   :  { %v1862_v21 = vsel %vm1861_vm10, %v3413_v22, 0.0  ;;  %v1864_v38 = vsel %vm1861_vm10, %v3416_v55, 0.0  ;;  %v1826_v53 = vadd.f32 %v1825_v7, %v1824_v0  ;;  %v3551_v33 = vmul.f32 %v3526_v49, %v3520_v5 }
 0x170   :  { %v1839_v44 = vsub.f32 %v1837_v61, %v1838_v43  ;;  %v1863_v58 = vadd.f32 %v1862_v21, %v1860_v41  ;;  %v1865_v20 = vadd.f32 %v1864_v38, %v1860_v41  ;;  %v1867_v4 = vsel %vm1866_vm15, %v3426_v36, 0.0 }
 0x171   :  { %v1869_v10 = vsel %vm1866_vm15, %v3432_v6, 0.0  ;;  %vm1871_vm9 = vcmp.eq.f32.partialorder %v2796_v14, 3.0  ;;  %v1816_v48 = vrot.slane %v1815_v59, 1  ;;  %v1827_v62 = vrot.slane %v1826_v53, 1 }
 0x172   :  { %v1841_v8 = vadd.f32 %v1840_v52, %v1839_v44  ;;  %v1868_v12 = vadd.f32 %v1867_v4, %v1863_v58  ;;  %v1870_v45 = vadd.f32 %v1869_v10, %v1865_v20  ;;  %v1872_v42 = vsel %vm1871_vm9, %v3451_v63, 0.0  ;;  %v3584_v20 = vld [vmem:[#allocation2 + $0xa] sm:$0x1] }
 0x173   :  { %v1874_v51 = vsel %vm1871_vm9, %v3455_v9, 0.0  ;;  %vm1876_vm2 = vcmp.eq.f32.partialorder %v2796_v14, 4.0  ;;  %v1828_v1 = vadd.f32 %v1827_v62, %v1826_v53  ;;  %v1852_v36 = vmul.f32 %v3534_v56, %v3516_v57 }
 0x174   :  { %v1843_v13 = vsub.f32 %v1841_v8, %v1842_v60  ;;  %v1873_v15 = vadd.f32 %v1872_v42, %v1868_v12  ;;  %v1875_v6 = vadd.f32 %v1874_v51, %v1870_v45  ;;  %v1877_v18 = vsel %vm1876_vm2, %v3457_v23, 0.0 }
 0x175   :  { %v1879_v19 = vsel %vm1876_vm2, %v3473_v11, 0.0  ;;  %vm1881_vm1 = vcmp.eq.f32.partialorder %v2796_v14, 5.0  ;;  %v1817_v54 = vadd.f32 %v1816_v48, %v1815_v59  ;;  %vm1886_vm3 = vcmp.eq.f32.partialorder %v2796_v14, 6.0  ;;  %v3581_v59 = vld [vmem:[#allocation2 + $0x3] sm:$0x1] }
 0x176   :  { %v1845_v32 = vadd.f32 %v1844_v31, %v1843_v13  ;;  %v1878_v63 = vadd.f32 %v1877_v18, %v1873_v15  ;;  %v1882_v9 = vsel %vm1881_vm1, %v3480_v37, 0.0  ;;  %v1880_v40 = vadd.f32 %v1879_v19, %v1875_v6 }
 0x177   :  { %v1884_v27 = vsel %vm1881_vm1, %v3485_v46, 0.0  ;;  %vm1891_vm11 = vcmp.eq.f32.partialorder %v2796_v14, 7.0  ;;  %v1887_v11 = vsel %vm1886_vm3, %v3500_v3, 0.0  ;;  %v1889_v2 = vsel %vm1886_vm3, %v3514_v28, 0.0  ;;  %v27_v46 = vld [vmem:[#allocation2 + $0x2] sm:$0x1] }
 0x178   :  { %v1847_v23 = vsub.f32 %v1845_v32, %v1846_v34  ;;  %v1883_v47 = vadd.f32 %v1882_v9, %v1878_v63  ;;  %v1856_v29 = vmul.f32 %v1828_v1, %v3526_v49  ;;  %v1885_v43 = vadd.f32 %v1884_v27, %v1880_v40 }
 0x179   :  { %v1892_v37 = vsel %vm1891_vm11, %v3516_v57, 0.0  ;;  %vm1896_vm12 = vcmp.eq.f32.partialorder %v2796_v14, 8.0  ;;  %v1894_v26 = vsel %vm1891_vm11, %v3520_v5, 0.0  ;;  %vm1901_vm0 = vcmp.eq.f32.partialorder %v2796_v14, 9.0 }
 0x17a   :  { %v1849_v52 = vadd.f32 %v1848_v30, %v1847_v23  ;;  %v1888_v60 = vadd.f32 %v1887_v11, %v1883_v47  ;;  %v1897_v0 = vsel %vm1896_vm12, %v3526_v49, 0.0  ;;  %v1890_v25 = vadd.f32 %v1889_v2, %v1885_v43  ;;  %v29_v30 = vld [vmem:[#allocation2 + $0x4] sm:$0x1] }
 0x17b   :  { %v1912_v3 = vmul.f32 0.5, %v30_v17  ;;  %v1915_v28 = vmul.f32 0.5, %v3568_v35  ;;  %v1899_v57 = vsel %vm1896_vm12, %v3534_v56, 0.0  ;;  %v1902_v41 = vsel %vm1901_vm0, %v1817_v54, 0.0 }
 0x17c   :  { %v1851_v31 = vsub.f32 %v1849_v52, %v3544_v39  ;;  %v1893_v34 = vadd.f32 %v1892_v37, %v1888_v60  ;;  %v1895_v7 = vadd.f32 %v1894_v26, %v1890_v25  ;;  %v1904_v61 = vsel %vm1901_vm0, %v1828_v1, 0.0  ;;  %v36_v39 = vld [vmem:[#allocation2 + $0xb] sm:$0x1] }
 0x17d   :  { %v1913_v5 = vadd.f32 %v1912_v3, %v27_v46  ;;  %v1916_v21 = vadd.f32 %v1915_v28, %v34_v50  ;;  %v1914_v53 = vsub.f32 %v27_v46, %v1912_v3  ;;  %v1917_v14 = vsub.f32 %v34_v50, %v1915_v28 }
 0x17e   :  { %v1853_v49 = vadd.f32 %v1852_v36, %v1851_v31  ;;  %v1898_v38 = vadd.f32 %v1897_v0, %v1893_v34  ;;  %v1900_v44 = vadd.f32 %v1899_v57, %v1895_v7  ;;  %v1929_v58 = vrot.slane %v2438_v16, 4 }
 0x17f   :  { %v1858_v10 = vmul.f32 %v1817_v54, %v3534_v56  ;;  %v1923_v62 = vmul.f32 %v29_v30, %v3581_v59  ;;  %v1918_v12 = vmin.f32 %v1913_v5, %v1916_v21  ;;  %v1919_v13 = vmax.f32 %v1914_v53, %v1917_v14 }
 0x180   :  { %v1855_v4 = vsub.f32 %v1853_v49, %v3551_v33  ;;  %v1903_v48 = vadd.f32 %v1902_v41, %v1898_v38  ;;  %v1905_v8 = vadd.f32 %v1904_v61, %v1900_v44  ;;  %v1930_v45 = vmax.f32 %v2438_v16, %v1929_v58  ;;  %v25_v61 = vld [vmem:[#allocation2] sm:$0x1]  ;;  %v33_v49 = vld [vmem:[#allocation2 + $0x8] sm:$0x1] }
 0x181   :  { %v1936_v42 = vmin.f32 %v2438_v16, %v1929_v58  ;;  %v1941_v36 = vrot.slane %v2440_v24, 4  ;;  %v1925_v15 = vmul.f32 %v36_v39, %v3584_v20  ;;  %v1924_v32 = vmul.f32 %v1923_v62, %v30_v17 }
 0x182   :  { %v1857_v51 = vadd.f32 %v1856_v29, %v1855_v4  ;;  %v1906_v1 = vmul.f32 %v1903_v48, %v3416_v55  ;;  %v1931_v33 = vrot.slane %v1930_v45, 2  ;;  %v1908_v18 = vmul.f32 %v1905_v8, %v3413_v22 }
 0x183   :  { %v1937_v6 = vrot.slane %v1936_v42, 2  ;;  %v1942_v19 = vmax.f32 %v2440_v24, %v1941_v36  ;;  %v1948_v54 = vmin.f32 %v2440_v24, %v1941_v36  ;;  %v1920_v40 = vsub.f32 %v1918_v12, %v1919_v13 }
 0x184   :  { %v1859_v56 = vsub.f32 %v1857_v51, %v1858_v10  ;;  %v1932_v63 = vmax.f32 %v1930_v45, %v1931_v33  ;;  %v1926_v23 = vmul.f32 %v1925_v15, %v3568_v35  ;;  %v1953_v2 = vmax.f32 %v1913_v5, %v1916_v21  ;;  %v26_v5 = vld [vmem:[#allocation2 + $0x1] sm:$0x1]  ;;  %v32_v21 = vld [vmem:[#allocation2 + $0x7] sm:$0x1] }
 0x185   :  { %v1938_v16 = vmin.f32 %v1936_v42, %v1937_v6  ;;  %v1943_v55 = vrot.slane %v1942_v19, 2  ;;  %v1949_v27 = vrot.slane %v1948_v54, 2  ;;  %v1954_v22 = vmin.f32 %v1914_v53, %v1917_v14 }
 0x186   :  { %v1907_v9 = vadd.f32 %v1906_v1, %v1859_v56  ;;  %v1933_v47 = vrot.slane %v1932_v63, 1  ;;  %v1921_v24 = vmax.f32 %v1920_v40, 0.0  ;;  %v1927_v26 = vadd.f32 %v1926_v23, %v1924_v32 }
 0x187   :  { %v1939_v11 = vrot.slane %v1938_v16, 1  ;;  %v1944_v43 = vmax.f32 %v1942_v19, %v1943_v55  ;;  %v1950_v37 = vmin.f32 %v1948_v54, %v1949_v27  ;;  %v1968_v31 = vsub.f32 %v1954_v22, %v1953_v2 }
 0x188   :  { %v1909_v29 = vsub.f32 %v1907_v9, %v1908_v18  ;;  %v1934_v46 = vmax.f32 %v1932_v63, %v1933_v47  ;;  %v1955_v14 = vsub.f32 %v25_v61, %v32_v21  ;;  %v1957_v44 = vsub.f32 %v26_v5, %v33_v49 }
 0x189   :  { %v1940_v50 = vmin.f32 %v1938_v16, %v1939_v11  ;;  %v1945_v17 = vrot.slane %v1944_v43, 1  ;;  %v1951_v60 = vrot.slane %v1950_v37, 1  ;;  %v1969_v7 = vmul.f32 %v1968_v31, %v1968_v31 }
 0x18a   :  { %v1910_v52 = vand.u32 2147483647, %v1909_v29  ;;  %v1956_v39 = vmul.f32 %v1955_v14, %v1955_v14  ;;  %v1958_v4 = vmul.f32 %v1957_v44, %v1957_v44  ;;  %v1960_v10 = vsub.f32 %v3581_v59, %v3584_v20 }
 0x18b   :  { %v1963_v0 = vsub.f32 %v1940_v50, %v1934_v46  ;;  %v1946_v3 = vmax.f32 %v1944_v43, %v1945_v17  ;;  %v1952_v28 = vmin.f32 %v1950_v37, %v1951_v60 }
 0x18c   :  { %v1911_v25 = vmul.f32 0.5, %v1910_v52  ;;  %v1959_v42 = vadd.f32 %v1958_v4, %v1956_v39  ;;  %v1961_v51 = vmul.f32 %v1960_v10, %v1960_v10 }
 0x18d   :  { %v1964_v34 = vmul.f32 %v1963_v0, %v1963_v0  ;;  %v1965_v57 = vsub.f32 %v1952_v28, %v1946_v3 }
 0x18e   :  { %v1922_v35 = vmul.f32 %v1921_v24, %v1911_v25  ;;  %v1962_v54 = vadd.f32 %v1961_v51, %v1959_v42 }
 0x18f   :  { %v1966_v30 = vmul.f32 %v1965_v57, %v1965_v57 }
 0x190   :  { %v1928_v41 = vsub.f32 %v1927_v26, %v1922_v35 }
 0x191   :  { %v1967_v38 = vadd.f32 %v1966_v30, %v1964_v34 }
 0x192   :  { %2144 = vrcp.f32 %v1928_v41  ;;  %v1980_v62 = vand.u32 2147483647, %v1928_v41  ;;  %v1982_v8 = vand.u32 2147483648, %v1928_v41  ;;  %vm1976_vm7 = vweird.f32 %v1928_v41 }
 0x193   :  { %v1970_v53 = vadd.f32 %v1969_v7, %v1967_v38 }
 0x194   :  { %vm1981_vm8 = vcmp.eq.f32.partialorder %v1980_v62, 8.507059e+37  ;;  %v1983_v36 = vor.u32 1.1754944e-38, %v1982_v8 }
 0x195   :  { %2146 = vrcp.f32 %v1970_v53  ;;  %vm1991_vm13 = vweird.f32 %v1970_v53  ;;  %v1997_v15 = vand.u32 2147483648, %v1970_v53  ;;  %v1995_v59 = vand.u32 2147483647, %v1970_v53 }
 0x197   :  { %v1998_v19 = vor.u32 1.1754944e-38, %v1997_v15  ;;  %vm1996_vm10 = vcmp.eq.f32.partialorder %v1995_v59, 8.507059e+37 }
 0x198   :  { %v2145_v58 = vpop.eup %2144 }
 0x199   :  { %v1972_v48 = vmul.f32 %v2145_v58, %v1928_v41  ;;  %vm1977_vm4 = vweird.f32 %v2145_v58 }
 0x19a   :  { %vm1978_vm14 = vmor %vm1976_vm7, %vm1977_vm4 }
 0x19b   :  { %v1973_v12 = vsub.f32 1.0, %v1972_v48  ;;  %v2147_v45 = vpop.eup %2146 }
 0x19c   :  { %v1987_v13 = vmul.f32 %v2147_v45, %v1970_v53  ;;  %vm1992_vm5 = vweird.f32 %v2147_v45 }
 0x19d   :  { %v1974_v1 = vmul.f32 %v2145_v58, %v1973_v12  ;;  %vm1993_vm6 = vmor %vm1991_vm13, %vm1992_vm5 }
 0x19e   :  { %v1988_v6 = vsub.f32 1.0, %v1987_v13 }
 0x19f   :  { %v1975_v33 = vadd.f32 %v2145_v58, %v1974_v1 }
 0x1a0   :  { %v1989_v56 = vmul.f32 %v2147_v45, %v1988_v6 }
 0x1a1   :  { %v1979_v20 = vsel %vm1978_vm14, %v2145_v58, %v1975_v33 }
 0x1a2   :  { %v1984_v18 = vsel %vm1981_vm8, %v1983_v36, %v1979_v20  ;;  %v1990_v63 = vadd.f32 %v2147_v45, %v1989_v56 }
 0x1a3   :  { %v1985_v32 = vmul.f32 %v1984_v18, %v1922_v35 }
 0x1a4   :  { %v1994_v16 = vsel %vm1993_vm6, %v2147_v45, %v1990_v63 }
 0x1a5   :  { %v2004_v9 = vsub.f32 1.0, %v1985_v32  ;;  %v1999_v40 = vsel %vm1996_vm10, %v1998_v19, %v1994_v16 }
 0x1a6   :  { %v2000_v55 = vmul.f32 %v1999_v40, %v1962_v54 }
 0x1a7   :  { %2005 = vst [vmem:[#allocation5 + $0x1] sm:$0x1] %v2004_v9 }
 0x1a8   :  { %v2001_v27 = vsub.f32 %v1985_v32, %v2000_v55 }
 0x1aa   :  { %v2002_v23 = vsub.f32 1.0, %v2001_v27 }
 0x1ac   :  { %2003 = vst [vmem:[#allocation5] sm:$0x1] %v2002_v23 }
 0x1ad   :  { %2016 = dma.vmem_to_hbm [thread:$0]  %s2012_s13, 32, %s2014_s16, [#allocation4]  }
 0x1ae   :  { %2198 = dma.done.wait [#allocation4], 32  }
 0x1af   :  { %2199 = vsyncadd [#allocation4], 4294967264 }
 0x1b0   :  { %2021 = vsyncpa [#allocation3], 1 }
 0x1b1   :  { %2022 = vsyncpa [#allocation4], 1 }

</bundles_post_ra>
